<compile_context>
chip_gen: v6e
topology: v6e:2x2x1
jax: 0.10.0
libtpu: 0.0.40
codegen_flags: <defaults>
</compile_context>

<pallas_src>
import jax
import jax.numpy as jnp
from jax.experimental import pallas as pl
from jax.experimental.pallas import tpu as pltpu

N_EMBD = 128          # small, MXU/lane friendly stand-in for 768
N_HEAD = 4            # small stand-in for 12; head_size = 32 (even, as asserted)
HEAD_SIZE = N_EMBD // N_HEAD
LN_EPS = 1e-5


def _block_kernel(x_ref, mask_ref, g1_ref, b1_ref, wk_ref, wv_ref, wp_ref,
                  bp_ref, cos_ref, sin_ref, g2_ref, b2_ref,
                  w1_ref, bb1_ref, w2_ref, bb2_ref, o_ref, att_ref):
    BB, T, C = x_ref.shape
    M = BB * T
    D = C // N_HEAD

    # Flatten batch*seq into the matmul M dimension (lane dim C unchanged).
    x = x_ref[...].reshape(M, C)

    # ---- LayerNorm 1 ----
    mu = jnp.mean(x, axis=-1, keepdims=True)
    var = jnp.mean((x - mu) ** 2, axis=-1, keepdims=True)
    xn = (x - mu) * jax.lax.rsqrt(var + LN_EPS) * g1_ref[...] + b1_ref[...]

    # ---- rotations ----
    cos_f = cos_ref[...]                      # (M, C) position tables, batch-tiled
    sin_f = sin_ref[...]
    cos2 = cos_f * cos_f - sin_f * sin_f      # cos(2f)
    sin2 = 2.0 * cos_f * sin_f                # sin(2f)

    lane = jax.lax.broadcasted_iota(jnp.int32, (M, C), 1)
    odd = (lane & 1) == 1

    def rot_half(z):
        # per pair: (z0, z1) -> (-z1, z0)  via XLU lane rolls + VPU select.
        return jnp.where(odd, pltpu.roll(z, 1, 1), -pltpu.roll(z, C - 1, 1))

    k0 = jnp.dot(xn, wk_ref[...], preferred_element_type=jnp.float32)
    rk0 = rot_half(k0)
    k = k0 * cos_f + rk0 * sin_f              # rot(key(x))
    q = k0 * cos2 + rk0 * sin2                # rot(rot(key(x)))  -- fused double rotation
    v = jnp.dot(xn, wv_ref[...], preferred_element_type=jnp.float32)

    scale = 1.0 / (C ** 0.5)                  # C == n_embd, as in the reference
    mask_add = mask_ref[...]                  # causal (-1e30) + user mask, pre-folded

    # Per-batch, per-head attention; head outputs go into a VMEM scratch slab
    # so the output projection is a single (M, C) x (C, C) matmul (no concat).
    for bb in range(BB):
        r0 = bb * T
        for h in range(N_HEAD):
            c0 = h * D
            qh = q[r0:r0 + T, c0:c0 + D]
            kh = k[r0:r0 + T, c0:c0 + D]
            vh = v[r0:r0 + T, c0:c0 + D]
            wei = jnp.dot(qh, kh.T, preferred_element_type=jnp.float32) * scale
            wei = wei + mask_add
            m = jnp.max(wei, axis=-1, keepdims=True)
            e = jnp.exp(wei - m)
            inv = pl.reciprocal(jnp.sum(e, axis=-1, keepdims=True), approx=True)
            att_ref[r0:r0 + T, c0:c0 + D] = jnp.dot(
                e * inv, vh, preferred_element_type=jnp.float32)

    sa = jnp.dot(att_ref[...], wp_ref[...],
                 preferred_element_type=jnp.float32) + bp_ref[...]

    # ---- first residual ----
    x1 = sa + x

    # ---- LayerNorm 2 ----
    mu2 = jnp.mean(x1, axis=-1, keepdims=True)
    var2 = jnp.mean((x1 - mu2) ** 2, axis=-1, keepdims=True)
    x2 = (x1 - mu2) * jax.lax.rsqrt(var2 + LN_EPS) * g2_ref[...] + b2_ref[...]

    # ---- feed-forward; second residual adds the post-norm tensor (as in ref) ----
    hdn = jnp.dot(x2, w1_ref[...], preferred_element_type=jnp.float32) + bb1_ref[...]
    hdn = jnp.maximum(hdn, 0.0)
    ff = jnp.dot(hdn, w2_ref[...], preferred_element_type=jnp.float32) + bb2_ref[...]
    o_ref[...] = (ff + x2).reshape(BB, T, C)


def block_forward(x, params, attn_mask=None, batch_block=None):
    B, T, C = x.shape
    g1, b1, wk, wv, wp, bp, g2, b2, w1, bb1, w2, bb2 = params
    D = C // N_HEAD

    # Batch blocking: flatten BB batches per grid step into the matmul M dim,
    # but keep >= 2 grid blocks when possible so v7x megacore can shard them.
    if batch_block is None:
        batch_block = B // 2 if (B % 2 == 0 and B >= 2) else 1
    BB = batch_block
    assert B % BB == 0
    G = B // BB

    # RoPE tables: same freqs for every head (tile along embedding axis), then
    # tile along the batch-block axis to match the flattened (BB*T, C) layout.
    theta = 1.0 / (10000.0 ** (jnp.arange(0, D, 2, dtype=jnp.float32) / D))
    pos = jnp.arange(T, dtype=jnp.float32)
    f = jnp.repeat(pos[:, None] * theta[None, :], 2, axis=-1)       # (T, D)
    f = jnp.tile(f, (BB, N_HEAD))                                   # (BB*T, C)
    cos_f = jnp.cos(f)
    sin_f = jnp.sin(f)

    # Fold the causal mask (finite large-negative) together with the optional
    # user additive mask: avoids per-step iota/select and -inf+inf NaNs.
    causal = jnp.tril(jnp.ones((T, T), dtype=bool))
    user = (attn_mask.astype(jnp.float32) if attn_mask is not None
            else jnp.zeros((T, T), jnp.float32))
    mask_add = jnp.where(causal, user, jnp.float32(-1e30))

    def full(shape):
        n = len(shape)
        return pl.BlockSpec(shape, lambda g, n=n: (0,) * n)

    in_specs = [
        pl.BlockSpec((BB, T, C), lambda g: (g, 0, 0)),  # x
        full((T, T)),                                   # folded causal + user mask
        full((1, C)), full((1, C)),                     # LN1 gamma/beta
        full((C, C)), full((C, C)),                     # Wk, Wv (all heads concat)
        full((C, C)), full((1, C)),                     # Wproj, bproj
        full((BB * T, C)), full((BB * T, C)),           # cos, sin tables
        full((1, C)), full((1, C)),                     # LN2 gamma/beta
        full((C, 4 * C)), full((1, 4 * C)),             # FFN W1, b1
        full((4 * C, C)), full((1, C)),                 # FFN W2, b2
    ]
    # NOTE: at real model sizes (C=768, 4C hidden), the grid-invariant weight
    # specs should be single-buffered (pipeline_mode=pl.Buffered(1)) or the FFN
    # hidden dim tiled on an "arbitrary" reduction axis to respect v7x VMEM.

    return pl.pallas_call(
        _block_kernel,
        out_shape=jax.ShapeDtypeStruct((B, T, C), jnp.float32),
        grid_spec=pltpu.PrefetchScalarGridSpec(
            num_scalar_prefetch=0,
            grid=(G,),
            in_specs=in_specs,
            out_specs=pl.BlockSpec((BB, T, C), lambda g: (g, 0, 0)),
            scratch_shapes=[pltpu.VMEM((BB * T, C), jnp.float32)],
        ),
        compiler_params=pltpu.CompilerParams(
            dimension_semantics=("parallel",)),
    )(x, mask_add, g1.reshape(1, C), b1.reshape(1, C), wk, wv, wp,
      bp.reshape(1, C), cos_f, sin_f, g2.reshape(1, C), b2.reshape(1, C),
      w1, bb1.reshape(1, 4 * C), w2, bb2.reshape(1, C))


def block_ref(x, params, attn_mask=None):
    """Pure-JAX reference mirroring the PyTorch module (for validation)."""
    g1, b1, wk, wv, wp, bp, g2, b2, w1, bb1, w2, bb2 = params
    B, T, C = x.shape
    D = C // N_HEAD

    def ln(z, g, bt):
        mu = jnp.mean(z, -1, keepdims=True)
        var = jnp.mean((z - mu) ** 2, -1, keepdims=True)
        return (z - mu) / jnp.sqrt(var + LN_EPS) * g + bt

    theta = 1.0 / (10000.0 ** (jnp.arange(0, D, 2, dtype=jnp.float32) / D))
    pos = jnp.arange(T, dtype=jnp.float32)
    f = jnp.repeat(pos[:, None] * theta[None, :], 2, axis=-1)       # (T, D)
    cos_f, sin_f = jnp.cos(f), jnp.sin(f)

    def rot_half(z):
        zz = z.reshape(*z.shape[:-1], -1, 2)
        z1, z2 = zz[..., 0], zz[..., 1]
        return jnp.stack((-z2, z1), axis=-1).reshape(*z.shape)

    def rot(z):
        return z * cos_f + rot_half(z) * sin_f

    xn = ln(x, g1, b1)
    causal = jnp.tril(jnp.ones((T, T), bool))
    outs = []
    for h in range(N_HEAD):
        k = rot(xn @ wk[:, h * D:(h + 1) * D])
        q = rot(k)                                  # reference quirk reproduced
        wei = q @ jnp.swapaxes(k, -1, -2) * (C ** -0.5)
        wei = jnp.where(causal, wei, -jnp.inf)
        if attn_mask is not None:
            wei = wei + attn_mask
        wei = jax.nn.softmax(wei, axis=-1)
        outs.append(wei @ (xn @ wv[:, h * D:(h + 1) * D]))
    sa = jnp.concatenate(outs, axis=-1) @ wp + bp
    x1 = sa + x
    x2 = ln(x1, g2, b2)
    ff = jnp.maximum(x2 @ w1 + bb1, 0.0) @ w2 + bb2
    return ff + x2


if __name__ == "__main__":
    B, T, C = 4, 16, N_EMBD
    key = jax.random.PRNGKey(0)
    ks = jax.random.split(key, 10)
    s = 0.02
    g1 = jnp.ones((C,), jnp.float32)
    b1 = jnp.zeros((C,), jnp.float32)
    g2 = jnp.ones((C,), jnp.float32)
    b2 = jnp.zeros((C,), jnp.float32)
    wk = jax.random.normal(ks[0], (C, C), jnp.float32) * s
    wv = jax.random.normal(ks[1], (C, C), jnp.float32) * s
    wp = jax.random.normal(ks[2], (C, C), jnp.float32) * s
    bp = jax.random.normal(ks[3], (C,), jnp.float32) * s
    w1 = jax.random.normal(ks[4], (C, 4 * C), jnp.float32) * s
    bb1 = jax.random.normal(ks[5], (4 * C,), jnp.float32) * s
    w2 = jax.random.normal(ks[6], (4 * C, C), jnp.float32) * s
    bb2 = jax.random.normal(ks[7], (C,), jnp.float32) * s
    params = (g1, b1, wk, wv, wp, bp, g2, b2, w1, bb1, w2, bb2)

    x = jax.random.normal(ks[8], (B, T, C), jnp.float32)

    out = block_forward(x, params, attn_mask=None)
    out = jax.block_until_ready(out)

    ref = block_ref(x, params, attn_mask=None)
    # Tolerance is slightly relaxed vs. bit-exact f32: the kernel uses the EUP
    # approximate reciprocal for the softmax denominator and the fused
    # double-angle rotation; real bugs produce errors orders of magnitude larger.
    if not jnp.allclose(out, ref, atol=2e-3, rtol=2e-3):
        raise AssertionError("Pallas kernel does not match JAX reference")
    print("KERNEL_OK")
</pallas_src>

<mosaic_0001>
module attributes {stable_mosaic.version = 11 : i64} {
  func.func @_block_kernel(%arg0: i32, %arg1: memref<2x16x128xf32, #tpu.memory_space<vmem>>, %arg2: memref<16x16xf32, #tpu.memory_space<vmem>>, %arg3: memref<1x128xf32, #tpu.memory_space<vmem>>, %arg4: memref<1x128xf32, #tpu.memory_space<vmem>>, %arg5: memref<128x128xf32, #tpu.memory_space<vmem>>, %arg6: memref<128x128xf32, #tpu.memory_space<vmem>>, %arg7: memref<128x128xf32, #tpu.memory_space<vmem>>, %arg8: memref<1x128xf32, #tpu.memory_space<vmem>>, %arg9: memref<32x128xf32, #tpu.memory_space<vmem>>, %arg10: memref<32x128xf32, #tpu.memory_space<vmem>>, %arg11: memref<1x128xf32, #tpu.memory_space<vmem>>, %arg12: memref<1x128xf32, #tpu.memory_space<vmem>>, %arg13: memref<128x512xf32, #tpu.memory_space<vmem>>, %arg14: memref<1x512xf32, #tpu.memory_space<vmem>>, %arg15: memref<512x128xf32, #tpu.memory_space<vmem>>, %arg16: memref<1x128xf32, #tpu.memory_space<vmem>>, %arg17: memref<2x16x128xf32, #tpu.memory_space<vmem>>, %arg18: memref<32x128xf32, #tpu.memory_space<vmem>>) attributes {dimension_semantics = [#tpu.dimension_semantics<parallel>], iteration_bounds = array<i64: 2>, scalar_prefetch = 0 : i64, scratch_operands = 1 : i64, tpu.core_type = #tpu.core_type<tc>, window_params = [{transform_indices = @transform_0, window_bounds = array<i64: 2, 16, 128>}, {pipeline_mode = #tpu.pipeline_mode<synchronous>, transform_indices = @transform_1, window_bounds = array<i64: 16, 16>}, {pipeline_mode = #tpu.pipeline_mode<synchronous>, transform_indices = @transform_2, window_bounds = array<i64: 1, 128>}, {pipeline_mode = #tpu.pipeline_mode<synchronous>, transform_indices = @transform_3, window_bounds = array<i64: 1, 128>}, {pipeline_mode = #tpu.pipeline_mode<synchronous>, transform_indices = @transform_4, window_bounds = array<i64: 128, 128>}, {pipeline_mode = #tpu.pipeline_mode<synchronous>, transform_indices = @transform_5, window_bounds = array<i64: 128, 128>}, {pipeline_mode = #tpu.pipeline_mode<synchronous>, transform_indices = @transform_6, window_bounds = array<i64: 128, 128>}, {pipeline_mode = #tpu.pipeline_mode<synchronous>, transform_indices = @transform_7, window_bounds = array<i64: 1, 128>}, {pipeline_mode = #tpu.pipeline_mode<synchronous>, transform_indices = @transform_8, window_bounds = array<i64: 32, 128>}, {pipeline_mode = #tpu.pipeline_mode<synchronous>, transform_indices = @transform_9, window_bounds = array<i64: 32, 128>}, {pipeline_mode = #tpu.pipeline_mode<synchronous>, transform_indices = @transform_10, window_bounds = array<i64: 1, 128>}, {pipeline_mode = #tpu.pipeline_mode<synchronous>, transform_indices = @transform_11, window_bounds = array<i64: 1, 128>}, {pipeline_mode = #tpu.pipeline_mode<synchronous>, transform_indices = @transform_12, window_bounds = array<i64: 128, 512>}, {pipeline_mode = #tpu.pipeline_mode<synchronous>, transform_indices = @transform_13, window_bounds = array<i64: 1, 512>}, {pipeline_mode = #tpu.pipeline_mode<synchronous>, transform_indices = @transform_14, window_bounds = array<i64: 512, 128>}, {pipeline_mode = #tpu.pipeline_mode<synchronous>, transform_indices = @transform_15, window_bounds = array<i64: 1, 128>}, {transform_indices = @transform_16, window_bounds = array<i64: 2, 16, 128>}]} {
    %c0 = arith.constant 0 : index
    %c0_0 = arith.constant 0 : index
    %c0_1 = arith.constant 0 : index
    %0 = vector.load %arg1[%c0, %c0_0, %c0_1] : memref<2x16x128xf32, #tpu.memory_space<vmem>>, vector<2x16x128xf32>
    %1 = vector.shape_cast %0 : vector<2x16x128xf32> to vector<32x128xf32>
    %cst = arith.constant dense<0.000000e+00> : vector<32xf32>
    %2 = vector.multi_reduction <add>, %1, %cst [1] : vector<32x128xf32> to vector<32xf32>
    %3 = vector.shape_cast %2 : vector<32xf32> to vector<32x1xf32>
    %cst_2 = arith.constant 1.280000e+02 : f32
    %4 = vector.broadcast %cst_2 : f32 to vector<32x1xf32>
    %5 = arith.divf %3, %4 : vector<32x1xf32>
    %6 = vector.broadcast %5 : vector<32x1xf32> to vector<32x128xf32>
    %7 = arith.subf %1, %6 : vector<32x128xf32>
    %8 = arith.mulf %7, %7 : vector<32x128xf32>
    %cst_3 = arith.constant dense<0.000000e+00> : vector<32xf32>
    %9 = vector.multi_reduction <add>, %8, %cst_3 [1] : vector<32x128xf32> to vector<32xf32>
    %10 = vector.shape_cast %9 : vector<32xf32> to vector<32x1xf32>
    %cst_4 = arith.constant 1.280000e+02 : f32
    %11 = vector.broadcast %cst_4 : f32 to vector<32x1xf32>
    %12 = arith.divf %10, %11 : vector<32x1xf32>
    %13 = vector.broadcast %5 : vector<32x1xf32> to vector<32x128xf32>
    %14 = arith.subf %1, %13 : vector<32x128xf32>
    %cst_5 = arith.constant 9.99999974E-6 : f32
    %15 = vector.broadcast %cst_5 : f32 to vector<32x1xf32>
    %16 = arith.addf %12, %15 : vector<32x1xf32>
    %17 = math.rsqrt %16 : vector<32x1xf32>
    %18 = vector.broadcast %17 : vector<32x1xf32> to vector<32x128xf32>
    %19 = arith.mulf %14, %18 : vector<32x128xf32>
    %c0_6 = arith.constant 0 : index
    %c0_7 = arith.constant 0 : index
    %20 = vector.load %arg3[%c0_6, %c0_7] : memref<1x128xf32, #tpu.memory_space<vmem>>, vector<1x128xf32>
    %21 = vector.broadcast %20 : vector<1x128xf32> to vector<32x128xf32>
    %22 = arith.mulf %19, %21 : vector<32x128xf32>
    %c0_8 = arith.constant 0 : index
    %c0_9 = arith.constant 0 : index
    %23 = vector.load %arg4[%c0_8, %c0_9] : memref<1x128xf32, #tpu.memory_space<vmem>>, vector<1x128xf32>
    %24 = vector.broadcast %23 : vector<1x128xf32> to vector<32x128xf32>
    %25 = arith.addf %22, %24 : vector<32x128xf32>
    %c0_10 = arith.constant 0 : index
    %c0_11 = arith.constant 0 : index
    %26 = vector.load %arg9[%c0_10, %c0_11] : memref<32x128xf32, #tpu.memory_space<vmem>>, vector<32x128xf32>
    %c0_12 = arith.constant 0 : index
    %c0_13 = arith.constant 0 : index
    %27 = vector.load %arg10[%c0_12, %c0_13] : memref<32x128xf32, #tpu.memory_space<vmem>>, vector<32x128xf32>
    %28 = arith.mulf %26, %26 : vector<32x128xf32>
    %29 = arith.mulf %27, %27 : vector<32x128xf32>
    %30 = arith.subf %28, %29 : vector<32x128xf32>
    %cst_14 = arith.constant 2.000000e+00 : f32
    %31 = vector.broadcast %cst_14 : f32 to vector<32x128xf32>
    %32 = arith.mulf %31, %26 : vector<32x128xf32>
    %33 = arith.mulf %32, %27 : vector<32x128xf32>
    %34 = tpu.iota {dimensions = array<i32: 1>} : vector<32x128xi32>
    %c1_i32 = arith.constant 1 : i32
    %35 = vector.broadcast %c1_i32 : i32 to vector<32x128xi32>
    %36 = arith.andi %34, %35 : vector<32x128xi32>
    %c1_i32_15 = arith.constant 1 : i32
    %37 = vector.broadcast %c1_i32_15 : i32 to vector<32x128xi32>
    %38 = arith.cmpi eq, %36, %37 : vector<32x128xi32>
    %c0_16 = arith.constant 0 : index
    %c0_17 = arith.constant 0 : index
    %39 = vector.load %arg5[%c0_16, %c0_17] : memref<128x128xf32, #tpu.memory_space<vmem>>, vector<128x128xf32>
    %cst_18 = arith.constant dense<0.000000e+00> : vector<32x128xf32>
    %40 = tpu.matmul %25, %39, %cst_18 {dimension_numbers = #tpu.dot_dimension_numbers<[1], [0], [0], [1], [0, 0, 1, 1], [], []>} : vector<32x128xf32>, vector<128x128xf32>, vector<32x128xf32> -> vector<32x128xf32>
    %c1_i32_19 = arith.constant 1 : i32
    %41 = tpu.dynamic_rotate %40 by %c1_i32_19 dim 1 : vector<32x128xf32>, i32 -> vector<32x128xf32>
    %c127_i32 = arith.constant 127 : i32
    %42 = tpu.dynamic_rotate %40 by %c127_i32 dim 1 : vector<32x128xf32>, i32 -> vector<32x128xf32>
    %cst_20 = arith.constant 0.000000e+00 : f32
    %43 = vector.broadcast %cst_20 : f32 to vector<32x128xf32>
    %44 = arith.subf %43, %42 : vector<32x128xf32>
    %45 = arith.select %38, %41, %44 : vector<32x128xi1>, vector<32x128xf32>
    %46 = arith.mulf %40, %26 : vector<32x128xf32>
    %47 = arith.mulf %45, %27 : vector<32x128xf32>
    %48 = arith.addf %46, %47 : vector<32x128xf32>
    %49 = arith.mulf %40, %30 : vector<32x128xf32>
    %50 = arith.mulf %45, %33 : vector<32x128xf32>
    %51 = arith.addf %49, %50 : vector<32x128xf32>
    %c0_21 = arith.constant 0 : index
    %c0_22 = arith.constant 0 : index
    %52 = vector.load %arg6[%c0_21, %c0_22] : memref<128x128xf32, #tpu.memory_space<vmem>>, vector<128x128xf32>
    %cst_23 = arith.constant dense<0.000000e+00> : vector<32x128xf32>
    %53 = tpu.matmul %25, %52, %cst_23 {dimension_numbers = #tpu.dot_dimension_numbers<[1], [0], [0], [1], [0, 0, 1, 1], [], []>} : vector<32x128xf32>, vector<128x128xf32>, vector<32x128xf32> -> vector<32x128xf32>
    %c0_24 = arith.constant 0 : index
    %c0_25 = arith.constant 0 : index
    %54 = vector.load %arg2[%c0_24, %c0_25] : memref<16x16xf32, #tpu.memory_space<vmem>>, vector<16x16xf32>
    %55 = vector.extract_strided_slice %51 {offsets = [0, 0], sizes = [16, 32], strides = [1, 1]} : vector<32x128xf32> to vector<16x32xf32>
    %56 = vector.extract_strided_slice %48 {offsets = [0, 0], sizes = [16, 32], strides = [1, 1]} : vector<32x128xf32> to vector<16x32xf32>
    %57 = vector.extract_strided_slice %53 {offsets = [0, 0], sizes = [16, 32], strides = [1, 1]} : vector<32x128xf32> to vector<16x32xf32>
    %58 = tpu.transpose %56, [1, 0] : vector<16x32xf32> -> vector<32x16xf32>
    %cst_26 = arith.constant dense<0.000000e+00> : vector<16x16xf32>
    %59 = tpu.matmul %55, %58, %cst_26 {dimension_numbers = #tpu.dot_dimension_numbers<[1], [0], [0], [1], [0, 0, 1, 1], [], []>} : vector<16x32xf32>, vector<32x16xf32>, vector<16x16xf32> -> vector<16x16xf32>
    %cst_27 = arith.constant 0.0883883461 : f32
    %60 = vector.broadcast %cst_27 : f32 to vector<16x16xf32>
    %61 = arith.mulf %59, %60 : vector<16x16xf32>
    %62 = arith.addf %61, %54 : vector<16x16xf32>
    %cst_28 = arith.constant dense<0xFF800000> : vector<16xf32>
    %63 = vector.multi_reduction <maximumf>, %62, %cst_28 [1] : vector<16x16xf32> to vector<16xf32>
    %64 = vector.shape_cast %63 : vector<16xf32> to vector<16x1xf32>
    %65 = vector.broadcast %64 : vector<16x1xf32> to vector<16x16xf32>
    %66 = arith.subf %62, %65 : vector<16x16xf32>
    %67 = math.exp %66 : vector<16x16xf32>
    %cst_29 = arith.constant dense<0.000000e+00> : vector<16xf32>
    %68 = vector.multi_reduction <add>, %67, %cst_29 [1] : vector<16x16xf32> to vector<16xf32>
    %69 = vector.shape_cast %68 : vector<16xf32> to vector<16x1xf32>
    %70 = tpu.reciprocal %69 {approx = true} : vector<16x1xf32> -> vector<16x1xf32>
    %71 = vector.broadcast %70 : vector<16x1xf32> to vector<16x16xf32>
    %72 = arith.mulf %67, %71 : vector<16x16xf32>
    %cst_30 = arith.constant dense<0.000000e+00> : vector<16x32xf32>
    %73 = tpu.matmul %72, %57, %cst_30 {dimension_numbers = #tpu.dot_dimension_numbers<[1], [0], [0], [1], [0, 0, 1, 1], [], []>} : vector<16x16xf32>, vector<16x32xf32>, vector<16x32xf32> -> vector<16x32xf32>
    %c0_31 = arith.constant 0 : index
    %c0_32 = arith.constant 0 : index
    %74 = vector.load %arg18[%c0_31, %c0_32] : memref<32x128xf32, #tpu.memory_space<vmem>>, vector<16x32xf32>
    tpu.vector_store %arg18[%c0_31, %c0_32], %73 {strides = array<i32>} : memref<32x128xf32, #tpu.memory_space<vmem>>, vector<16x32xf32>,
    %75 = vector.extract_strided_slice %51 {offsets = [0, 32], sizes = [16, 32], strides = [1, 1]} : vector<32x128xf32> to vector<16x32xf32>
    %76 = vector.extract_strided_slice %48 {offsets = [0, 32], sizes = [16, 32], strides = [1, 1]} : vector<32x128xf32> to vector<16x32xf32>
    %77 = vector.extract_strided_slice %53 {offsets = [0, 32], sizes = [16, 32], strides = [1, 1]} : vector<32x128xf32> to vector<16x32xf32>
    %78 = tpu.transpose %76, [1, 0] : vector<16x32xf32> -> vector<32x16xf32>
    %cst_33 = arith.constant dense<0.000000e+00> : vector<16x16xf32>
    %79 = tpu.matmul %75, %78, %cst_33 {dimension_numbers = #tpu.dot_dimension_numbers<[1], [0], [0], [1], [0, 0, 1, 1], [], []>} : vector<16x32xf32>, vector<32x16xf32>, vector<16x16xf32> -> vector<16x16xf32>
    %cst_34 = arith.constant 0.0883883461 : f32
    %80 = vector.broadcast %cst_34 : f32 to vector<16x16xf32>
    %81 = arith.mulf %79, %80 : vector<16x16xf32>
    %82 = arith.addf %81, %54 : vector<16x16xf32>
    %cst_35 = arith.constant dense<0xFF800000> : vector<16xf32>
    %83 = vector.multi_reduction <maximumf>, %82, %cst_35 [1] : vector<16x16xf32> to vector<16xf32>
    %84 = vector.shape_cast %83 : vector<16xf32> to vector<16x1xf32>
    %85 = vector.broadcast %84 : vector<16x1xf32> to vector<16x16xf32>
    %86 = arith.subf %82, %85 : vector<16x16xf32>
    %87 = math.exp %86 : vector<16x16xf32>
    %cst_36 = arith.constant dense<0.000000e+00> : vector<16xf32>
    %88 = vector.multi_reduction <add>, %87, %cst_36 [1] : vector<16x16xf32> to vector<16xf32>
    %89 = vector.shape_cast %88 : vector<16xf32> to vector<16x1xf32>
    %90 = tpu.reciprocal %89 {approx = true} : vector<16x1xf32> -> vector<16x1xf32>
    %91 = vector.broadcast %90 : vector<16x1xf32> to vector<16x16xf32>
    %92 = arith.mulf %87, %91 : vector<16x16xf32>
    %cst_37 = arith.constant dense<0.000000e+00> : vector<16x32xf32>
    %93 = tpu.matmul %92, %77, %cst_37 {dimension_numbers = #tpu.dot_dimension_numbers<[1], [0], [0], [1], [0, 0, 1, 1], [], []>} : vector<16x16xf32>, vector<16x32xf32>, vector<16x32xf32> -> vector<16x32xf32>
    %c0_38 = arith.constant 0 : index
    %c32 = arith.constant 32 : index
    %94 = vector.load %arg18[%c0_38, %c32] : memref<32x128xf32, #tpu.memory_space<vmem>>, vector<16x32xf32>
    tpu.vector_store %arg18[%c0_38, %c32], %93 {strides = array<i32>} : memref<32x128xf32, #tpu.memory_space<vmem>>, vector<16x32xf32>,
    %95 = vector.extract_strided_slice %51 {offsets = [0, 64], sizes = [16, 32], strides = [1, 1]} : vector<32x128xf32> to vector<16x32xf32>
    %96 = vector.extract_strided_slice %48 {offsets = [0, 64], sizes = [16, 32], strides = [1, 1]} : vector<32x128xf32> to vector<16x32xf32>
    %97 = vector.extract_strided_slice %53 {offsets = [0, 64], sizes = [16, 32], strides = [1, 1]} : vector<32x128xf32> to vector<16x32xf32>
    %98 = tpu.transpose %96, [1, 0] : vector<16x32xf32> -> vector<32x16xf32>
    %cst_39 = arith.constant dense<0.000000e+00> : vector<16x16xf32>
    %99 = tpu.matmul %95, %98, %cst_39 {dimension_numbers = #tpu.dot_dimension_numbers<[1], [0], [0], [1], [0, 0, 1, 1], [], []>} : vector<16x32xf32>, vector<32x16xf32>, vector<16x16xf32> -> vector<16x16xf32>
    %cst_40 = arith.constant 0.0883883461 : f32
    %100 = vector.broadcast %cst_40 : f32 to vector<16x16xf32>
    %101 = arith.mulf %99, %100 : vector<16x16xf32>
    %102 = arith.addf %101, %54 : vector<16x16xf32>
    %cst_41 = arith.constant dense<0xFF800000> : vector<16xf32>
    %103 = vector.multi_reduction <maximumf>, %102, %cst_41 [1] : vector<16x16xf32> to vector<16xf32>
    %104 = vector.shape_cast %103 : vector<16xf32> to vector<16x1xf32>
    %105 = vector.broadcast %104 : vector<16x1xf32> to vector<16x16xf32>
    %106 = arith.subf %102, %105 : vector<16x16xf32>
    %107 = math.exp %106 : vector<16x16xf32>
    %cst_42 = arith.constant dense<0.000000e+00> : vector<16xf32>
    %108 = vector.multi_reduction <add>, %107, %cst_42 [1] : vector<16x16xf32> to vector<16xf32>
    %109 = vector.shape_cast %108 : vector<16xf32> to vector<16x1xf32>
    %110 = tpu.reciprocal %109 {approx = true} : vector<16x1xf32> -> vector<16x1xf32>
    %111 = vector.broadcast %110 : vector<16x1xf32> to vector<16x16xf32>
    %112 = arith.mulf %107, %111 : vector<16x16xf32>
    %cst_43 = arith.constant dense<0.000000e+00> : vector<16x32xf32>
    %113 = tpu.matmul %112, %97, %cst_43 {dimension_numbers = #tpu.dot_dimension_numbers<[1], [0], [0], [1], [0, 0, 1, 1], [], []>} : vector<16x16xf32>, vector<16x32xf32>, vector<16x32xf32> -> vector<16x32xf32>
    %c0_44 = arith.constant 0 : index
    %c64 = arith.constant 64 : index
    %114 = vector.load %arg18[%c0_44, %c64] : memref<32x128xf32, #tpu.memory_space<vmem>>, vector<16x32xf32>
    tpu.vector_store %arg18[%c0_44, %c64], %113 {strides = array<i32>} : memref<32x128xf32, #tpu.memory_space<vmem>>, vector<16x32xf32>,
    %115 = vector.extract_strided_slice %51 {offsets = [0, 96], sizes = [16, 32], strides = [1, 1]} : vector<32x128xf32> to vector<16x32xf32>
    %116 = vector.extract_strided_slice %48 {offsets = [0, 96], sizes = [16, 32], strides = [1, 1]} : vector<32x128xf32> to vector<16x32xf32>
    %117 = vector.extract_strided_slice %53 {offsets = [0, 96], sizes = [16, 32], strides = [1, 1]} : vector<32x128xf32> to vector<16x32xf32>
    %118 = tpu.transpose %116, [1, 0] : vector<16x32xf32> -> vector<32x16xf32>
    %cst_45 = arith.constant dense<0.000000e+00> : vector<16x16xf32>
    %119 = tpu.matmul %115, %118, %cst_45 {dimension_numbers = #tpu.dot_dimension_numbers<[1], [0], [0], [1], [0, 0, 1, 1], [], []>} : vector<16x32xf32>, vector<32x16xf32>, vector<16x16xf32> -> vector<16x16xf32>
    %cst_46 = arith.constant 0.0883883461 : f32
    %120 = vector.broadcast %cst_46 : f32 to vector<16x16xf32>
    %121 = arith.mulf %119, %120 : vector<16x16xf32>
    %122 = arith.addf %121, %54 : vector<16x16xf32>
    %cst_47 = arith.constant dense<0xFF800000> : vector<16xf32>
    %123 = vector.multi_reduction <maximumf>, %122, %cst_47 [1] : vector<16x16xf32> to vector<16xf32>
    %124 = vector.shape_cast %123 : vector<16xf32> to vector<16x1xf32>
    %125 = vector.broadcast %124 : vector<16x1xf32> to vector<16x16xf32>
    %126 = arith.subf %122, %125 : vector<16x16xf32>
    %127 = math.exp %126 : vector<16x16xf32>
    %cst_48 = arith.constant dense<0.000000e+00> : vector<16xf32>
    %128 = vector.multi_reduction <add>, %127, %cst_48 [1] : vector<16x16xf32> to vector<16xf32>
    %129 = vector.shape_cast %128 : vector<16xf32> to vector<16x1xf32>
    %130 = tpu.reciprocal %129 {approx = true} : vector<16x1xf32> -> vector<16x1xf32>
    %131 = vector.broadcast %130 : vector<16x1xf32> to vector<16x16xf32>
    %132 = arith.mulf %127, %131 : vector<16x16xf32>
    %cst_49 = arith.constant dense<0.000000e+00> : vector<16x32xf32>
    %133 = tpu.matmul %132, %117, %cst_49 {dimension_numbers = #tpu.dot_dimension_numbers<[1], [0], [0], [1], [0, 0, 1, 1], [], []>} : vector<16x16xf32>, vector<16x32xf32>, vector<16x32xf32> -> vector<16x32xf32>
    %c0_50 = arith.constant 0 : index
    %c96 = arith.constant 96 : index
    %134 = vector.load %arg18[%c0_50, %c96] : memref<32x128xf32, #tpu.memory_space<vmem>>, vector<16x32xf32>
    tpu.vector_store %arg18[%c0_50, %c96], %133 {strides = array<i32>} : memref<32x128xf32, #tpu.memory_space<vmem>>, vector<16x32xf32>,
    %135 = vector.extract_strided_slice %51 {offsets = [16, 0], sizes = [16, 32], strides = [1, 1]} : vector<32x128xf32> to vector<16x32xf32>
    %136 = vector.extract_strided_slice %48 {offsets = [16, 0], sizes = [16, 32], strides = [1, 1]} : vector<32x128xf32> to vector<16x32xf32>
    %137 = vector.extract_strided_slice %53 {offsets = [16, 0], sizes = [16, 32], strides = [1, 1]} : vector<32x128xf32> to vector<16x32xf32>
    %138 = tpu.transpose %136, [1, 0] : vector<16x32xf32> -> vector<32x16xf32>
    %cst_51 = arith.constant dense<0.000000e+00> : vector<16x16xf32>
    %139 = tpu.matmul %135, %138, %cst_51 {dimension_numbers = #tpu.dot_dimension_numbers<[1], [0], [0], [1], [0, 0, 1, 1], [], []>} : vector<16x32xf32>, vector<32x16xf32>, vector<16x16xf32> -> vector<16x16xf32>
    %cst_52 = arith.constant 0.0883883461 : f32
    %140 = vector.broadcast %cst_52 : f32 to vector<16x16xf32>
    %141 = arith.mulf %139, %140 : vector<16x16xf32>
    %142 = arith.addf %141, %54 : vector<16x16xf32>
    %cst_53 = arith.constant dense<0xFF800000> : vector<16xf32>
    %143 = vector.multi_reduction <maximumf>, %142, %cst_53 [1] : vector<16x16xf32> to vector<16xf32>
    %144 = vector.shape_cast %143 : vector<16xf32> to vector<16x1xf32>
    %145 = vector.broadcast %144 : vector<16x1xf32> to vector<16x16xf32>
    %146 = arith.subf %142, %145 : vector<16x16xf32>
    %147 = math.exp %146 : vector<16x16xf32>
    %cst_54 = arith.constant dense<0.000000e+00> : vector<16xf32>
    %148 = vector.multi_reduction <add>, %147, %cst_54 [1] : vector<16x16xf32> to vector<16xf32>
    %149 = vector.shape_cast %148 : vector<16xf32> to vector<16x1xf32>
    %150 = tpu.reciprocal %149 {approx = true} : vector<16x1xf32> -> vector<16x1xf32>
    %151 = vector.broadcast %150 : vector<16x1xf32> to vector<16x16xf32>
    %152 = arith.mulf %147, %151 : vector<16x16xf32>
    %cst_55 = arith.constant dense<0.000000e+00> : vector<16x32xf32>
    %153 = tpu.matmul %152, %137, %cst_55 {dimension_numbers = #tpu.dot_dimension_numbers<[1], [0], [0], [1], [0, 0, 1, 1], [], []>} : vector<16x16xf32>, vector<16x32xf32>, vector<16x32xf32> -> vector<16x32xf32>
    %c16 = arith.constant 16 : index
    %c0_56 = arith.constant 0 : index
    %154 = vector.load %arg18[%c16, %c0_56] : memref<32x128xf32, #tpu.memory_space<vmem>>, vector<16x32xf32>
    tpu.vector_store %arg18[%c16, %c0_56], %153 {strides = array<i32>} : memref<32x128xf32, #tpu.memory_space<vmem>>, vector<16x32xf32>,
    %155 = vector.extract_strided_slice %51 {offsets = [16, 32], sizes = [16, 32], strides = [1, 1]} : vector<32x128xf32> to vector<16x32xf32>
    %156 = vector.extract_strided_slice %48 {offsets = [16, 32], sizes = [16, 32], strides = [1, 1]} : vector<32x128xf32> to vector<16x32xf32>
    %157 = vector.extract_strided_slice %53 {offsets = [16, 32], sizes = [16, 32], strides = [1, 1]} : vector<32x128xf32> to vector<16x32xf32>
    %158 = tpu.transpose %156, [1, 0] : vector<16x32xf32> -> vector<32x16xf32>
    %cst_57 = arith.constant dense<0.000000e+00> : vector<16x16xf32>
    %159 = tpu.matmul %155, %158, %cst_57 {dimension_numbers = #tpu.dot_dimension_numbers<[1], [0], [0], [1], [0, 0, 1, 1], [], []>} : vector<16x32xf32>, vector<32x16xf32>, vector<16x16xf32> -> vector<16x16xf32>
    %cst_58 = arith.constant 0.0883883461 : f32
    %160 = vector.broadcast %cst_58 : f32 to vector<16x16xf32>
    %161 = arith.mulf %159, %160 : vector<16x16xf32>
    %162 = arith.addf %161, %54 : vector<16x16xf32>
    %cst_59 = arith.constant dense<0xFF800000> : vector<16xf32>
    %163 = vector.multi_reduction <maximumf>, %162, %cst_59 [1] : vector<16x16xf32> to vector<16xf32>
    %164 = vector.shape_cast %163 : vector<16xf32> to vector<16x1xf32>
    %165 = vector.broadcast %164 : vector<16x1xf32> to vector<16x16xf32>
    %166 = arith.subf %162, %165 : vector<16x16xf32>
    %167 = math.exp %166 : vector<16x16xf32>
    %cst_60 = arith.constant dense<0.000000e+00> : vector<16xf32>
    %168 = vector.multi_reduction <add>, %167, %cst_60 [1] : vector<16x16xf32> to vector<16xf32>
    %169 = vector.shape_cast %168 : vector<16xf32> to vector<16x1xf32>
    %170 = tpu.reciprocal %169 {approx = true} : vector<16x1xf32> -> vector<16x1xf32>
    %171 = vector.broadcast %170 : vector<16x1xf32> to vector<16x16xf32>
    %172 = arith.mulf %167, %171 : vector<16x16xf32>
    %cst_61 = arith.constant dense<0.000000e+00> : vector<16x32xf32>
    %173 = tpu.matmul %172, %157, %cst_61 {dimension_numbers = #tpu.dot_dimension_numbers<[1], [0], [0], [1], [0, 0, 1, 1], [], []>} : vector<16x16xf32>, vector<16x32xf32>, vector<16x32xf32> -> vector<16x32xf32>
    %c16_62 = arith.constant 16 : index
    %c32_63 = arith.constant 32 : index
    %174 = vector.load %arg18[%c16_62, %c32_63] : memref<32x128xf32, #tpu.memory_space<vmem>>, vector<16x32xf32>
    tpu.vector_store %arg18[%c16_62, %c32_63], %173 {strides = array<i32>} : memref<32x128xf32, #tpu.memory_space<vmem>>, vector<16x32xf32>,
    %175 = vector.extract_strided_slice %51 {offsets = [16, 64], sizes = [16, 32], strides = [1, 1]} : vector<32x128xf32> to vector<16x32xf32>
    %176 = vector.extract_strided_slice %48 {offsets = [16, 64], sizes = [16, 32], strides = [1, 1]} : vector<32x128xf32> to vector<16x32xf32>
    %177 = vector.extract_strided_slice %53 {offsets = [16, 64], sizes = [16, 32], strides = [1, 1]} : vector<32x128xf32> to vector<16x32xf32>
    %178 = tpu.transpose %176, [1, 0] : vector<16x32xf32> -> vector<32x16xf32>
    %cst_64 = arith.constant dense<0.000000e+00> : vector<16x16xf32>
    %179 = tpu.matmul %175, %178, %cst_64 {dimension_numbers = #tpu.dot_dimension_numbers<[1], [0], [0], [1], [0, 0, 1, 1], [], []>} : vector<16x32xf32>, vector<32x16xf32>, vector<16x16xf32> -> vector<16x16xf32>
    %cst_65 = arith.constant 0.0883883461 : f32
    %180 = vector.broadcast %cst_65 : f32 to vector<16x16xf32>
    %181 = arith.mulf %179, %180 : vector<16x16xf32>
    %182 = arith.addf %181, %54 : vector<16x16xf32>
    %cst_66 = arith.constant dense<0xFF800000> : vector<16xf32>
    %183 = vector.multi_reduction <maximumf>, %182, %cst_66 [1] : vector<16x16xf32> to vector<16xf32>
    %184 = vector.shape_cast %183 : vector<16xf32> to vector<16x1xf32>
    %185 = vector.broadcast %184 : vector<16x1xf32> to vector<16x16xf32>
    %186 = arith.subf %182, %185 : vector<16x16xf32>
    %187 = math.exp %186 : vector<16x16xf32>
    %cst_67 = arith.constant dense<0.000000e+00> : vector<16xf32>
    %188 = vector.multi_reduction <add>, %187, %cst_67 [1] : vector<16x16xf32> to vector<16xf32>
    %189 = vector.shape_cast %188 : vector<16xf32> to vector<16x1xf32>
    %190 = tpu.reciprocal %189 {approx = true} : vector<16x1xf32> -> vector<16x1xf32>
    %191 = vector.broadcast %190 : vector<16x1xf32> to vector<16x16xf32>
    %192 = arith.mulf %187, %191 : vector<16x16xf32>
    %cst_68 = arith.constant dense<0.000000e+00> : vector<16x32xf32>
    %193 = tpu.matmul %192, %177, %cst_68 {dimension_numbers = #tpu.dot_dimension_numbers<[1], [0], [0], [1], [0, 0, 1, 1], [], []>} : vector<16x16xf32>, vector<16x32xf32>, vector<16x32xf32> -> vector<16x32xf32>
    %c16_69 = arith.constant 16 : index
    %c64_70 = arith.constant 64 : index
    %194 = vector.load %arg18[%c16_69, %c64_70] : memref<32x128xf32, #tpu.memory_space<vmem>>, vector<16x32xf32>
    tpu.vector_store %arg18[%c16_69, %c64_70], %193 {strides = array<i32>} : memref<32x128xf32, #tpu.memory_space<vmem>>, vector<16x32xf32>,
    %195 = vector.extract_strided_slice %51 {offsets = [16, 96], sizes = [16, 32], strides = [1, 1]} : vector<32x128xf32> to vector<16x32xf32>
    %196 = vector.extract_strided_slice %48 {offsets = [16, 96], sizes = [16, 32], strides = [1, 1]} : vector<32x128xf32> to vector<16x32xf32>
    %197 = vector.extract_strided_slice %53 {offsets = [16, 96], sizes = [16, 32], strides = [1, 1]} : vector<32x128xf32> to vector<16x32xf32>
    %198 = tpu.transpose %196, [1, 0] : vector<16x32xf32> -> vector<32x16xf32>
    %cst_71 = arith.constant dense<0.000000e+00> : vector<16x16xf32>
    %199 = tpu.matmul %195, %198, %cst_71 {dimension_numbers = #tpu.dot_dimension_numbers<[1], [0], [0], [1], [0, 0, 1, 1], [], []>} : vector<16x32xf32>, vector<32x16xf32>, vector<16x16xf32> -> vector<16x16xf32>
    %cst_72 = arith.constant 0.0883883461 : f32
    %200 = vector.broadcast %cst_72 : f32 to vector<16x16xf32>
    %201 = arith.mulf %199, %200 : vector<16x16xf32>
    %202 = arith.addf %201, %54 : vector<16x16xf32>
    %cst_73 = arith.constant dense<0xFF800000> : vector<16xf32>
    %203 = vector.multi_reduction <maximumf>, %202, %cst_73 [1] : vector<16x16xf32> to vector<16xf32>
    %204 = vector.shape_cast %203 : vector<16xf32> to vector<16x1xf32>
    %205 = vector.broadcast %204 : vector<16x1xf32> to vector<16x16xf32>
    %206 = arith.subf %202, %205 : vector<16x16xf32>
    %207 = math.exp %206 : vector<16x16xf32>
    %cst_74 = arith.constant dense<0.000000e+00> : vector<16xf32>
    %208 = vector.multi_reduction <add>, %207, %cst_74 [1] : vector<16x16xf32> to vector<16xf32>
    %209 = vector.shape_cast %208 : vector<16xf32> to vector<16x1xf32>
    %210 = tpu.reciprocal %209 {approx = true} : vector<16x1xf32> -> vector<16x1xf32>
    %211 = vector.broadcast %210 : vector<16x1xf32> to vector<16x16xf32>
    %212 = arith.mulf %207, %211 : vector<16x16xf32>
    %cst_75 = arith.constant dense<0.000000e+00> : vector<16x32xf32>
    %213 = tpu.matmul %212, %197, %cst_75 {dimension_numbers = #tpu.dot_dimension_numbers<[1], [0], [0], [1], [0, 0, 1, 1], [], []>} : vector<16x16xf32>, vector<16x32xf32>, vector<16x32xf32> -> vector<16x32xf32>
    %c16_76 = arith.constant 16 : index
    %c96_77 = arith.constant 96 : index
    %214 = vector.load %arg18[%c16_76, %c96_77] : memref<32x128xf32, #tpu.memory_space<vmem>>, vector<16x32xf32>
    tpu.vector_store %arg18[%c16_76, %c96_77], %213 {strides = array<i32>} : memref<32x128xf32, #tpu.memory_space<vmem>>, vector<16x32xf32>,
    %c0_78 = arith.constant 0 : index
    %c0_79 = arith.constant 0 : index
    %215 = vector.load %arg18[%c0_78, %c0_79] : memref<32x128xf32, #tpu.memory_space<vmem>>, vector<32x128xf32>
    %c0_80 = arith.constant 0 : index
    %c0_81 = arith.constant 0 : index
    %216 = vector.load %arg7[%c0_80, %c0_81] : memref<128x128xf32, #tpu.memory_space<vmem>>, vector<128x128xf32>
    %cst_82 = arith.constant dense<0.000000e+00> : vector<32x128xf32>
    %217 = tpu.matmul %215, %216, %cst_82 {dimension_numbers = #tpu.dot_dimension_numbers<[1], [0], [0], [1], [0, 0, 1, 1], [], []>} : vector<32x128xf32>, vector<128x128xf32>, vector<32x128xf32> -> vector<32x128xf32>
    %c0_83 = arith.constant 0 : index
    %c0_84 = arith.constant 0 : index
    %218 = vector.load %arg8[%c0_83, %c0_84] : memref<1x128xf32, #tpu.memory_space<vmem>>, vector<1x128xf32>
    %219 = vector.broadcast %218 : vector<1x128xf32> to vector<32x128xf32>
    %220 = arith.addf %217, %219 : vector<32x128xf32>
    %221 = arith.addf %220, %1 : vector<32x128xf32>
    %cst_85 = arith.constant dense<0.000000e+00> : vector<32xf32>
    %222 = vector.multi_reduction <add>, %221, %cst_85 [1] : vector<32x128xf32> to vector<32xf32>
    %223 = vector.shape_cast %222 : vector<32xf32> to vector<32x1xf32>
    %cst_86 = arith.constant 1.280000e+02 : f32
    %224 = vector.broadcast %cst_86 : f32 to vector<32x1xf32>
    %225 = arith.divf %223, %224 : vector<32x1xf32>
    %226 = vector.broadcast %225 : vector<32x1xf32> to vector<32x128xf32>
    %227 = arith.subf %221, %226 : vector<32x128xf32>
    %228 = arith.mulf %227, %227 : vector<32x128xf32>
    %cst_87 = arith.constant dense<0.000000e+00> : vector<32xf32>
    %229 = vector.multi_reduction <add>, %228, %cst_87 [1] : vector<32x128xf32> to vector<32xf32>
    %230 = vector.shape_cast %229 : vector<32xf32> to vector<32x1xf32>
    %cst_88 = arith.constant 1.280000e+02 : f32
    %231 = vector.broadcast %cst_88 : f32 to vector<32x1xf32>
    %232 = arith.divf %230, %231 : vector<32x1xf32>
    %233 = vector.broadcast %225 : vector<32x1xf32> to vector<32x128xf32>
    %234 = arith.subf %221, %233 : vector<32x128xf32>
    %cst_89 = arith.constant 9.99999974E-6 : f32
    %235 = vector.broadcast %cst_89 : f32 to vector<32x1xf32>
    %236 = arith.addf %232, %235 : vector<32x1xf32>
    %237 = math.rsqrt %236 : vector<32x1xf32>
    %238 = vector.broadcast %237 : vector<32x1xf32> to vector<32x128xf32>
    %239 = arith.mulf %234, %238 : vector<32x128xf32>
    %c0_90 = arith.constant 0 : index
    %c0_91 = arith.constant 0 : index
    %240 = vector.load %arg11[%c0_90, %c0_91] : memref<1x128xf32, #tpu.memory_space<vmem>>, vector<1x128xf32>
    %241 = vector.broadcast %240 : vector<1x128xf32> to vector<32x128xf32>
    %242 = arith.mulf %239, %241 : vector<32x128xf32>
    %c0_92 = arith.constant 0 : index
    %c0_93 = arith.constant 0 : index
    %243 = vector.load %arg12[%c0_92, %c0_93] : memref<1x128xf32, #tpu.memory_space<vmem>>, vector<1x128xf32>
    %244 = vector.broadcast %243 : vector<1x128xf32> to vector<32x128xf32>
    %245 = arith.addf %242, %244 : vector<32x128xf32>
    %c0_94 = arith.constant 0 : index
    %c0_95 = arith.constant 0 : index
    %246 = vector.load %arg13[%c0_94, %c0_95] : memref<128x512xf32, #tpu.memory_space<vmem>>, vector<128x512xf32>
    %cst_96 = arith.constant dense<0.000000e+00> : vector<32x512xf32>
    %247 = tpu.matmul %245, %246, %cst_96 {dimension_numbers = #tpu.dot_dimension_numbers<[1], [0], [0], [1], [0, 0, 1, 1], [], []>} : vector<32x128xf32>, vector<128x512xf32>, vector<32x512xf32> -> vector<32x512xf32>
    %c0_97 = arith.constant 0 : index
    %c0_98 = arith.constant 0 : index
    %248 = vector.load %arg14[%c0_97, %c0_98] : memref<1x512xf32, #tpu.memory_space<vmem>>, vector<1x512xf32>
    %249 = vector.broadcast %248 : vector<1x512xf32> to vector<32x512xf32>
    %250 = arith.addf %247, %249 : vector<32x512xf32>
    %cst_99 = arith.constant 0.000000e+00 : f32
    %251 = vector.broadcast %cst_99 : f32 to vector<32x512xf32>
    %252 = arith.maximumf %250, %251 : vector<32x512xf32>
    %c0_100 = arith.constant 0 : index
    %c0_101 = arith.constant 0 : index
    %253 = vector.load %arg15[%c0_100, %c0_101] : memref<512x128xf32, #tpu.memory_space<vmem>>, vector<512x128xf32>
    %cst_102 = arith.constant dense<0.000000e+00> : vector<32x128xf32>
    %254 = tpu.matmul %252, %253, %cst_102 {dimension_numbers = #tpu.dot_dimension_numbers<[1], [0], [0], [1], [0, 0, 1, 1], [], []>} : vector<32x512xf32>, vector<512x128xf32>, vector<32x128xf32> -> vector<32x128xf32>
    %c0_103 = arith.constant 0 : index
    %c0_104 = arith.constant 0 : index
    %255 = vector.load %arg16[%c0_103, %c0_104] : memref<1x128xf32, #tpu.memory_space<vmem>>, vector<1x128xf32>
    %256 = vector.broadcast %255 : vector<1x128xf32> to vector<32x128xf32>
    %257 = arith.addf %254, %256 : vector<32x128xf32>
    %258 = arith.addf %257, %245 : vector<32x128xf32>
    %259 = vector.shape_cast %258 : vector<32x128xf32> to vector<2x16x128xf32>
    %c0_105 = arith.constant 0 : index
    %c0_106 = arith.constant 0 : index
    %c0_107 = arith.constant 0 : index
    %260 = vector.load %arg17[%c0_105, %c0_106, %c0_107] : memref<2x16x128xf32, #tpu.memory_space<vmem>>, vector<2x16x128xf32>
    tpu.vector_store %arg17[%c0_105, %c0_106, %c0_107], %259 {strides = array<i32>} : memref<2x16x128xf32, #tpu.memory_space<vmem>>, vector<2x16x128xf32>,
    return
  }
  func.func @transform_0(%arg0: i32) -> (i32, i32, i32) {
    %c0_i32 = arith.constant 0 : i32
    %c0_i32_0 = arith.constant 0 : i32
    %c0_i32_1 = arith.constant 0 : i32
    return %arg0, %c0_i32, %c0_i32_0 : i32, i32, i32
  }
  func.func @transform_1(%arg0: i32) -> (i32, i32) {
    %c0_i32 = arith.constant 0 : i32
    %c0_i32_0 = arith.constant 0 : i32
    %c0_i32_1 = arith.constant 0 : i32
    return %c0_i32, %c0_i32_0 : i32, i32
  }
  func.func @transform_2(%arg0: i32) -> (i32, i32) {
    %c0_i32 = arith.constant 0 : i32
    %c0_i32_0 = arith.constant 0 : i32
    %c0_i32_1 = arith.constant 0 : i32
    return %c0_i32, %c0_i32_0 : i32, i32
  }
  func.func @transform_3(%arg0: i32) -> (i32, i32) {
    %c0_i32 = arith.constant 0 : i32
    %c0_i32_0 = arith.constant 0 : i32
    %c0_i32_1 = arith.constant 0 : i32
    return %c0_i32, %c0_i32_0 : i32, i32
  }
  func.func @transform_4(%arg0: i32) -> (i32, i32) {
    %c0_i32 = arith.constant 0 : i32
    %c0_i32_0 = arith.constant 0 : i32
    %c0_i32_1 = arith.constant 0 : i32
    return %c0_i32, %c0_i32_0 : i32, i32
  }
  func.func @transform_5(%arg0: i32) -> (i32, i32) {
    %c0_i32 = arith.constant 0 : i32
    %c0_i32_0 = arith.constant 0 : i32
    %c0_i32_1 = arith.constant 0 : i32
    return %c0_i32, %c0_i32_0 : i32, i32
  }
  func.func @transform_6(%arg0: i32) -> (i32, i32) {
    %c0_i32 = arith.constant 0 : i32
    %c0_i32_0 = arith.constant 0 : i32
    %c0_i32_1 = arith.constant 0 : i32
    return %c0_i32, %c0_i32_0 : i32, i32
  }
  func.func @transform_7(%arg0: i32) -> (i32, i32) {
    %c0_i32 = arith.constant 0 : i32
    %c0_i32_0 = arith.constant 0 : i32
    %c0_i32_1 = arith.constant 0 : i32
    return %c0_i32, %c0_i32_0 : i32, i32
  }
  func.func @transform_8(%arg0: i32) -> (i32, i32) {
    %c0_i32 = arith.constant 0 : i32
    %c0_i32_0 = arith.constant 0 : i32
    %c0_i32_1 = arith.constant 0 : i32
    return %c0_i32, %c0_i32_0 : i32, i32
  }
  func.func @transform_9(%arg0: i32) -> (i32, i32) {
    %c0_i32 = arith.constant 0 : i32
    %c0_i32_0 = arith.constant 0 : i32
    %c0_i32_1 = arith.constant 0 : i32
    return %c0_i32, %c0_i32_0 : i32, i32
  }
  func.func @transform_10(%arg0: i32) -> (i32, i32) {
    %c0_i32 = arith.constant 0 : i32
    %c0_i32_0 = arith.constant 0 : i32
    %c0_i32_1 = arith.constant 0 : i32
    return %c0_i32, %c0_i32_0 : i32, i32
  }
  func.func @transform_11(%arg0: i32) -> (i32, i32) {
    %c0_i32 = arith.constant 0 : i32
    %c0_i32_0 = arith.constant 0 : i32
    %c0_i32_1 = arith.constant 0 : i32
    return %c0_i32, %c0_i32_0 : i32, i32
  }
  func.func @transform_12(%arg0: i32) -> (i32, i32) {
    %c0_i32 = arith.constant 0 : i32
    %c0_i32_0 = arith.constant 0 : i32
    %c0_i32_1 = arith.constant 0 : i32
    return %c0_i32, %c0_i32_0 : i32, i32
  }
  func.func @transform_13(%arg0: i32) -> (i32, i32) {
    %c0_i32 = arith.constant 0 : i32
    %c0_i32_0 = arith.constant 0 : i32
    %c0_i32_1 = arith.constant 0 : i32
    return %c0_i32, %c0_i32_0 : i32, i32
  }
  func.func @transform_14(%arg0: i32) -> (i32, i32) {
    %c0_i32 = arith.constant 0 : i32
    %c0_i32_0 = arith.constant 0 : i32
    %c0_i32_1 = arith.constant 0 : i32
    return %c0_i32, %c0_i32_0 : i32, i32
  }
  func.func @transform_15(%arg0: i32) -> (i32, i32) {
    %c0_i32 = arith.constant 0 : i32
    %c0_i32_0 = arith.constant 0 : i32
    %c0_i32_1 = arith.constant 0 : i32
    return %c0_i32, %c0_i32_0 : i32, i32
  }
  func.func @transform_16(%arg0: i32) -> (i32, i32, i32) {
    %c0_i32 = arith.constant 0 : i32
    %c0_i32_0 = arith.constant 0 : i32
    %c0_i32_1 = arith.constant 0 : i32
    return %arg0, %c0_i32, %c0_i32_0 : i32, i32, i32
  }
}

</mosaic_0001>

<bundles_post_ra>
// kernel: tpu_custom_call.1
= control target key start
LH: loop header
LB: loop body
LE: loop exit
PB: predicated region body
PF: predicated region fallthrough
CT: control target
= control target key end

     0   :  { %s5479_s0 = inlined_call_operand.hbm [shape: f32[4,16,128], index: 0, kind: input, shape index: {}]   ;;  %s5480_s1 = inlined_call_operand.hbm [shape: f32[16,16], index: 1, kind: input, shape index: {}]   ;;  %s5481_s2 = inlined_call_operand.vmem [shape: f32[1,128], index: 2, kind: input, shape index: {}]   ;;  %s5482_s3 = inlined_call_operand.vmem [shape: f32[1,128], index: 3, kind: input, shape index: {}]   ;;  %s5483_s4 = inlined_call_operand.hbm [shape: f32[128,128], index: 4, kind: input, shape index: {}]   ;;  %s5484_s5 = inlined_call_operand.hbm [shape: f32[128,128], index: 5, kind: input, shape index: {}]   ;;  %s5485_s6 = inlined_call_operand.hbm [shape: f32[128,128], index: 6, kind: input, shape index: {}]   ;;  %s5486_s7 = inlined_call_operand.vmem [shape: f32[1,128], index: 7, kind: input, shape index: {}]   ;;  %s5487_s8 = inlined_call_operand.hbm [shape: f32[32,128], index: 8, kind: input, shape index: {}]   ;;  %s5488_s9 = inlined_call_operand.hbm [shape: f32[32,128], index: 9, kind: input, shape index: {}]   ;;  %s5489_s10 = inlined_call_operand.vmem [shape: f32[1,128], index: 10, kind: input, shape index: {}]   ;;  %s5490_s11 = inlined_call_operand.vmem [shape: f32[1,128], index: 11, kind: input, shape index: {}]   ;;  %s5491_s12 = inlined_call_operand.hbm [shape: f32[128,512], index: 12, kind: input, shape index: {}]   ;;  %s5492_s13 = inlined_call_operand.vmem [shape: f32[1,512], index: 13, kind: input, shape index: {}]   ;;  %s5493_s14 = inlined_call_operand.hbm [shape: f32[512,128], index: 14, kind: input, shape index: {}]   ;;  %s5494_s15 = inlined_call_operand.vmem [shape: f32[1,128], index: 15, kind: input, shape index: {}]   ;;  %s5495_s16 = inlined_call_operand.hbm [shape: f32[4,16,128], index: 16, kind: output, shape index: {}]  }
   0x1   :  { %5507 = sst [smem:[#allocation27_spill]] %s5479_s0 }
   0x2   :  { %5508 = sst [smem:[#allocation28_spill]] %s5480_s1 }
   0x3   :  { %5509 = sst [smem:[#allocation29_spill]] %s5483_s4 }
   0x4   :  { %5510 = sst [smem:[#allocation30_spill]] %s5484_s5 }
   0x5   :  { %5511 = sst [smem:[#allocation31_spill]] %s5485_s6 }
   0x6   :  { %5512 = sst [smem:[#allocation32_spill]] %s5487_s8 }
   0x7   :  { %5513 = sst [smem:[#allocation33_spill]] %s5488_s9 }
   0x8   :  { %5514 = sst [smem:[#allocation34_spill]] %s5491_s12 }
   0x9   :  { %5515 = sst [smem:[#allocation35_spill]] %s5493_s14 }
   0xa   :  { %5516 = sst [smem:[#allocation36_spill]] %s5494_s15 }
   0xb   :  { %5517 = sst [smem:[#allocation37_spill]] %s5495_s16 }
   0xc   :  { %21 = vsyncpa [#allocation4], 0 }
   0xd   :  { %23 = vsyncpa [#allocation4 + $0x1], 0 }
   0xe   :  { %24 = vsyncpa [#allocation7], 0 }
   0xf   :  { %25 = vsyncpa [#allocation10], 0 }
  0x10   :  { %26 = vsyncpa [#allocation13], 0 }
  0x11   :  { %27 = vsyncpa [#allocation16], 0 }
  0x12   :  { %28 = vsyncpa [#allocation5], 0 }
  0x13   :  { %30 = vsyncpa [#allocation5 + $0x1], 0  ;;  %s4750_s21 = smov 0   ;;  %s4752_s22 = smov 0  }
  0x14   :  { %s4754_s23 = smov 0   ;;  %s4756_s24 = smov 0  }
  0x15 LB: > { %5518 = sst [smem:[#allocation25_spill]] %s4637_s23  ;;  %s4643_s25 = smov [#allocation6]   ;;  %s4641_s24 = sphi %s4756_s24, %s5560_s24   ;;  %s4637_s23 = sphi %s4754_s23, %s5557_s23   ;;  %s4633_s22 = sphi %s4752_s22, %s5559_s22   ;;  %s4629_s21 = sphi %s4750_s21, %s5558_s21  }
  0x16   : > { %s420_s26 = sshll.u32 %s4643_s25, 4  ;;  %s4771_s27 = sadd.s32 4294967295, %s4641_s24   ;;  %s421_s26 = int_to_ptr.vmem [resolvable:$true] %s420_s26 }
  0x17   : > { %p3575_p0 = scmp.ge.s32.totalorder %s4641_s24, 1  ;;  %p5502_p1 = scmp.eq.s32.totalorder %s4771_s27, 0 }
  0x18   : > { %p408_p2 = scmp.lt.s32.totalorder %s4641_s24, 3  ;;  %s4644_s29 = smov [#allocation9]  }
  0x19   : > { %s452_s30 = sshll.u32 %s4644_s29, 4  ;;  %s4645_s17 = smov [#allocation12]   ;;  %s4789_s30 = int_to_ptr.vmem [resolvable:$true] %s452_s30 }
  0x1a   : > { %p4776_p3 = pnand %p3575_p0, %p408_p2  ;;  %s481_s18 = sshll.u32 %s4645_s17, 4  ;;  %s4791_s18 = int_to_ptr.vmem [resolvable:$true] %s481_s18 }
  0x1b   : > { %s4336_s20 = scalar_lea.vmem %s421_s26, 256  ;;  %p4344_p11 = scmp.lt.s32.totalorder %s421_s26, %s421_s26 }
  0x1c   : > { %s5519_s28 = scalar_select %p4776_p3, 1, 0 }
  0x1d   : > { %p4138_p5 = pneg %p4776_p3  ;;  %p4337_p8 = scmp.ne.s32.totalorder %s421_s26, %s4336_s20 }
  0x1e   : > { %p4345_p12 = scmp.lt.s32.totalorder %s4336_s20, %s4336_s20 }
  0x1f   : > { %p4785_p6 = pnand %p4138_p5, %p5502_p1 }
  0x20   : > { %p4346_p13 = por %p4345_p12, %p4344_p11 }
  0x21   : > { %p4795_p7 = pneg %p4785_p6 }
  0x23   : > { %p4339_p9 = pnand %p4337_p8, %p4795_p7 }
  0x25   : > { %p4340_p10 = pneg %p4339_p9 }
  0x27   : > { %p4347_p0 = pnand %p4346_p13, %p4340_p10 }
  0x29   : > { %4350 = shalt.err (!%p4347_p0)
}
  0x2a   : > { %s5498_s25 = smov 128   ;;  %s5500_s29 = smov 8  }
  0x2b   : > { %s5522_s1 = sld [smem:[#allocation28_spill]]  ;;  %s4362_s15 = scalar_lea.vmem %s4789_s30, 2048 }
  0x2c   : > { %p4363_p2 = scmp.ne.s32.totalorder %s4789_s30, %s4362_s15  ;;  %p4370_p9 = scmp.lt.s32.totalorder %s4789_s30, %s4789_s30 }
  0x2d   : > { %p4371_p10 = scmp.lt.s32.totalorder %s4362_s15, %s4362_s15 }
  0x2e   : > { %p4365_p5 = pnand %p4363_p2, %p4795_p7 }
  0x2f   : > { %p4372_p11 = por %p4371_p10, %p4370_p9 }
  0x30   : > { %p4366_p8 = pneg %p4365_p5 }
  0x31   : > { %4141 = dma.hbm_to_vmem [thread:$0]  (!%p4785_p6), %s5522_s1, 256, %s421_s26, [#allocation7], %s5498_s25, %s5498_s25, %s5500_s29  }
  0x32   : > { %p4373_p12 = pnand %p4372_p11, %p4366_p8 }
  0x34   : > { %4376 = shalt.err (!%p4373_p12)
}
  0x35   : > { %s5523_s5 = sld [smem:[#allocation30_spill]]  ;;  %s4388_s26 = scalar_lea.vmem %s4791_s18, 512 }
  0x36   : > { %p4389_p13 = scmp.ne.s32.totalorder %s4791_s18, %s4388_s26  ;;  %p4396_p5 = scmp.lt.s32.totalorder %s4791_s18, %s4791_s18 }
  0x37   : > { %p4397_p8 = scmp.lt.s32.totalorder %s4388_s26, %s4388_s26 }
  0x38   : > { %p4391_p0 = pnand %p4389_p13, %p4795_p7 }
  0x39   : > { %p4398_p9 = por %p4397_p8, %p4396_p5 }
  0x3a   : > { %p4392_p2 = pneg %p4391_p0 }
  0x3b   : > { %4147 = dma.hbm_to_vmem [thread:$0]  (!%p4785_p6), %s5523_s5, 2048, %s4789_s30, [#allocation10], %s5498_s25, %s5498_s25, %s5500_s29  }
  0x3c   : > { %p4399_p10 = pnand %p4398_p9, %p4392_p2 }
  0x3e   : > { %4402 = shalt.err (!%p4399_p10)
}
  0x3f   : > { %s5524_s8 = sld [smem:[#allocation32_spill]]  ;;  %s4648_s30 = smov [#allocation15]  }
  0x40   : > { %s513_s20 = sshll.u32 %s4648_s30, 4  ;;  %s514_s20 = int_to_ptr.vmem [resolvable:$true] %s513_s20 }
  0x41   : > { %s4414_s16 = scalar_lea.vmem %s514_s20, 8192  ;;  %p4422_p0 = scmp.lt.s32.totalorder %s514_s20, %s514_s20 }
  0x42   : > { %p4415_p11 = scmp.ne.s32.totalorder %s514_s20, %s4414_s16  ;;  %p4423_p2 = scmp.lt.s32.totalorder %s4414_s16, %s4414_s16 }
  0x44   : > { %p4417_p12 = pnand %p4415_p11, %p4795_p7  ;;  %p4424_p5 = por %p4423_p2, %p4422_p0 }
  0x45   : > { %4153 = dma.hbm_to_vmem [thread:$0]  (!%p4785_p6), %s5524_s8, 512, %s4791_s18, [#allocation13], %s5498_s25, %s5498_s25, %s5500_s29  }
  0x46   : > { %p4418_p13 = pneg %p4417_p12 }
  0x48   : > { %p4425_p8 = pnand %p4424_p5, %p4418_p13 }
  0x4a   : > { %4428 = shalt.err (!%p4425_p8)
}
  0x4b   : > { %s4649_s26 = smov 512   ;;  %s4650_s1 = smov 32  }
  0x4c   : > { %s5525_s12 = sld [smem:[#allocation34_spill]]  ;;  %s4651_s17 = smov [#allocation8]  }
  0x4d   : > { %s439_s30 = sshll.u32 %s4651_s17, 4  ;;  %s4652_s25 = smov [#allocation11]   ;;  %s440_s30 = int_to_ptr.vmem [resolvable:$true] %s439_s30 }
  0x4e   : > { %s465_s29 = sshll.u32 %s4652_s25, 4  ;;  %s4440_s5 = scalar_lea.vmem %s440_s30, 2048  ;;  %s466_s29 = int_to_ptr.vmem [resolvable:$true] %s465_s29 }
  0x4f   : > { %p4441_p9 = scmp.ne.s32.totalorder %s440_s30, %s4440_s5  ;;  %p4448_p12 = scmp.lt.s32.totalorder %s440_s30, %s440_s30 }
  0x50   : > { %p4449_p13 = scmp.lt.s32.totalorder %s4440_s5, %s4440_s5 }
  0x51   : > { %p4443_p10 = pnand %p4441_p9, %p4795_p7 }
  0x52   : > { %4159 = dma.hbm_to_vmem [thread:$0]  (!%p4785_p6), %s5525_s12, 8192, %s514_s20, [#allocation16], %s4649_s26, %s4649_s26, %s4650_s1  }
  0x53   : > { %p4444_p11 = pneg %p4443_p10  ;;  %p4450_p0 = por %p4449_p13, %p4448_p12 }
  0x55   : > { %p4451_p2 = pnand %p4450_p0, %p4444_p11 }
  0x57   : > { %4454 = shalt.err (!%p4451_p2)
}
  0x58   : > { %s5526_s16 = smov 8   ;;  %s5527_s1 = smov 128  }
  0x59   : > { %s5528_s4 = sld [smem:[#allocation29_spill]]  ;;  %s4466_s25 = scalar_lea.vmem %s466_s29, 2048 }
  0x5a   : > { %p4467_p5 = scmp.ne.s32.totalorder %s466_s29, %s4466_s25  ;;  %p4474_p10 = scmp.lt.s32.totalorder %s466_s29, %s466_s29 }
  0x5b   : > { %p4475_p4 = scmp.lt.s32.totalorder %s4466_s25, %s4466_s25 }
  0x5c   : > { %p4469_p8 = pnand %p4467_p5, %p4795_p7 }
  0x5d   : > { %p4476_p12 = por %p4475_p4, %p4474_p10 }
  0x5e   : > { %p4470_p9 = pneg %p4469_p8 }
  0x5f   : > { %4144 = dma.hbm_to_vmem [thread:$0]  (!%p4785_p6), %s5528_s4, 2048, %s440_s30, [#allocation7], %s5527_s1, %s5527_s1, %s5526_s16  }
  0x60   : > { %p4477_p11 = pnand %p4476_p12, %p4470_p9 }
  0x62   : > { %4480 = shalt.err (!%p4477_p11)
}
  0x63   : > { %s5529_s6 = sld [smem:[#allocation31_spill]]  ;;  %s4653_s18 = smov [#allocation14]  }
  0x64   : > { %s494_s17 = sshll.u32 %s4653_s18, 4  ;;  %s4654_s30 = smov [#allocation17]   ;;  %s495_s17 = int_to_ptr.vmem [resolvable:$true] %s494_s17 }
  0x65   : > { %s529_s20 = sshll.u32 %s4654_s30, 4  ;;  %s4492_s26 = scalar_lea.vmem %s495_s17, 512  ;;  %s530_s20 = int_to_ptr.vmem [resolvable:$true] %s529_s20 }
  0x66   : > { %p4493_p4 = scmp.ne.s32.totalorder %s495_s17, %s4492_s26  ;;  %p4500_p2 = scmp.lt.s32.totalorder %s495_s17, %s495_s17 }
  0x67   : > { %p4501_p5 = scmp.lt.s32.totalorder %s4492_s26, %s4492_s26 }
  0x68   : > { %p4495_p13 = pnand %p4493_p4, %p4795_p7 }
  0x69   : > { %4150 = dma.hbm_to_vmem [thread:$0]  (!%p4785_p6), %s5529_s6, 2048, %s466_s29, [#allocation10], %s5527_s1, %s5527_s1, %s5526_s16  }
  0x6a   : > { %p4496_p0 = pneg %p4495_p13  ;;  %p4502_p8 = por %p4501_p5, %p4500_p2 }
  0x6c   : > { %p4503_p9 = pnand %p4502_p8, %p4496_p0 }
  0x6e   : > { %4506 = shalt.err (!%p4503_p9)
}
  0x6f   : > { %s5530_s9 = sld [smem:[#allocation33_spill]]  ;;  %s4518_s5 = scalar_lea.vmem %s530_s20, 8192 }
  0x70   : > { %p4519_p10 = scmp.ne.s32.totalorder %s530_s20, %s4518_s5  ;;  %p4526_p4 = scmp.lt.s32.totalorder %s530_s20, %s530_s20 }
  0x71   : > { %p4527_p13 = scmp.lt.s32.totalorder %s4518_s5, %s4518_s5 }
  0x72   : > { %p4521_p12 = pnand %p4519_p10, %p4795_p7 }
  0x73   : > { %p4528_p2 = por %p4527_p13, %p4526_p4 }
  0x74   : > { %p4522_p11 = pneg %p4521_p12 }
  0x75   : > { %4156 = dma.hbm_to_vmem [thread:$0]  (!%p4785_p6), %s5530_s9, 512, %s495_s17, [#allocation13], %s5527_s1, %s5527_s1, %s5526_s16  }
  0x76   : > { %p4529_p0 = pnand %p4528_p2, %p4522_p11 }
  0x78   : > { %4532 = shalt.err (!%p4529_p0)
}
  0x79   : > { %s5531_s14 = sld [smem:[#allocation35_spill]]  ;;  %s3574_s0 = sadd.s32 4294967294, %s4641_s24  }
  0x7a   : > { %s4888_s19 = sadd.s32 1, %s4641_s24   ;;  %s43_s30 = sadd.s32 1, %s4637_s23 }
  0x7b   : > { %s40_s17 = ssub.s32 %s4641_s24, %s4888_s19  ;;  %p50_p5 = scmp.ne.s32.totalorder %s4637_s23, %s4633_s22 }
  0x7c   : > { %p41_p7 = scmp.eq.s32.totalorder %s40_s17, 0  ;;  %p51_p8 = scmp.eq.s32.totalorder %s4641_s24, 0 }
  0x7d   : > { %p56_p9 = scmp.ne.s32.totalorder %s4633_s22, %s4629_s21  ;;  %p395_p12 = scmp.eq.s32.totalorder %s4771_s27, 1 }
  0x7e   : > { %s4899_s26 = scalar_select %p41_p7, %s4637_s23, %s43_s30  }
  0x7f   : > { %4162 = dma.hbm_to_vmem [thread:$0]  (!%p4785_p6), %s5531_s14, 8192, %s530_s20, [#allocation16], %s5527_s1, %s5527_s1, %s5526_s16  }
  0x80   : > { %5532 = sst [smem:[#allocation26_spill]] %s4899_s26  ;;  %p4901_p10 = por %p51_p8, %p50_p5 }
  0x81   : > { %p4907_p6 = por %p5502_p1, %p56_p9  ;;  %p401_p11 = scmp.eq.s32.totalorder %s3574_s0, 1 }
  0x82   : > { %p4179_p4 = scmp.lt.s32.totalorder %s4641_s24, 2  ;;  %s546_s25 = sand.u32 1, %s4637_s23  }
  0x83   : > { %s5534_s20 = scalar_select %p4907_p6, 1, 0 }
  0x84   : > { %p4914_p13 = por %p395_p12, %p50_p5  ;;  %p4918_p2 = por %p401_p11, %p56_p9 }
  0x85   : > { %s3585_s18 = sshll.u32 %s546_s25, 5  ;;  %s3661_s17 = sshll.u32 %s4641_s24, 9 }
  0x86   : > { %s5535_s5 = scalar_select %p4914_p13, 1, 0 }
  0x87   : > { %s5536_s15 = scalar_select %p4918_p2, 1, 0 }
  0x88   : > { %s5537_s6 = sld [smem:[#allocation27_spill]]  ;;  %s550_s0 = scalar_lea.vmem [#allocation3], %s3585_s18 }
  0x89   : > { %s558_s9 = sshll.u32 %s550_s0, 4  ;;  %p4932_p0 = pnand %p4179_p4, %p4901_p10  ;;  %s4928_s9 = int_to_ptr.vmem [resolvable:$true] %s558_s9 }
  0x8a   : > { %s4936_s14 = scalar_lea.sflag [#allocation4], %s546_s25 }
  0x8b   : > { %p4535_p5 = pneg %p4932_p0 }
  0x8e   : > { %s4926_s8 = scalar_lea.hbm %s5537_s6, %s3661_s17  ;;  %s4538_s18 = scalar_lea.hbm %s5537_s6, 1024 }
  0x8f   : > { %s4533_s26 = scalar_lea.hbm %s4926_s8, 512  ;;  %p4539_p10 = scmp.lt.s32.totalorder %s4926_s8, %s5537_s6 }
  0x90   : > { %p4534_p7 = scmp.ne.s32.totalorder %s4926_s8, %s4533_s26  ;;  %p4540_p12 = scmp.lt.s32.totalorder %s4538_s18, %s4533_s26 }
  0x92   : > { %p4536_p8 = pnand %p4535_p5, %p4534_p7  ;;  %p4541_p11 = por %p4540_p12, %p4539_p10 }
  0x94   : > { %p4537_p9 = pneg %p4536_p8 }
  0x96   : > { %p4542_p4 = pnand %p4541_p11, %p4537_p9 }
  0x98   : > { %4545 = shalt.err (!%p4542_p4)
}
  0x99   : > { %s4546_s29 = scalar_lea.vmem %s4928_s9, 512  ;;  %s4655_s25 = smov [#allocation3]  }
  0x9a   : > { %p4547_p1 = scmp.ne.s32.totalorder %s4928_s9, %s4546_s29  ;;  %s4551_s23 = sshll.u32 %s4655_s25, 4  ;;  %s4552_s23 = int_to_ptr.vmem [resolvable:$false] %s4551_s23 }
  0x9b   : > { %s4553_s4 = scalar_lea.vmem %s4552_s23, 1024  ;;  %p4554_p8 = scmp.lt.s32.totalorder %s4928_s9, %s4552_s23 }
  0x9c   : > { %p4549_p2 = pnand %p4547_p1, %p4535_p5  ;;  %p4555_p13 = scmp.lt.s32.totalorder %s4553_s4, %s4546_s29 }
  0x9e   : > { %p4550_p7 = pneg %p4549_p2  ;;  %p4556_p6 = por %p4555_p13, %p4554_p8 }
  0xa0   : > { %p4557_p3 = pnand %p4556_p6, %p4550_p7 }
  0xa2   : > { %4560 = shalt.err (!%p4557_p3)
}
  0xa3   : > { %4166 = dma.hbm_to_vmem [thread:$0]  (!%p4932_p0), %s4926_s8, 512, %s4928_s9, %s4936_s14, %s5527_s1, %s5527_s1, %s5526_s16  }
  0xa4   : > { %p5539_p1 = scmp.ne.s32.totalorder %s5519_s28, 0 }
  0xa5   : > { %s4963_s26 = sand.u32 (!%p5539_p1), 1, %s4633_s22   ;;  %p5540_p3 = scmp.ne.s32.totalorder (!%p5539_p1), %s5534_s20, 0 }
  0xa6   : > { %570 = sbr.rel (%p5539_p1) target bundleno = 5721 (0x1659), region = 84  ;;  %s3590_s23 = sshll.u32 (!%p5539_p1), %s4963_s26, 5 }
  0xa7   : > { %s573_s17 = scalar_lea.sflag (!%p5539_p1), [#allocation4], %s4963_s26  ;;  %s4969_s12 = scalar_lea.vmem (!%p5539_p1), [#allocation3], %s3590_s23 }
  0xab   : > { %4604 = dma.done.wait (%p5540_p3), %s573_s17, 512  }
  0xac   : > { %4606 = vsyncadd (%p5540_p3), %s573_s17, 4294966784  ;;  %p5541_p6 = scmp.eq.s32.totalorder %s4771_s27, 0 }
  0xae   : > { %4608 = dma.done.wait (%p5541_p6), [#allocation7], 2304   ;;  %p5542_p13 = pmov %p5541_p6 }
  0xaf   : > { %p5543_p2 = pmov %p5541_p6 }
  0xb0   : > { %4610 = vsyncadd (%p5542_p13), [#allocation7], 4294964992 }
  0xb1   : > { %4612 = dma.done.wait (%p5543_p2), [#allocation10], 4096   ;;  %p5544_p0 = pmov %p5543_p2 }
  0xb3   : > { %4614 = vsyncadd (%p5544_p0), [#allocation10], 4294963200  ;;  %p5545_p5 = pmov %p5544_p0 }
  0xb4   : > { %p5546_p9 = pmov %p5544_p0 }
  0xb5   : > { %4616 = dma.done.wait (%p5545_p5), [#allocation13], 1024  }
  0xb6   : > { %4618 = vsyncadd (%p5546_p9), [#allocation13], 4294966272  ;;  %p5547_p10 = pmov %p5544_p0 }
  0xb7   : > { %p5548_p12 = pmov %p5544_p0 }
  0xb8   : > { %4620 = dma.done.wait (%p5547_p10), [#allocation16], 16384  }
  0xb9   : > { %4622 = vsyncadd (%p5548_p12), [#allocation16], 4294950912  ;;  %v659_v0 = vld [vmem:[%s4969_s12] sm:$0xff]  ;;  %v660_v1 = vld [vmem:[%s4969_s12 + $0x8] sm:$0xff]  ;;  %s4656_s16 = smov 1   ;;  %s4657_s1 = smov 127  }
  0xba   : > { %663 = vadd.xlane.f32.xlu0 %v659_v0  ;;  %v4994_v2 = vld [vmem:[%s4969_s12 + $0x10] sm:$0xff]  ;;  %v777_v3 = vld [vmem:[#allocation8 + $0x78] sm:$0xff]  ;;  %v776_v5 = vld [vmem:[#allocation8 + $0x70] sm:$0xff]  ;;  %vm1014_vm1 = vcmask 261120   ;;  %vm1106_vm2 = vcmask 130048   ;;  %s4658_s20 = smov 96  }
  0xbb   : > { %v926_v4 = vld [vmem:[#allocation9 + $0x78] sm:$0xff]  ;;  %3876 = vmatprep.subr.mxu0 %v777_v3  ;;  %v925_v6 = vld [vmem:[#allocation9 + $0x70] sm:$0xff]  ;;  %v5006_v15 = vld [vmem:[%s4969_s12 + $0x18] sm:$0xff]  ;;  %s4659_s18 = smov 64   ;;  %s4660_s30 = smov 32   ;;  %vm1426_vm3 = vcmask 523520  }
  0xbc   : > { %3914 = vmatprep.subr.mxu1 %v926_v4  ;;  %3877 = vmatpush3.msra.mxu0 %v777_v3  ;;  %v775_v16 = vld [vmem:[#allocation8 + $0x68] sm:$0xff]  ;;  %v774_v18 = vld [vmem:[#allocation8 + $0x60] sm:$0xff]  ;;  %v773_v20 = vld [vmem:[#allocation8 + $0x58] sm:$0xff]  ;;  %vm1641_vm4 = vcmask 785920   ;;  %vm1856_vm5 = vcmask 1048320   ;;  %s5552_s0 = sld [smem:[#allocation37_spill]] }
  0xbd   : > { %3915 = vmatpush3.msra.mxu1 %v926_v4  ;;  %3878 = vmatprep.subr.mxu0 %v776_v5  ;;  %v924_v17 = vld [vmem:[#allocation9 + $0x68] sm:$0xff]  ;;  %v923_v19 = vld [vmem:[#allocation9 + $0x60] sm:$0xff]  ;;  %v922_v21 = vld [vmem:[#allocation9 + $0x58] sm:$0xff]  ;;  %s3411_s25 = scalar_lea.sflag [#allocation5], %s4963_s26  ;;  %p5553_p4 = scmp.ne.s32.totalorder %s5535_s5, 0 }
  0xbe   : > { %665 = vadd.xlane.f32.xlu0 %v660_v1  ;;  %3916 = vmatprep.subr.mxu1 %v925_v6  ;;  %v772_v22 = vld [vmem:[#allocation8 + $0x50] sm:$0xff]  ;;  %v771_v24 = vld [vmem:[#allocation8 + $0x48] sm:$0xff]  ;;  %v770_v26 = vld [vmem:[#allocation8 + $0x40] sm:$0xff] }
  0xbf   : > { %3879 = vmatpush3.msra.mxu0 %v776_v5  ;;  %3917 = vmatpush3.msra.mxu1 %v925_v6  ;;  %v921_v23 = vld [vmem:[#allocation9 + $0x50] sm:$0xff]  ;;  %v920_v25 = vld [vmem:[#allocation9 + $0x48] sm:$0xff]  ;;  %v919_v27 = vld [vmem:[#allocation9 + $0x40] sm:$0xff] }
  0xc0   : > { %3880 = vmatprep.subr.mxu0 %v775_v16  ;;  %3918 = vmatprep.subr.mxu1 %v924_v17  ;;  %v769_v28 = vld [vmem:[#allocation8 + $0x38] sm:$0xff]  ;;  %v768_v30 = vld [vmem:[#allocation8 + $0x30] sm:$0xff]  ;;  %v767_v32 = vld [vmem:[#allocation8 + $0x28] sm:$0xff] }
  0xc1   : > { %3881 = vmatpush3.msra.mxu0 %v775_v16  ;;  %3919 = vmatpush3.msra.mxu1 %v924_v17  ;;  %v918_v29 = vld [vmem:[#allocation9 + $0x38] sm:$0xff]  ;;  %v917_v31 = vld [vmem:[#allocation9 + $0x30] sm:$0xff]  ;;  %v916_v33 = vld [vmem:[#allocation9 + $0x28] sm:$0xff] }
  0xc2   : > { %667 = vadd.xlane.f32.xlu0 %v4994_v2  ;;  %3882 = vmatprep.subr.mxu0 %v774_v18  ;;  %v766_v34 = vld [vmem:[#allocation8 + $0x20] sm:$0xff]  ;;  %v765_v37 = vld [vmem:[#allocation8 + $0x18] sm:$0xff]  ;;  %v764_v40 = vld [vmem:[#allocation8 + $0x10] sm:$0xff] }
  0xc3   : > { %3920 = vmatprep.subr.mxu1 %v923_v19  ;;  %3883 = vmatpush3.msra.mxu0 %v774_v18  ;;  %v915_v35 = vld [vmem:[#allocation9 + $0x20] sm:$0xff]  ;;  %v914_v38 = vld [vmem:[#allocation9 + $0x18] sm:$0xff]  ;;  %v913_v41 = vld [vmem:[#allocation9 + $0x10] sm:$0xff] }
  0xc4   : > { %3921 = vmatpush3.msra.mxu1 %v923_v19  ;;  %3884 = vmatprep.subr.mxu0 %v773_v20  ;;  %v763_v42 = vld [vmem:[#allocation8 + $0x8] sm:$0xff]  ;;  %v762_v45 = vld [vmem:[#allocation8] sm:$0xff]  ;;  %v3600_v59 = vld [vmem:[%s5481_s2] ss:$0 sm:$0xff] }
  0xc5   : > { %3922 = vmatprep.subr.mxu1 %v922_v21  ;;  %3885 = vmatpush3.msra.mxu0 %v773_v20  ;;  %v912_v44 = vld [vmem:[#allocation9 + $0x8] sm:$0xff]  ;;  %v911_v46 = vld [vmem:[#allocation9] sm:$0xff]  ;;  %v3601_v61 = vld [vmem:[%s5482_s3] ss:$0 sm:$0xff]  ;;  %v758_v20 = vlaneseq }
  0xc6   : > { %3923 = vmatpush3.msra.mxu1 %v922_v21  ;;  %3886 = vmatprep.subr.mxu0 %v772_v22 }
  0xc7   : > { %3924 = vmatprep.subr.mxu1 %v921_v23  ;;  %3887 = vmatpush3.msra.mxu0 %v772_v22  ;;  %v759_v21 = vand.u32 127, %v758_v20 }
  0xc8   : > { %3925 = vmatpush3.msra.mxu1 %v921_v23  ;;  %3888 = vmatprep.subr.mxu0 %v771_v24  ;;  %v730_v23 = vld [vmem:[#allocation12] sm:$0xff] }
  0xc9   : > { %3926 = vmatprep.subr.mxu1 %v920_v25  ;;  %3889 = vmatpush3.msra.mxu0 %v771_v24  ;;  %v760_v22 = vand.u32 1, %v759_v21  ;;  %v734_v24 = vld [vmem:[#allocation14] sm:$0xff] }
  0xca   : > { %3927 = vmatpush3.msra.mxu1 %v920_v25  ;;  %3890 = vmatprep.subr.mxu0 %v770_v26 }
  0xcb   : > { %3928 = vmatprep.subr.mxu1 %v919_v27  ;;  %3891 = vmatpush3.msra.mxu0 %v770_v26  ;;  %vm5024_vm0 = vcmp.eq.s32.totalorder %v760_v22, 1 }
  0xcc   : > { %3929 = vmatpush3.msra.mxu1 %v919_v27  ;;  %3892 = vmatprep.subr.mxu0 %v769_v28 }
  0xcd   : > { %3930 = vmatprep.subr.mxu1 %v918_v29  ;;  %3893 = vmatpush3.msra.mxu0 %v769_v28 }
  0xce   : > { %3931 = vmatpush3.msra.mxu1 %v918_v29  ;;  %3894 = vmatprep.subr.mxu0 %v768_v30  ;;  %v731_v29 = vld [vmem:[#allocation12 + $0x8] sm:$0xff] }
  0xcf   : > { %3932 = vmatprep.subr.mxu1 %v917_v31  ;;  %3895 = vmatpush3.msra.mxu0 %v768_v30  ;;  %v735_v30 = vld [vmem:[#allocation14 + $0x8] sm:$0xff] }
  0xd0   : > { %3933 = vmatpush3.msra.mxu1 %v917_v31  ;;  %3896 = vmatprep.subr.mxu0 %v767_v32  ;;  %v738_v31 = vmul.f32 %v730_v23, %v730_v23 }
  0xd1   : > { %3934 = vmatprep.subr.mxu1 %v916_v33  ;;  %3897 = vmatpush3.msra.mxu0 %v767_v32  ;;  %v742_v32 = vmul.f32 %v734_v24, %v734_v24 }
  0xd2   : > { %3935 = vmatpush3.msra.mxu1 %v916_v33  ;;  %3898 = vmatprep.subr.mxu0 %v766_v34  ;;  %v750_v33 = vmul.f32 2.0, %v730_v23 }
  0xd3   : > { %3936 = vmatprep.subr.mxu1 %v915_v35  ;;  %3899 = vmatpush3.msra.mxu0 %v766_v34 }
  0xd4   : > { %3937 = vmatpush3.msra.mxu1 %v915_v35  ;;  %3900 = vmatprep.subr.mxu0 %v765_v37 }
  0xd5   : > { %3938 = vmatprep.subr.mxu1 %v914_v38  ;;  %3901 = vmatpush3.msra.mxu0 %v765_v37 }
  0xd6   : > { %3939 = vmatpush3.msra.mxu1 %v914_v38  ;;  %3902 = vmatprep.subr.mxu0 %v764_v40 }
  0xd7   : > { %3940 = vmatprep.subr.mxu1 %v913_v41  ;;  %3903 = vmatpush3.msra.mxu0 %v764_v40  ;;  %v743_v40 = vmul.f32 %v735_v30, %v735_v30 }
  0xd8   : > { %3941 = vmatpush3.msra.mxu1 %v913_v41  ;;  %3904 = vmatprep.subr.mxu0 %v763_v42 }
  0xd9   : > { %3942 = vmatprep.subr.mxu1 %v912_v44  ;;  %3905 = vmatpush3.msra.mxu0 %v763_v42  ;;  %v746_v42 = vsub.f32 %v738_v31, %v742_v32 }
  0xda   : > { %3943 = vmatpush3.msra.mxu1 %v912_v44  ;;  %3906 = vmatprep.subr.mxu0 %v762_v45 }
  0xdb   : > { %3944 = vmatprep.subr.mxu1 %v911_v46  ;;  %3907 = vmatpush3.msra.mxu0 %v762_v45 }
  0xdc   : > { %3945 = vmatpush3.msra.mxu1 %v911_v46 }
 0x143   : > { %v664_v7 = vpop.xlane.xlu0 %663 }
 0x144   : > { %v672_v8 = vmul.f32 0.0078125, %v664_v7 }
 0x146   : > { %v4997_v9 = vsub.f32 %v659_v0, %v672_v8 }
 0x147   : > { %v666_v10 = vpop.xlane.xlu0 %665 }
 0x148   : > { %v673_v11 = vmul.f32 0.0078125, %v666_v10  ;;  %v680_v12 = vmul.f32 %v4997_v9, %v4997_v9 }
 0x14a   : > { %684 = vadd.xlane.f32.xlu1 %v680_v12  ;;  %v5001_v13 = vsub.f32 %v660_v1, %v673_v11 }
 0x14b   : > { %v668_v36 = vpop.xlane.xlu0 %667 }
 0x14c   : > { %v681_v14 = vmul.f32 %v5001_v13, %v5001_v13  ;;  %v674_v39 = vmul.f32 0.0078125, %v668_v36  ;;  %v751_v36 = vmul.f32 2.0, %v731_v29 }
 0x14e   : > { %686 = vadd.xlane.f32.xlu1 %v681_v14  ;;  %v678_v43 = vsub.f32 %v4994_v2, %v674_v39  ;;  %v739_v39 = vmul.f32 %v731_v29, %v731_v29  ;;  %v755_v45 = vmul.f32 %v751_v36, %v735_v30 }
 0x150   : > { %v682_v47 = vmul.f32 %v678_v43, %v678_v43 }
 0x152   : > { %669 = vadd.xlane.f32.xlu1 %v5006_v15  ;;  %688 = vadd.xlane.f32.xlu0 %v682_v47  ;;  %v747_v47 = vsub.f32 %v739_v39, %v743_v40 }
 0x1d3   : > { %v685_v48 = vpop.xlane.xlu1 %684 }
 0x1d4   : > { %v692_v49 = vmul.f32 0.0078125, %v685_v48 }
 0x1d6   : > { %v696_v50 = vadd.f32 1e-05, %v692_v49 }
 0x1d7   : > { %v687_v51 = vpop.xlane.xlu1 %686 }
 0x1d8   : > { %4241 = vrsqrt.f32 %v696_v50  ;;  %v693_v52 = vmul.f32 0.0078125, %v687_v51 }
 0x1da   : > { %v697_v53 = vadd.f32 1e-05, %v693_v52 }
 0x1db   : > { %v670_v54 = vpop.xlane.xlu1 %669  ;;  %v689_v4 = vpop.xlane.xlu0 %688 }
 0x1dc   : > { %4243 = vrsqrt.f32 %v697_v53  ;;  %v675_v55 = vmul.f32 0.0078125, %v670_v54  ;;  %v694_v5 = vmul.f32 0.0078125, %v689_v4 }
 0x1de   : > { %v679_v56 = vsub.f32 %v5006_v15, %v675_v55  ;;  %v698_v6 = vadd.f32 1e-05, %v694_v5 }
 0x1e0   : > { %v683_v57 = vmul.f32 %v679_v56, %v679_v56  ;;  %4245 = vrsqrt.f32 %v698_v6 }
 0x1e2   : > { %690 = vadd.xlane.f32.xlu1 %v683_v57 }
 0x1e5   : > { %v4242_v58 = vpop.eup %4241 }
 0x1e6   : > { %v704_v60 = vmul.f32 %v4242_v58, %v4997_v9 }
 0x1e8   : > { %v715_v62 = vmul.f32 %v3600_v59, %v704_v60 }
 0x1e9   : > { %v4244_v63 = vpop.eup %4243 }
 0x1ea   : > { %v726_v0 = vadd.f32 %v3601_v61, %v715_v62  ;;  %v705_v1 = vmul.f32 %v4244_v63, %v5001_v13  ;;  %v5064_v63 = vld [vmem:[#allocation6 + $0x8] sm:$0xff] }
 0x1ec   : > { %3908 = vmatprep.mubr.f32.mxu0 %v726_v0  ;;  %3946 = vmatprep.mubr.f32.mxu1 %v726_v0  ;;  %v716_v2 = vmul.f32 %v3600_v59, %v705_v1 }
 0x1ed   : > { %v4246_v7 = vpop.eup %4245 }
 0x1ee   : > { %v727_v3 = vadd.f32 %v3601_v61, %v716_v2  ;;  %v706_v8 = vmul.f32 %v4246_v7, %v678_v43  ;;  %v754_v43 = vmul.f32 %v750_v33, %v734_v24  ;;  %v5066_v2 = vld [vmem:[#allocation6] sm:$0xff] }
 0x1f0   : > { %3909 = vmatmul.mubr.f32.vlgmr.msra.gmra.mxu0 %v727_v3  ;;  %3947 = vmatmul.mubr.f32.vlgmr.msra.gmra.mxu1 %v727_v3  ;;  %v717_v9 = vmul.f32 %v3600_v59, %v706_v8 }
 0x1f2   : > { %v728_v10 = vadd.f32 %v3601_v61, %v717_v9 }
 0x1f4   : > { %3911 = vmatprep.mubr.f32.mxu0 %v728_v10  ;;  %3949 = vmatprep.mubr.f32.mxu1 %v728_v10 }
 0x26b   : > { %v691_v11 = vpop.xlane.xlu1 %690 }
 0x26c   : > { %v695_v12 = vmul.f32 0.0078125, %v691_v11 }
 0x26e   : > { %v699_v14 = vadd.f32 1e-05, %v695_v12 }
 0x270   : > { %4247 = vrsqrt.f32 %v699_v14 }
 0x27d   : > { %v4248_v13 = vpop.eup %4247 }
 0x27e   : > { %v707_v15 = vmul.f32 %v4248_v13, %v679_v56 }
 0x280   : > { %v718_v16 = vmul.f32 %v3600_v59, %v707_v15 }
 0x282   : > { %v729_v17 = vadd.f32 %v3601_v61, %v718_v16 }
 0x284   : > { %3912 = vmatmul.mubr.f32.gmra.mxu0 %v729_v17  ;;  %3950 = vmatmul.mubr.f32.gmra.mxu1 %v729_v17 }
 0x2b0   : > { %v3910_v18 = vpop.f32.mrf.mxu0  ;;  %v5046_v57 = vpop.f32.mrf.mxu1 }
 0x2b1   : > { %865 = vrot.lane.b32.xlu1 %v3910_v18, %s4656_s16  ;;  %873 = vrot.lane.b32.xlu0 %v3910_v18, %s4657_s1  ;;  %v888_v35 = vmul.f32 %v3910_v18, %v731_v29  ;;  %v900_v56 = vmul.f32 %v3910_v18, %v747_v47 }
 0x2b2   : > { %v844_v19 = vpop.f32.mrf.mxu0  ;;  %v5055_v59 = vpop.f32.mrf.mxu1 }
 0x2b3   : > { %v887_v49 = vmul.f32 %v844_v19, %v730_v23  ;;  %v899_v50 = vmul.f32 %v844_v19, %v746_v42 }
 0x2b5   : > { %871 = vrot.lane.b32.xlu1 %v844_v19, %s4657_s1 }
 0x2b9   : > { %863 = vrot.lane.b32.xlu1 %v844_v19, %s4656_s16 }
 0x323   : > { %v866_v25 = vpop.permute.xlu1 %865  ;;  %v874_v27 = vpop.permute.xlu0 %873 }
 0x324   : > { %v880_v28 = vsub.f32 0.0, %v874_v27 }
 0x326   : > { %v884_v34 = vsel %vm5024_vm0, %v866_v25, %v880_v28 }
 0x327   : > { %v892_v37 = vmul.f32 %v884_v34, %v735_v30  ;;  %v872_v38 = vpop.permute.xlu1 %871  ;;  %v904_v53 = vmul.f32 %v884_v34, %v755_v45 }
 0x328   : > { %v879_v44 = vsub.f32 0.0, %v872_v38 }
 0x329   : > { %v5030_v41 = vadd.f32 %v892_v37, %v888_v35  ;;  %v5050_v58 = vadd.f32 %v904_v53, %v900_v56 }
 0x32b   : > { %v864_v46 = vpop.permute.xlu1 %863  ;;  %3952 = vmatprep.subr.msk.mxu0 %vm1014_vm1, %v5030_v41 }
 0x32c   : > { %v883_v48 = vsel %vm5024_vm0, %v864_v46, %v879_v44  ;;  %3953 = vmatpush3.xpose.msk.msra.mxu0 %vm1014_vm1, %v5030_v41 }
 0x32d   : > { %v891_v51 = vmul.f32 %v883_v48, %v734_v24  ;;  %v903_v52 = vmul.f32 %v883_v48, %v754_v43 }
 0x32f   : > { %v5038_v54 = vadd.f32 %v891_v51, %v887_v49  ;;  %v5040_v55 = vadd.f32 %v903_v52, %v899_v50 }
 0x331   : > { %3954 = vmatprep.subr.msk.mxu0 %vm1014_vm1, %v5038_v54  ;;  %3956 = vmatprep.mubr.msk.f32.mxu0 %vm1014_vm1, %v5040_v55 }
 0x332   : > { %3955 = vmatpush3.xpose.msk.msra.mxu0 %vm1014_vm1, %v5038_v54 }
 0x333   : > { %3959 = vmatprep.subr.mxu0 %v5046_v57 }
 0x335   : > { %3957 = vmatmul.mubr.msk.f32.vlgmr.msra.gmra.mxu0 %vm1014_vm1, %v5050_v58 }
 0x336   : > { %3960 = vmatpush3.msra.mxu0 %v5046_v57 }
 0x337   : > { %3961 = vmatprep.subr.mxu0 %v5055_v59 }
 0x338   : > { %3962 = vmatpush3.msra.mxu0 %v5055_v59 }
 0x344   : > { %v5060_v60 = vpop.f32.mrf.mxu0 }
 0x346   : > { %v5062_v61 = vpop.f32.mrf.mxu0 }
 0x3f5   : > { %v3958_v62 = vpop.f32.mrf.mxu0 }
 0x3f6   : > { %v1103_v0 = vmul.f32 0.088388346, %v3958_v62 }
 0x3f7   : > { %v1093_v1 = vpop.f32.mrf.mxu0 }
 0x3f8   : > { %v1102_v3 = vmul.f32 0.088388346, %v1093_v1  ;;  %v1105_v4 = vadd.f32 %v1103_v0, %v5064_v63 }
 0x3fa   : > { %v1110_v5 = vsel %vm1106_vm2, %v1105_v4, -inf  ;;  %v1104_v6 = vadd.f32 %v1102_v3, %v5066_v2 }
 0x3fb   : > { %1111 = vmax.xlane.f32.xlu1 %v1110_v5 }
 0x3fc   : > { %v1107_v7 = vsel %vm1106_vm2, %v1104_v6, -inf }
 0x3fd   : > { %1108 = vmax.xlane.f32.xlu0 %v1107_v7 }
 0x40c   : > { %1216 = vrot.lane.b32.xlu1 %v5038_v54, %s4658_s20 }
 0x410   : > { %1212 = vrot.lane.b32.xlu1 %v5040_v55, %s4658_s20 }
 0x414   : > { %1435 = vrot.lane.b32.xlu1 %v5030_v41, %s4659_s18 }
 0x418   : > { %1433 = vrot.lane.b32.xlu1 %v5038_v54, %s4659_s18 }
 0x41c   : > { %1431 = vrot.lane.b32.xlu1 %v5050_v58, %s4659_s18 }
 0x484   : > { %v1112_v8 = vpop.xlane.xlu1 %1111 }
 0x485   : > { %v1114_v9 = vsub.f32 %v1105_v4, %v1112_v8 }
 0x486   : > { %v1109_v10 = vpop.xlane.xlu0 %1108 }
 0x487   : > { %v1117_v11 = vmul.f32 1.442695, %v1114_v9  ;;  %v1113_v12 = vsub.f32 %v1104_v6, %v1109_v10 }
 0x488   : > { %v1217_v22 = vpop.permute.xlu1 %1216 }
 0x489   : > { %4249 = vpow2.f32 %v1117_v11  ;;  %v1115_v14 = vmul.f32 1.442695, %v1113_v12 }
 0x48b   : > { %4251 = vpow2.f32 %v1115_v14 }
 0x48c   : > { %v1213_v25 = vpop.permute.xlu1 %1212 }
 0x490   : > { %v1436_v30 = vpop.permute.xlu1 %1435 }
 0x494   : > { %v1434_v32 = vpop.permute.xlu1 %1433 }
 0x496   : > { %v4250_v13 = vpop.eup %4249 }
 0x497   : > { %v1122_v15 = vsel %vm1106_vm2, %v4250_v13, 0.0 }
 0x498   : > { %v4252_v16 = vpop.eup %4251  ;;  %1123 = vadd.xlane.f32.xlu0 %v1122_v15  ;;  %v1432_v33 = vpop.permute.xlu1 %1431 }
 0x499   : > { %v1119_v17 = vsel %vm1106_vm2, %v4252_v16, 0.0 }
 0x49c   : > { %1120 = vadd.xlane.f32.xlu0 %v1119_v17 }
 0x4b2   : > { %1218 = vrot.lane.b32.xlu0 %v5030_v41, %s4658_s20 }
 0x4b6   : > { %1214 = vrot.lane.b32.xlu0 %v5050_v58, %s4658_s20 }
 0x4ba   : > { %1429 = vrot.lane.b32.xlu0 %v5040_v55, %s4659_s18 }
 0x521   : > { %v1124_v18 = vpop.xlane.xlu0 %1123 }
 0x522   : > { %4253 = vrcp.f32 %v1124_v18 }
 0x525   : > { %v1121_v19 = vpop.xlane.xlu0 %1120 }
 0x526   : > { %4255 = vrcp.f32 %v1121_v19 }
 0x529   : > { %v1219_v21 = vpop.permute.xlu0 %1218 }
 0x52a   : > { %3966 = vmatprep.subr.msk.mxu0 %vm1014_vm1, %v1219_v21 }
 0x52d   : > { %v1215_v29 = vpop.permute.xlu0 %1214 }
 0x52f   : > { %v4254_v23 = vpop.eup %4253 }
 0x530   : > { %v1128_v28 = vmul.f32 %v4254_v23, %v4250_v13 }
 0x531   : > { %v1430_v31 = vpop.permute.xlu0 %1429 }
 0x533   : > { %v4256_v24 = vpop.eup %4255 }
 0x534   : > { %v1127_v27 = vmul.f32 %v4256_v24, %v4252_v16 }
 0x536   : > { %3963 = vmatprep.mubr.msk.f32.mxu0 %vm1106_vm2, %v1127_v27 }
 0x537   : > { %3964 = vmatmul.mubr.msk.f32.vlgmr.msra.gmra.mxu0 %vm1106_vm2, %v1128_v28 }
 0x538   : > { %3967 = vmatpush3.xpose.msk.msra.mxu0 %vm1014_vm1, %v1219_v21  ;;  %3970 = vmatprep.mubr.msk.f32.mxu0 %vm1014_vm1, %v1213_v25 }
 0x539   : > { %3968 = vmatprep.subr.msk.mxu0 %vm1014_vm1, %v1217_v22 }
 0x53c   : > { %3969 = vmatpush3.xpose.msk.msra.mxu0 %vm1014_vm1, %v1217_v22  ;;  %v5146_v22 = vpop.f32.mrf.mxu1 }
 0x53d   : > { %3980 = vmatprep.subr.msk.mxu0 %vm1014_vm1, %v1436_v30 }
 0x53e   : > { %v5151_v23 = vpop.f32.mrf.mxu1 }
 0x53f   : > { %3971 = vmatmul.mubr.msk.f32.vlgmr.msra.gmra.mxu0 %vm1014_vm1, %v1215_v29 }
 0x540   : > { %3981 = vmatpush3.xpose.msk.msra.mxu0 %vm1014_vm1, %v1436_v30  ;;  %3984 = vmatprep.mubr.msk.f32.mxu0 %vm1014_vm1, %v1430_v31 }
 0x541   : > { %3982 = vmatprep.subr.msk.mxu0 %vm1014_vm1, %v1434_v32 }
 0x544   : > { %3983 = vmatpush3.xpose.msk.msra.mxu0 %vm1014_vm1, %v1434_v32 }
 0x547   : > { %3985 = vmatmul.mubr.msk.f32.vlgmr.msra.gmra.mxu0 %vm1014_vm1, %v1432_v33 }
 0x5f7   : > { %v3965_v34 = vpop.f32.mrf.mxu0 }
 0x5f8   : > { %1211 = vst.msk [vmem:[#allocation2 + $0x8] sm:$0xff] %vm1014_vm1, %v3965_v34 }
 0x5f9   : > { %v1201_v35 = vpop.f32.mrf.mxu0 }
 0x5fa   : > { %1210 = vst.msk [vmem:[#allocation2] sm:$0xff] %vm1014_vm1, %v1201_v35 }
 0x5ff   : > { %v3972_v36 = vpop.f32.mrf.mxu0 }
 0x600   : > { %v1304_v47 = vmul.f32 0.088388346, %v3972_v36 }
 0x601   : > { %v1294_v37 = vpop.f32.mrf.mxu0 }
 0x602   : > { %v1306_v48 = vadd.f32 %v1304_v47, %v5064_v63  ;;  %v1303_v9 = vmul.f32 0.088388346, %v1294_v37 }
 0x604   : > { %v1310_v49 = vsel %vm1106_vm2, %v1306_v48, -inf  ;;  %v1305_v10 = vadd.f32 %v1303_v9, %v5066_v2  ;;  %v733_v9 = vld [vmem:[#allocation12 + $0x18] sm:$0xff] }
 0x606   : > { %v1307_v11 = vsel %vm1106_vm2, %v1305_v10, -inf }
 0x607   : > { %v3986_v38 = vpop.f32.mrf.mxu0 }
 0x608   : > { %v1521_v39 = vmul.f32 0.088388346, %v3986_v38 }
 0x609   : > { %v1511_v40 = vpop.f32.mrf.mxu0 }
 0x60a   : > { %v1520_v42 = vmul.f32 0.088388346, %v1511_v40  ;;  %v1523_v43 = vadd.f32 %v1521_v39, %v5064_v63 }
 0x60c   : > { %v1527_v44 = vsel %vm1106_vm2, %v1523_v43, -inf  ;;  %v1522_v45 = vadd.f32 %v1520_v42, %v5066_v2 }
 0x60d   : > { %1528 = vmax.xlane.f32.xlu1 %v1527_v44 }
 0x60e   : > { %v1524_v46 = vsel %vm1106_vm2, %v1522_v45, -inf }
 0x60f   : > { %1525 = vmax.xlane.f32.xlu0 %v1524_v46 }
 0x61e   : > { %1546 = vrot.lane.b32.xlu1 %v5055_v59, %s4659_s18 }
 0x622   : > { %1650 = vrot.lane.b32.xlu1 %v5030_v41, %s4660_s30 }
 0x626   : > { %1648 = vrot.lane.b32.xlu1 %v5038_v54, %s4660_s30 }
 0x62a   : > { %1646 = vrot.lane.b32.xlu1 %v5050_v58, %s4660_s30 }
 0x64e   : > { %1311 = vmax.xlane.f32.xlu1 %v1310_v49 }
 0x696   : > { %v1529_v50 = vpop.xlane.xlu1 %1528 }
 0x697   : > { %v1531_v51 = vsub.f32 %v1523_v43, %v1529_v50 }
 0x698   : > { %v1526_v52 = vpop.xlane.xlu0 %1525 }
 0x699   : > { %v1534_v53 = vmul.f32 1.442695, %v1531_v51  ;;  %v1530_v56 = vsub.f32 %v1522_v45, %v1526_v52 }
 0x69a   : > { %v1547_v1 = vpop.permute.xlu1 %1546 }
 0x69b   : > { %4257 = vpow2.f32 %v1534_v53  ;;  %v1532_v62 = vmul.f32 1.442695, %v1530_v56 }
 0x69d   : > { %4259 = vpow2.f32 %v1532_v62 }
 0x69e   : > { %v1651_v3 = vpop.permute.xlu1 %1650 }
 0x6a2   : > { %v1649_v4 = vpop.permute.xlu1 %1648 }
 0x6a6   : > { %v1647_v5 = vpop.permute.xlu1 %1646 }
 0x6a8   : > { %v4258_v41 = vpop.eup %4257 }
 0x6a9   : > { %v1539_v54 = vsel %vm1106_vm2, %v4258_v41, 0.0 }
 0x6aa   : > { %v4260_v0 = vpop.eup %4259  ;;  %1540 = vadd.xlane.f32.xlu0 %v1539_v54 }
 0x6ab   : > { %v1536_v58 = vsel %vm1106_vm2, %v4260_v0, 0.0 }
 0x6ae   : > { %1537 = vadd.xlane.f32.xlu0 %v1536_v58 }
 0x6c4   : > { %1548 = vrot.lane.b32.xlu0 %v5046_v57, %s4659_s18 }
 0x6c8   : > { %1644 = vrot.lane.b32.xlu0 %v5040_v55, %s4660_s30 }
 0x6d7   : > { %v1312_v6 = vpop.xlane.xlu1 %1311 }
 0x6d8   : > { %v1314_v7 = vsub.f32 %v1306_v48, %v1312_v6 }
 0x6da   : > { %v1317_v8 = vmul.f32 1.442695, %v1314_v7 }
 0x6dc   : > { %4261 = vpow2.f32 %v1317_v8 }
 0x6e7   : > { %1308 = vmax.xlane.f32.xlu0 %v1307_v11 }
 0x6e9   : > { %v5128_v12 = vpop.eup %4261 }
 0x6ea   : > { %v1322_v14 = vsel %vm1106_vm2, %v5128_v12, 0.0 }
 0x6eb   : > { %1323 = vadd.xlane.f32.xlu1 %v1322_v14 }
 0x6fc   : > { %877 = vrot.lane.b32.xlu1 %v5060_v60, %s4657_s1 }
 0x700   : > { %1331 = vrot.lane.b32.xlu1 %v5055_v59, %s4658_s20 }
 0x704   : > { %869 = vrot.lane.b32.xlu1 %v5060_v60, %s4656_s16 }
 0x708   : > { %875 = vrot.lane.b32.xlu1 %v5062_v61, %s4657_s1  ;;  %s656_s1 = scalar_lea.vmem [#allocation18], %s3590_s23 }
 0x709   : > { %s3425_s23 = sshll.u32 %s656_s1, 4  ;;  %s5430_s23 = int_to_ptr.vmem [resolvable:$true] %s3425_s23 }
 0x70a   : > { %s4561_s4 = scalar_lea.vmem %s5430_s23, 512 }
 0x70b   : > { %p4562_p11 = scmp.ne.s32.totalorder %s5430_s23, %s4561_s4 }
 0x70d   : > { %p4563_p7 = pnand %p4562_p11, %p5553_p4 }
 0x70f   : > { %p4564_p8 = pneg %p4563_p7 }
 0x733   : > { %v1541_v55 = vpop.xlane.xlu0 %1540 }
 0x734   : > { %4263 = vrcp.f32 %v1541_v55  ;;  %v736_v55 = vld [vmem:[#allocation14 + $0x10] sm:$0xff] }
 0x737   : > { %v1538_v13 = vpop.xlane.xlu0 %1537 }
 0x738   : > { %4265 = vrcp.f32 %v1538_v13 }
 0x73b   : > { %v1549_v15 = vpop.permute.xlu0 %1548 }
 0x73c   : > { %3987 = vmatprep.subr.mxu0 %v1549_v15 }
 0x73d   : > { %3988 = vmatpush3.msra.mxu0 %v1549_v15 }
 0x73e   : > { %3989 = vmatprep.subr.mxu0 %v1547_v1 }
 0x73f   : > { %3990 = vmatpush3.msra.mxu0 %v1547_v1  ;;  %v1645_v21 = vpop.permute.xlu0 %1644 }
 0x740   : > { %3994 = vmatprep.subr.msk.mxu0 %vm1014_vm1, %v1651_v3 }
 0x741   : > { %v4264_v16 = vpop.eup %4263 }
 0x742   : > { %v1545_v19 = vmul.f32 %v4264_v16, %v4258_v41  ;;  %v744_v16 = vmul.f32 %v736_v55, %v736_v55 }
 0x745   : > { %v4266_v17 = vpop.eup %4265 }
 0x746   : > { %v1544_v18 = vmul.f32 %v4266_v17, %v4260_v0 }
 0x748   : > { %3991 = vmatprep.mubr.msk.f32.mxu0 %vm1106_vm2, %v1544_v18 }
 0x749   : > { %3992 = vmatmul.mubr.msk.f32.vlgmr.msra.gmra.mxu0 %vm1106_vm2, %v1545_v19 }
 0x74a   : > { %3995 = vmatpush3.xpose.msk.msra.mxu0 %vm1014_vm1, %v1651_v3  ;;  %3998 = vmatprep.mubr.msk.f32.mxu0 %vm1014_vm1, %v1645_v21 }
 0x74b   : > { %3996 = vmatprep.subr.msk.mxu0 %vm1014_vm1, %v1649_v4 }
 0x74e   : > { %3997 = vmatpush3.xpose.msk.msra.mxu0 %vm1014_vm1, %v1649_v4 }
 0x74f   : > { %4015 = vmatprep.subr.mxu0 %v5146_v22 }
 0x751   : > { %3999 = vmatmul.mubr.msk.f32.vlgmr.msra.gmra.mxu0 %vm1014_vm1, %v1647_v5  ;;  %v737_v5 = vld [vmem:[#allocation14 + $0x18] sm:$0xff] }
 0x752   : > { %4016 = vmatpush3.msra.mxu0 %v5146_v22 }
 0x753   : > { %4017 = vmatprep.subr.mxu0 %v5151_v23 }
 0x754   : > { %4018 = vmatpush3.msra.mxu0 %v5151_v23 }
 0x770   : > { %v1309_v24 = vpop.xlane.xlu0 %1308 }
 0x771   : > { %v1313_v25 = vsub.f32 %v1305_v10, %v1309_v24  ;;  %v890_v10 = vmul.f32 %v5060_v60, %v733_v9 }
 0x773   : > { %v1315_v28 = vmul.f32 1.442695, %v1313_v25 }
 0x774   : > { %v1324_v43 = vpop.xlane.xlu1 %1323 }
 0x775   : > { %4267 = vpow2.f32 %v1315_v28  ;;  %v753_v28 = vmul.f32 2.0, %v733_v9 }
 0x778   : > { %v878_v48 = vpop.permute.xlu1 %877 }
 0x779   : > { %v882_v3 = vsub.f32 0.0, %v878_v48 }
 0x77c   : > { %v1332_v51 = vpop.permute.xlu1 %1331 }
 0x780   : > { %v870_v1 = vpop.permute.xlu1 %869 }
 0x781   : > { %v886_v4 = vsel %vm5024_vm0, %v870_v1, %v882_v3 }
 0x782   : > { %v4268_v38 = vpop.eup %4267  ;;  %v894_v8 = vmul.f32 %v886_v4, %v737_v5 }
 0x783   : > { %v1319_v39 = vsel %vm1106_vm2, %v4268_v38, 0.0 }
 0x784   : > { %v876_v6 = vpop.permute.xlu1 %875  ;;  %v5181_v14 = vadd.f32 %v894_v8, %v890_v10 }
 0x785   : > { %v881_v18 = vsub.f32 0.0, %v876_v6 }
 0x809   : > { %v5156_v27 = vpop.f32.mrf.mxu0 }
 0x80b   : > { %v5158_v29 = vpop.f32.mrf.mxu0 }
 0x811   : > { %v4000_v30 = vpop.f32.mrf.mxu0 }
 0x812   : > { %v1736_v32 = vmul.f32 0.088388346, %v4000_v30 }
 0x813   : > { %v1726_v31 = vpop.f32.mrf.mxu0 }
 0x814   : > { %v1735_v33 = vmul.f32 0.088388346, %v1726_v31  ;;  %v1738_v36 = vadd.f32 %v1736_v32, %v5064_v63  ;;  %v741_v32 = vmul.f32 %v733_v9, %v733_v9 }
 0x816   : > { %v1737_v34 = vadd.f32 %v1735_v33, %v5066_v2  ;;  %v1742_v37 = vsel %vm1106_vm2, %v1738_v36, -inf  ;;  %v745_v33 = vmul.f32 %v737_v5, %v737_v5 }
 0x818   : > { %v1739_v35 = vsel %vm1106_vm2, %v1737_v34, -inf  ;;  %v749_v26 = vsub.f32 %v741_v32, %v745_v33 }
 0x819   : > { %1740 = vmax.xlane.f32.xlu0 %v1739_v35 }
 0x81d   : > { %1743 = vmax.xlane.f32.xlu0 %v1742_v37 }
 0x821   : > { %1320 = vadd.xlane.f32.xlu0 %v1319_v39 }
 0x837   : > { %1333 = vrot.lane.b32.xlu0 %v5046_v57, %s4658_s20 }
 0x83b   : > { %1763 = vrot.lane.b32.xlu0 %v5046_v57, %s4660_s30 }
 0x8a2   : > { %v1741_v40 = vpop.xlane.xlu0 %1740 }
 0x8a3   : > { %v1745_v42 = vsub.f32 %v1737_v34, %v1741_v40 }
 0x8a5   : > { %v1747_v44 = vmul.f32 1.442695, %v1745_v42 }
 0x8a6   : > { %v1744_v45 = vpop.xlane.xlu0 %1743 }
 0x8a7   : > { %4269 = vpow2.f32 %v1747_v44  ;;  %v1746_v46 = vsub.f32 %v1738_v36, %v1744_v45 }
 0x8a8   : > { %4271 = vrcp.f32 %v1324_v43 }
 0x8a9   : > { %v1749_v47 = vmul.f32 1.442695, %v1746_v46 }
 0x8aa   : > { %v1321_v49 = vpop.xlane.xlu0 %1320 }
 0x8ab   : > { %4273 = vpow2.f32 %v1749_v47 }
 0x8ac   : > { %4275 = vrcp.f32 %v1321_v49 }
 0x8ae   : > { %v1334_v50 = vpop.permute.xlu0 %1333 }
 0x8af   : > { %3973 = vmatprep.subr.mxu1 %v1334_v50 }
 0x8b0   : > { %3974 = vmatpush3.msra.mxu1 %v1334_v50 }
 0x8b1   : > { %3975 = vmatprep.subr.mxu1 %v1332_v51 }
 0x8b2   : > { %3976 = vmatpush3.msra.mxu1 %v1332_v51  ;;  %v1764_v57 = vpop.permute.xlu0 %1763 }
 0x8b3   : > { %4001 = vmatprep.subr.mxu1 %v1764_v57 }
 0x8b4   : > { %v4270_v52 = vpop.eup %4269 }
 0x8b5   : > { %v1751_v53 = vsel %vm1106_vm2, %v4270_v52, 0.0  ;;  %v4272_v56 = vpop.eup %4271 }
 0x8b6   : > { %1752 = vadd.xlane.f32.xlu0 %v1751_v53  ;;  %v1328_v58 = vmul.f32 %v4272_v56, %v5128_v12 }
 0x8b8   : > { %v4274_v62 = vpop.eup %4273 }
 0x8b9   : > { %v4276_v41 = vpop.eup %4275  ;;  %v1754_v54 = vsel %vm1106_vm2, %v4274_v62, 0.0 }
 0x8ba   : > { %1755 = vadd.xlane.f32.xlu1 %v1754_v54  ;;  %v1327_v0 = vmul.f32 %v4276_v41, %v4268_v38  ;;  %v757_v38 = vmul.f32 %v753_v28, %v737_v5 }
 0x8bc   : > { %3977 = vmatprep.mubr.msk.f32.mxu1 %vm1106_vm2, %v1327_v0  ;;  %v906_v43 = vmul.f32 %v886_v4, %v757_v38 }
 0x8bd   : > { %3978 = vmatmul.mubr.msk.f32.vlgmr.msra.gmra.mxu1 %vm1106_vm2, %v1328_v58 }
 0x8be   : > { %4002 = vmatpush3.msra.mxu1 %v1764_v57 }
 0x8cb   : > { %867 = vrot.lane.b32.xlu1 %v5062_v61, %s4656_s16  ;;  %s5551_s16 = sld [smem:[#allocation36_spill]] }
 0x8cc   : > { %1761 = vrot.lane.b32.xlu0 %v5055_v59, %s4660_s30  ;;  %v732_v59 = vld [vmem:[#allocation12 + $0x10] sm:$0xff] }
 0x8cd   : > { %v752_v13 = vmul.f32 2.0, %v732_v59  ;;  %v740_v15 = vmul.f32 %v732_v59, %v732_v59  ;;  %v889_v37 = vmul.f32 %v5062_v61, %v732_v59 }
 0x8cf   : > { %v756_v19 = vmul.f32 %v752_v13, %v736_v55  ;;  %v748_v25 = vsub.f32 %v740_v15, %v744_v16 }
 0x8d1   : > { %v901_v36 = vmul.f32 %v5062_v61, %v748_v25  ;;  %v902_v61 = vmul.f32 %v5060_v60, %v749_v26 }
 0x8d3   : > { %v5204_v44 = vadd.f32 %v906_v43, %v902_v61 }
 0x93f   : > { %v1753_v7 = vpop.xlane.xlu0 %1752 }
 0x940   : > { %4277 = vrcp.f32 %v1753_v7 }
 0x943   : > { %v1756_v11 = vpop.xlane.xlu1 %1755  ;;  %v1762_v12 = vpop.permute.xlu0 %1761 }
 0x944   : > { %4279 = vrcp.f32 %v1756_v11  ;;  %4003 = vmatprep.subr.mxu1 %v1762_v12 }
 0x945   : > { %4004 = vmatpush3.msra.mxu1 %v1762_v12 }
 0x946   : > { %4008 = vmatprep.subr.msk.mxu1 %vm1014_vm1, %v5181_v14 }
 0x947   : > { %v868_v17 = vpop.permute.xlu1 %867 }
 0x948   : > { %v885_v21 = vsel %vm5024_vm0, %v868_v17, %v881_v18 }
 0x949   : > { %v905_v31 = vmul.f32 %v885_v21, %v756_v19  ;;  %v893_v34 = vmul.f32 %v885_v21, %v736_v55 }
 0x94b   : > { %v5190_v40 = vadd.f32 %v905_v31, %v901_v36  ;;  %v5192_v42 = vadd.f32 %v893_v34, %v889_v37 }
 0x94d   : > { %v4278_v24 = vpop.eup %4277 }
 0x94e   : > { %v1759_v30 = vmul.f32 %v4278_v24, %v4270_v52 }
 0x950   : > { %4005 = vmatprep.mubr.msk.f32.mxu1 %vm1106_vm2, %v1759_v30 }
 0x951   : > { %v4280_v35 = vpop.eup %4279 }
 0x952   : > { %v1760_v39 = vmul.f32 %v4280_v35, %v4274_v62 }
 0x954   : > { %4006 = vmatmul.mubr.msk.f32.vlgmr.msra.gmra.mxu1 %vm1106_vm2, %v1760_v39 }
 0x955   : > { %4009 = vmatpush3.xpose.msk.msra.mxu1 %vm1014_vm1, %v5181_v14  ;;  %4012 = vmatprep.mubr.msk.f32.mxu1 %vm1014_vm1, %v5190_v40 }
 0x956   : > { %4010 = vmatprep.subr.msk.mxu1 %vm1014_vm1, %v5192_v42 }
 0x959   : > { %4011 = vmatpush3.xpose.msk.msra.mxu1 %vm1014_vm1, %v5192_v42 }
 0x95c   : > { %4013 = vmatmul.mubr.msk.f32.vlgmr.msra.gmra.mxu1 %vm1014_vm1, %v5204_v44 }
 0x97d   : > { %v5208_v45 = vpop.f32.mrf.mxu1 }
 0x97f   : > { %v5210_v46 = vpop.f32.mrf.mxu1 }
 0xa14   : > { %v5212_v47 = vpop.f32.mrf.mxu1 }
 0xa16   : > { %v5214_v48 = vpop.f32.mrf.mxu1 }
 0xa1c   : > { %v4014_v49 = vpop.f32.mrf.mxu1 }
 0xa1d   : > { %v1947_v50 = vmul.f32 0.088388346, %v4014_v49 }
 0xa1e   : > { %v1937_v51 = vpop.f32.mrf.mxu1 }
 0xa1f   : > { %v1946_v60 = vmul.f32 0.088388346, %v1937_v51  ;;  %v1949_v57 = vadd.f32 %v1947_v50, %v5064_v63 }
 0xa21   : > { %v1953_v52 = vsel %vm1106_vm2, %v1949_v57, -inf  ;;  %v1948_v53 = vadd.f32 %v1946_v60, %v5066_v2 }
 0xa22   : > { %1954 = vmax.xlane.f32.xlu1 %v1953_v52 }
 0xa23   : > { %v1950_v56 = vsel %vm1106_vm2, %v1948_v53, -inf }
 0xa24   : > { %1951 = vmax.xlane.f32.xlu0 %v1950_v56 }
 0xa33   : > { %2059 = vrot.lane.b32.xlu1 %v5192_v42, %s4658_s20 }
 0xa37   : > { %2055 = vrot.lane.b32.xlu1 %v5190_v40, %s4658_s20 }
 0xa3b   : > { %2057 = vrot.lane.b32.xlu1 %v5204_v44, %s4658_s20 }
 0xaab   : > { %v1955_v62 = vpop.xlane.xlu1 %1954 }
 0xaac   : > { %v1957_v41 = vsub.f32 %v1949_v57, %v1955_v62 }
 0xaad   : > { %v1952_v54 = vpop.xlane.xlu0 %1951 }
 0xaae   : > { %v1960_v0 = vmul.f32 1.442695, %v1957_v41  ;;  %v1956_v58 = vsub.f32 %v1948_v53, %v1952_v54 }
 0xaaf   : > { %v2060_v10 = vpop.permute.xlu1 %2059 }
 0xab0   : > { %4281 = vpow2.f32 %v1960_v0  ;;  %v1958_v1 = vmul.f32 1.442695, %v1956_v58 }
 0xab2   : > { %4283 = vpow2.f32 %v1958_v1 }
 0xab3   : > { %v2056_v13 = vpop.permute.xlu1 %2055 }
 0xab7   : > { %v2058_v15 = vpop.permute.xlu1 %2057 }
 0xabd   : > { %v4282_v3 = vpop.eup %4281 }
 0xabe   : > { %v1965_v4 = vsel %vm1106_vm2, %v4282_v3, 0.0 }
 0xabf   : > { %v4284_v5 = vpop.eup %4283  ;;  %1966 = vadd.xlane.f32.xlu0 %v1965_v4 }
 0xac0   : > { %v1962_v6 = vsel %vm1106_vm2, %v4284_v5, 0.0 }
 0xac3   : > { %1963 = vadd.xlane.f32.xlu0 %v1962_v6 }
 0xad9   : > { %2061 = vrot.lane.b32.xlu0 %v5181_v14, %s4658_s20 }
 0xb48   : > { %v1967_v7 = vpop.xlane.xlu0 %1966 }
 0xb49   : > { %4285 = vrcp.f32 %v1967_v7 }
 0xb4c   : > { %v1964_v8 = vpop.xlane.xlu0 %1963 }
 0xb4d   : > { %4287 = vrcp.f32 %v1964_v8 }
 0xb50   : > { %v2062_v9 = vpop.permute.xlu0 %2061 }
 0xb51   : > { %4022 = vmatprep.subr.msk.mxu0 %vm1014_vm1, %v2062_v9 }
 0xb56   : > { %v4286_v11 = vpop.eup %4285 }
 0xb57   : > { %v1971_v55 = vmul.f32 %v4286_v11, %v4282_v3 }
 0xb5a   : > { %v4288_v12 = vpop.eup %4287 }
 0xb5b   : > { %v1970_v59 = vmul.f32 %v4288_v12, %v4284_v5 }
 0xb5d   : > { %4019 = vmatprep.mubr.msk.f32.mxu0 %vm1106_vm2, %v1970_v59 }
 0xb5e   : > { %4020 = vmatmul.mubr.msk.f32.vlgmr.msra.gmra.mxu0 %vm1106_vm2, %v1971_v55 }
 0xb5f   : > { %4023 = vmatpush3.xpose.msk.msra.mxu0 %vm1014_vm1, %v2062_v9  ;;  %4026 = vmatprep.mubr.msk.f32.mxu0 %vm1014_vm1, %v2056_v13 }
 0xb60   : > { %4024 = vmatprep.subr.msk.mxu0 %vm1014_vm1, %v2060_v10 }
 0xb63   : > { %4025 = vmatpush3.xpose.msk.msra.mxu0 %vm1014_vm1, %v2060_v10 }
 0xb66   : > { %4027 = vmatmul.mubr.msk.f32.vlgmr.msra.gmra.mxu0 %vm1014_vm1, %v2058_v15 }
 0xc1e   : > { %v4021_v16 = vpop.f32.mrf.mxu0 }
 0xc1f   : > { %2054 = vst.msk [vmem:[#allocation2 + $0x18] sm:$0xff] %vm1014_vm1, %v4021_v16 }
 0xc20   : > { %v2044_v17 = vpop.f32.mrf.mxu0 }
 0xc21   : > { %2053 = vst.msk [vmem:[#allocation2 + $0x10] sm:$0xff] %vm1014_vm1, %v2044_v17 }
 0xc26   : > { %v4028_v18 = vpop.f32.mrf.mxu0 }
 0xc27   : > { %v2147_v19 = vmul.f32 0.088388346, %v4028_v18 }
 0xc28   : > { %v2137_v21 = vpop.f32.mrf.mxu0 }
 0xc29   : > { %v2146_v24 = vmul.f32 0.088388346, %v2137_v21  ;;  %v2149_v25 = vadd.f32 %v2147_v19, %v5064_v63 }
 0xc2b   : > { %v2153_v28 = vsel %vm1106_vm2, %v2149_v25, -inf  ;;  %v2148_v30 = vadd.f32 %v2146_v24, %v5066_v2 }
 0xc2c   : > { %2154 = vmax.xlane.f32.xlu1 %v2153_v28 }
 0xc2d   : > { %v2150_v31 = vsel %vm1106_vm2, %v2148_v30, -inf }
 0xc2e   : > { %2151 = vmax.xlane.f32.xlu0 %v2150_v31 }
 0xc3d   : > { %2174 = vrot.lane.b32.xlu1 %v5151_v23, %s4658_s20 }
 0xc41   : > { %2277 = vrot.lane.b32.xlu1 %v5181_v14, %s4659_s18 }
 0xc45   : > { %2275 = vrot.lane.b32.xlu1 %v5192_v42, %s4659_s18 }
 0xc49   : > { %2273 = vrot.lane.b32.xlu1 %v5204_v44, %s4659_s18 }
 0xcb5   : > { %v2155_v32 = vpop.xlane.xlu1 %2154 }
 0xcb6   : > { %v2157_v33 = vsub.f32 %v2149_v25, %v2155_v32 }
 0xcb7   : > { %v2152_v34 = vpop.xlane.xlu0 %2151 }
 0xcb8   : > { %v2160_v35 = vmul.f32 1.442695, %v2157_v33  ;;  %v2156_v36 = vsub.f32 %v2148_v30, %v2152_v34 }
 0xcb9   : > { %v2175_v50 = vpop.permute.xlu1 %2174 }
 0xcba   : > { %4289 = vpow2.f32 %v2160_v35  ;;  %v2158_v37 = vmul.f32 1.442695, %v2156_v36 }
 0xcbc   : > { %4291 = vpow2.f32 %v2158_v37 }
 0xcbd   : > { %v2278_v60 = vpop.permute.xlu1 %2277 }
 0xcc1   : > { %v2276_v41 = vpop.permute.xlu1 %2275 }
 0xcc5   : > { %v2274_v54 = vpop.permute.xlu1 %2273 }
 0xcc7   : > { %v4290_v38 = vpop.eup %4289 }
 0xcc8   : > { %v2165_v39 = vsel %vm1106_vm2, %v4290_v38, 0.0 }
 0xcc9   : > { %v4292_v26 = vpop.eup %4291  ;;  %2166 = vadd.xlane.f32.xlu0 %v2165_v39 }
 0xcca   : > { %v2162_v43 = vsel %vm1106_vm2, %v4292_v26, 0.0 }
 0xccd   : > { %2163 = vadd.xlane.f32.xlu0 %v2162_v43 }
 0xce3   : > { %2176 = vrot.lane.b32.xlu0 %v5146_v22, %s4658_s20 }
 0xce7   : > { %2271 = vrot.lane.b32.xlu0 %v5190_v40, %s4659_s18 }
 0xd52   : > { %v2167_v61 = vpop.xlane.xlu0 %2166 }
 0xd53   : > { %4293 = vrcp.f32 %v2167_v61 }
 0xd56   : > { %v2164_v49 = vpop.xlane.xlu0 %2163 }
 0xd57   : > { %4295 = vrcp.f32 %v2164_v49 }
 0xd5a   : > { %v2177_v51 = vpop.permute.xlu0 %2176 }
 0xd5b   : > { %4029 = vmatprep.subr.mxu1 %v2177_v51 }
 0xd5c   : > { %4030 = vmatpush3.msra.mxu1 %v2177_v51 }
 0xd5d   : > { %4031 = vmatprep.subr.mxu1 %v2175_v50 }
 0xd5e   : > { %4032 = vmatpush3.msra.mxu1 %v2175_v50  ;;  %v2272_v62 = vpop.permute.xlu0 %2271 }
 0xd5f   : > { %4036 = vmatprep.subr.msk.mxu1 %vm1014_vm1, %v2278_v60 }
 0xd60   : > { %v4294_v57 = vpop.eup %4293 }
 0xd61   : > { %v2171_v56 = vmul.f32 %v4294_v57, %v4290_v38 }
 0xd64   : > { %v4296_v52 = vpop.eup %4295 }
 0xd65   : > { %v2170_v53 = vmul.f32 %v4296_v52, %v4292_v26 }
 0xd67   : > { %4033 = vmatprep.mubr.msk.f32.mxu1 %vm1106_vm2, %v2170_v53 }
 0xd68   : > { %4034 = vmatmul.mubr.msk.f32.vlgmr.msra.gmra.mxu1 %vm1106_vm2, %v2171_v56 }
 0xd69   : > { %4037 = vmatpush3.xpose.msk.msra.mxu1 %vm1014_vm1, %v2278_v60  ;;  %4040 = vmatprep.mubr.msk.f32.mxu1 %vm1014_vm1, %v2272_v62 }
 0xd6a   : > { %4038 = vmatprep.subr.msk.mxu1 %vm1014_vm1, %v2276_v41 }
 0xd6d   : > { %4039 = vmatpush3.xpose.msk.msra.mxu1 %vm1014_vm1, %v2276_v41 }
 0xd70   : > { %4041 = vmatmul.mubr.msk.f32.vlgmr.msra.gmra.mxu1 %vm1014_vm1, %v2274_v54 }
 0xe28   : > { %v5266_v0 = vpop.f32.mrf.mxu1 }
 0xe2a   : > { %v5268_v58 = vpop.f32.mrf.mxu1 }
 0xe30   : > { %v4042_v1 = vpop.f32.mrf.mxu1 }
 0xe31   : > { %v2363_v3 = vmul.f32 0.088388346, %v4042_v1 }
 0xe32   : > { %v2353_v4 = vpop.f32.mrf.mxu1 }
 0xe33   : > { %v2362_v5 = vmul.f32 0.088388346, %v2353_v4  ;;  %v2365_v6 = vadd.f32 %v2363_v3, %v5064_v63  ;;  %v2718_v3 = vld [vmem:[#allocation11 + $0x78] sm:$0xff] }
 0xe35   : > { %v2369_v7 = vsel %vm1106_vm2, %v2365_v6, -inf  ;;  %v2364_v8 = vadd.f32 %v2362_v5, %v5066_v2 }
 0xe36   : > { %2370 = vmax.xlane.f32.xlu1 %v2369_v7  ;;  %v2717_v7 = vld [vmem:[#allocation11 + $0x70] sm:$0xff] }
 0xe37   : > { %v2366_v9 = vsel %vm1106_vm2, %v2364_v8, -inf }
 0xe38   : > { %2367 = vmax.xlane.f32.xlu0 %v2366_v9 }
 0xe47   : > { %2388 = vrot.lane.b32.xlu1 %v5151_v23, %s4659_s18 }
 0xe4b   : > { %2491 = vrot.lane.b32.xlu1 %v5181_v14, %s4660_s30 }
 0xe4f   : > { %2489 = vrot.lane.b32.xlu1 %v5192_v42, %s4660_s30 }
 0xe53   : > { %2487 = vrot.lane.b32.xlu1 %v5204_v44, %s4660_s30 }
 0xebf   : > { %v2371_v10 = vpop.xlane.xlu1 %2370 }
 0xec0   : > { %v2373_v11 = vsub.f32 %v2365_v6, %v2371_v10 }
 0xec1   : > { %v2368_v12 = vpop.xlane.xlu0 %2367 }
 0xec2   : > { %v2376_v59 = vmul.f32 1.442695, %v2373_v11  ;;  %v2372_v55 = vsub.f32 %v2364_v8, %v2368_v12  ;;  %v2716_v8 = vld [vmem:[#allocation11 + $0x68] sm:$0xff]  ;;  %v2715_v11 = vld [vmem:[#allocation11 + $0x60] sm:$0xff]  ;;  %v2714_v12 = vld [vmem:[#allocation11 + $0x58] sm:$0xff] }
 0xec3   : > { %v2389_v18 = vpop.permute.xlu1 %2388 }
 0xec4   : > { %4297 = vpow2.f32 %v2376_v59  ;;  %v2374_v13 = vmul.f32 1.442695, %v2372_v55  ;;  %v2713_v59 = vld [vmem:[#allocation11 + $0x50] sm:$0xff]  ;;  %v2712_v55 = vld [vmem:[#allocation11 + $0x48] sm:$0xff] }
 0xec6   : > { %4299 = vpow2.f32 %v2374_v13  ;;  %v2711_v13 = vld [vmem:[#allocation11 + $0x40] sm:$0xff] }
 0xec7   : > { %v2492_v21 = vpop.permute.xlu1 %2491 }
 0xecb   : > { %v2490_v31 = vpop.permute.xlu1 %2489 }
 0xecf   : > { %v2488_v32 = vpop.permute.xlu1 %2487 }
 0xed1   : > { %v4298_v15 = vpop.eup %4297 }
 0xed2   : > { %v2381_v16 = vsel %vm1106_vm2, %v4298_v15, 0.0 }
 0xed3   : > { %v4300_v17 = vpop.eup %4299  ;;  %2382 = vadd.xlane.f32.xlu0 %v2381_v16  ;;  %v2709_v16 = vld [vmem:[#allocation11 + $0x30] sm:$0xff] }
 0xed4   : > { %v2378_v14 = vsel %vm1106_vm2, %v4300_v17, 0.0 }
 0xed7   : > { %2379 = vadd.xlane.f32.xlu0 %v2378_v14  ;;  %v2707_v14 = vld [vmem:[#allocation11 + $0x20] sm:$0xff] }
 0xeed   : > { %2390 = vrot.lane.b32.xlu0 %v5146_v22, %s4659_s18 }
 0xef1   : > { %2485 = vrot.lane.b32.xlu0 %v5190_v40, %s4660_s30 }
 0xf5c   : > { %v2383_v42 = vpop.xlane.xlu0 %2382 }
 0xf5d   : > { %4301 = vrcp.f32 %v2383_v42  ;;  %v2706_v42 = vld [vmem:[#allocation11 + $0x18] sm:$0xff] }
 0xf60   : > { %v2380_v44 = vpop.xlane.xlu0 %2379 }
 0xf61   : > { %4303 = vrcp.f32 %v2380_v44  ;;  %v2705_v44 = vld [vmem:[#allocation11 + $0x10] sm:$0xff] }
 0xf64   : > { %v2391_v19 = vpop.permute.xlu0 %2390 }
 0xf65   : > { %4043 = vmatprep.subr.mxu0 %v2391_v19 }
 0xf66   : > { %4044 = vmatpush3.msra.mxu0 %v2391_v19  ;;  %v2703_v19 = vld [vmem:[#allocation11] sm:$0xff] }
 0xf67   : > { %4045 = vmatprep.subr.mxu0 %v2389_v18 }
 0xf68   : > { %4046 = vmatpush3.msra.mxu0 %v2389_v18  ;;  %v2486_v40 = vpop.permute.xlu0 %2485  ;;  %v2704_v18 = vld [vmem:[#allocation11 + $0x8] sm:$0xff] }
 0xf69   : > { %4050 = vmatprep.subr.msk.mxu0 %vm1014_vm1, %v2492_v21 }
 0xf6a   : > { %v4302_v24 = vpop.eup %4301 }
 0xf6b   : > { %v2387_v30 = vmul.f32 %v4302_v24, %v4298_v15  ;;  %v2710_v15 = vld [vmem:[#allocation11 + $0x38] sm:$0xff] }
 0xf6e   : > { %v4304_v25 = vpop.eup %4303 }
 0xf6f   : > { %v2386_v28 = vmul.f32 %v4304_v25, %v4300_v17  ;;  %v2708_v17 = vld [vmem:[#allocation11 + $0x28] sm:$0xff] }
 0xf71   : > { %4047 = vmatprep.mubr.msk.f32.mxu0 %vm1106_vm2, %v2386_v28  ;;  %v3650_v28 = vld [vmem:[%s5486_s7] ss:$0 sm:$0xff] }
 0xf72   : > { %4048 = vmatmul.mubr.msk.f32.vlgmr.msra.gmra.mxu0 %vm1106_vm2, %v2387_v30 }
 0xf73   : > { %4051 = vmatpush3.xpose.msk.msra.mxu0 %vm1014_vm1, %v2492_v21  ;;  %4054 = vmatprep.mubr.msk.f32.mxu0 %vm1014_vm1, %v2486_v40 }
 0xf74   : > { %4052 = vmatprep.subr.msk.mxu0 %vm1014_vm1, %v2490_v31 }
 0xf77   : > { %4053 = vmatpush3.xpose.msk.msra.mxu0 %vm1014_vm1, %v2490_v31 }
 0xf7a   : > { %4055 = vmatmul.mubr.msk.f32.vlgmr.msra.gmra.mxu0 %vm1014_vm1, %v2488_v32  ;;  %v4321_v32 = vld [vmem:[%s4969_s12 + $0x8] sm:$0xff] }
0x1032   : > { %v4049_v33 = vpop.f32.mrf.mxu0 }
0x1034   : > { %v2466_v34 = vpop.f32.mrf.mxu0 }
0x103a   : > { %v4056_v35 = vpop.f32.mrf.mxu0 }
0x103b   : > { %v2577_v36 = vmul.f32 0.088388346, %v4056_v35  ;;  %v4322_v35 = vld [vmem:[%s4969_s12] sm:$0xff] }
0x103c   : > { %v2567_v37 = vpop.f32.mrf.mxu0 }
0x103d   : > { %v2576_v38 = vmul.f32 0.088388346, %v2567_v37  ;;  %v2579_v39 = vadd.f32 %v2577_v36, %v5064_v63 }
0x103f   : > { %v2583_v26 = vsel %vm1106_vm2, %v2579_v39, -inf  ;;  %v2578_v43 = vadd.f32 %v2576_v38, %v5066_v2 }
0x1040   : > { %2584 = vmax.xlane.f32.xlu1 %v2583_v26 }
0x1041   : > { %v2580_v61 = vsel %vm1106_vm2, %v2578_v43, -inf }
0x1042   : > { %2581 = vmax.xlane.f32.xlu0 %v2580_v61 }
0x1051   : > { %2602 = vrot.lane.b32.xlu1 %v5151_v23, %s4660_s30 }
0x1055   : > { %1420 = vrot.lane.b32.xlu1 %v5210_v46, %s4660_s30 }
0x1059   : > { %1422 = vrot.lane.b32.xlu1 %v5208_v45, %s4660_s30 }
0x105d   : > { %1637 = vrot.lane.b32.xlu1 %v5156_v27, %s4659_s18 }
0x1061   : > { %1852 = vrot.lane.b32.xlu1 %v5212_v47, %s4658_s20 }
0x1065   : > { %2265 = vrot.lane.b32.xlu1 %v5266_v0, %s4660_s30 }
0x1069   : > { %2479 = vrot.lane.b32.xlu1 %v4049_v33, %s4659_s18 }
0x10c9   : > { %v2585_v63 = vpop.xlane.xlu1 %2584 }
0x10ca   : > { %v2587_v2 = vsub.f32 %v2579_v39, %v2585_v63 }
0x10cb   : > { %v2582_v23 = vpop.xlane.xlu0 %2581 }
0x10cc   : > { %v2590_v49 = vmul.f32 1.442695, %v2587_v2  ;;  %v2586_v50 = vsub.f32 %v2578_v43, %v2582_v23 }
0x10cd   : > { %v2603_v46 = vpop.permute.xlu1 %2602 }
0x10ce   : > { %4305 = vpow2.f32 %v2590_v49  ;;  %v2588_v51 = vmul.f32 1.442695, %v2586_v50 }
0x10d0   : > { %4307 = vpow2.f32 %v2588_v51 }
0x10d1   : > { %v1421_v45 = vpop.permute.xlu1 %1420 }
0x10d2   : > { %1427 = vst.msk [vmem:[#allocation2] sm:$0xff] %vm1426_vm3, %v1421_v45 }
0x10d5   : > { %v1423_v27 = vpop.permute.xlu1 %1422 }
0x10d6   : > { %1428 = vst.msk [vmem:[#allocation2 + $0x8] sm:$0xff] %vm1426_vm3, %v1423_v27  ;;  %v4323_v27 = vld [vmem:[%s4969_s12 + $0x10] sm:$0xff] }
0x10d9   : > { %v1638_v47 = vpop.permute.xlu1 %1637 }
0x10da   : > { %1643 = vst.msk [vmem:[#allocation2 + $0x8] sm:$0xff] %vm1641_vm4, %v1638_v47 }
0x10db   : > { %v4306_v60 = vpop.eup %4305 }
0x10dc   : > { %v2595_v57 = vsel %vm1106_vm2, %v4306_v60, 0.0 }
0x10dd   : > { %v4308_v52 = vpop.eup %4307  ;;  %v1853_v53 = vpop.permute.xlu1 %1852  ;;  %2596 = vadd.xlane.f32.xlu0 %v2595_v57  ;;  %v4324_v57 = vld [vmem:[%s4969_s12 + $0x18] sm:$0xff] }
0x10de   : > { %1858 = vst.msk [vmem:[#allocation2 + $0x8] sm:$0xff] %vm1856_vm5, %v1853_v53  ;;  %v2592_v56 = vsel %vm1106_vm2, %v4308_v52, 0.0 }
0x10e1   : > { %v2266_v62 = vpop.permute.xlu1 %2265  ;;  %2593 = vadd.xlane.f32.xlu0 %v2592_v56  ;;  %v2942_v56 = vld [vmem:[#allocation15 + $0x1e8] sm:$0xff] }
0x10e2   : > { %2270 = vst.msk [vmem:[#allocation2 + $0x18] sm:$0xff] %vm1426_vm3, %v2266_v62  ;;  %v2944_v62 = vld [vmem:[#allocation15 + $0x1f8] sm:$0xff]  ;;  %2967 = vmatprep.subr.mxu0 %v2942_v56  ;;  %v2887_v56 = vld [vmem:[#allocation15 + $0x30] sm:$0xff] }
0x10e5   : > { %v2480_v41 = vpop.permute.xlu1 %2479  ;;  %v2700_v21 = vld [vmem:[#allocation2 + $0x8] sm:$0xff] }
0x10e6   : > { %2484 = vst.msk [vmem:[#allocation2 + $0x18] sm:$0xff] %vm1641_vm4, %v2480_v41  ;;  %v2941_v41 = vld [vmem:[#allocation15 + $0x1e0] sm:$0xff] }
0x10e7   : > { %2968 = vmatpush1.msra.mxu0 %v2941_v41  ;;  %v2884_v41 = vld [vmem:[#allocation15 + $0x18] sm:$0xff] }
0x10f7   : > { %2604 = vrot.lane.b32.xlu0 %v5146_v22, %s4660_s30 }
0x10fb   : > { %1635 = vrot.lane.b32.xlu0 %v5158_v29, %s4659_s18 }
0x10ff   : > { %1850 = vrot.lane.b32.xlu0 %v5214_v48, %s4658_s20 }
0x1103   : > { %2263 = vrot.lane.b32.xlu0 %v5268_v58, %s4660_s30 }
0x1107   : > { %2477 = vrot.lane.b32.xlu0 %v2466_v34, %s4659_s18 }
0x1166   : > { %v2597_v54 = vpop.xlane.xlu0 %2596 }
0x1167   : > { %4309 = vrcp.f32 %v2597_v54  ;;  %v2943_v54 = vld [vmem:[#allocation15 + $0x1f0] sm:$0xff] }
0x116a   : > { %v2594_v0 = vpop.xlane.xlu0 %2593 }
0x116b   : > { %4311 = vrcp.f32 %v2594_v0  ;;  %v2938_v0 = vld [vmem:[#allocation15 + $0x1c8] sm:$0xff] }
0x116c   : > { %2969 = vmatprep.subr.mxu0 %v2938_v0  ;;  %v2883_v0 = vld [vmem:[#allocation15 + $0x10] sm:$0xff] }
0x116e   : > { %v2605_v1 = vpop.permute.xlu0 %2604 }
0x116f   : > { %4057 = vmatprep.subr.mxu1 %v2605_v1 }
0x1170   : > { %4058 = vmatpush3.msra.mxu1 %v2605_v1  ;;  %v2940_v1 = vld [vmem:[#allocation15 + $0x1d8] sm:$0xff] }
0x1171   : > { %4059 = vmatprep.subr.mxu1 %v2603_v46 }
0x1172   : > { %4060 = vmatpush3.msra.mxu1 %v2603_v46  ;;  %v1636_v22 = vpop.permute.xlu0 %1635 }
0x1173   : > { %1642 = vst.msk [vmem:[#allocation2] sm:$0xff] %vm1641_vm4, %v1636_v22  ;;  %4064 = vmatprep.subr.mxu1 %v2718_v3  ;;  %v2939_v22 = vld [vmem:[#allocation15 + $0x1d0] sm:$0xff] }
0x1174   : > { %v4310_v48 = vpop.eup %4309 }
0x1175   : > { %v2601_v6 = vmul.f32 %v4310_v48, %v4306_v60  ;;  %v2936_v48 = vld [vmem:[#allocation15 + $0x1b8] sm:$0xff] }
0x1176   : > { %v1851_v29 = vpop.permute.xlu0 %1850 }
0x1177   : > { %1857 = vst.msk [vmem:[#allocation2] sm:$0xff] %vm1856_vm5, %v1851_v29  ;;  %v2934_v29 = vld [vmem:[#allocation15 + $0x1a8] sm:$0xff] }
0x1178   : > { %v4312_v58 = vpop.eup %4311 }
0x1179   : > { %v2600_v4 = vmul.f32 %v4312_v58, %v4308_v52  ;;  %v2933_v58 = vld [vmem:[#allocation15 + $0x1a0] sm:$0xff] }
0x117a   : > { %v2264_v5 = vpop.permute.xlu0 %2263 }
0x117b   : > { %2269 = vst.msk [vmem:[#allocation2 + $0x10] sm:$0xff] %vm1426_vm3, %v2264_v5  ;;  %4061 = vmatprep.mubr.msk.f32.mxu1 %vm1106_vm2, %v2600_v4  ;;  %v2935_v4 = vld [vmem:[#allocation15 + $0x1b0] sm:$0xff]  ;;  %v2930_v5 = vld [vmem:[#allocation15 + $0x188] sm:$0xff] }
0x117c   : > { %4062 = vmatmul.mubr.msk.f32.vlgmr.msra.gmra.mxu1 %vm1106_vm2, %v2601_v6  ;;  %v2932_v6 = vld [vmem:[#allocation15 + $0x198] sm:$0xff] }
0x117d   : > { %4065 = vmatpush3.msra.mxu1 %v2718_v3  ;;  %v2937_v3 = vld [vmem:[#allocation15 + $0x1c0] sm:$0xff] }
0x117e   : > { %4066 = vmatprep.subr.mxu1 %v2717_v7  ;;  %v2478_v9 = vpop.permute.xlu0 %2477  ;;  %v2699_v10 = vld [vmem:[#allocation2] sm:$0xff]  ;;  %2970 = vmatpush1.msra.mxu0 %v2937_v3 }
0x117f   : > { %4067 = vmatpush3.msra.mxu1 %v2717_v7  ;;  %2483 = vst.msk [vmem:[#allocation2 + $0x10] sm:$0xff] %vm1641_vm4, %v2478_v9  ;;  %4096 = vmatprep.mubr.f32.mxu1 %v2699_v10  ;;  %v2929_v7 = vld [vmem:[#allocation15 + $0x180] sm:$0xff]  ;;  %v2926_v9 = vld [vmem:[#allocation15 + $0x168] sm:$0xff]  ;;  %v2928_v10 = vld [vmem:[#allocation15 + $0x178] sm:$0xff] }
0x1180   : > { %4068 = vmatprep.subr.mxu1 %v2716_v8  ;;  %2971 = vmatprep.subr.mxu0 %v2934_v29 }
0x1181   : > { %4069 = vmatpush3.msra.mxu1 %v2716_v8  ;;  %2972 = vmatpush1.msra.mxu0 %v2933_v58  ;;  %v2931_v8 = vld [vmem:[#allocation15 + $0x190] sm:$0xff] }
0x1182   : > { %4070 = vmatprep.subr.mxu1 %v2715_v11  ;;  %2973 = vmatprep.subr.mxu0 %v2930_v5 }
0x1183   : > { %4071 = vmatpush3.msra.mxu1 %v2715_v11  ;;  %2974 = vmatpush1.msra.mxu0 %v2929_v7  ;;  %v2925_v11 = vld [vmem:[#allocation15 + $0x160] sm:$0xff] }
0x1184   : > { %4072 = vmatprep.subr.mxu1 %v2714_v12  ;;  %2975 = vmatprep.subr.mxu0 %v2926_v9 }
0x1185   : > { %4073 = vmatpush3.msra.mxu1 %v2714_v12  ;;  %v2927_v12 = vld [vmem:[#allocation15 + $0x170] sm:$0xff]  ;;  %2976 = vmatpush1.msra.mxu0 %v2925_v11 }
0x1186   : > { %4074 = vmatprep.subr.mxu1 %v2713_v59 }
0x1187   : > { %4075 = vmatpush3.msra.mxu1 %v2713_v59  ;;  %v2922_v59 = vld [vmem:[#allocation15 + $0x148] sm:$0xff] }
0x1188   : > { %4076 = vmatprep.subr.mxu1 %v2712_v55  ;;  %2977 = vmatprep.subr.mxu0 %v2922_v59 }
0x1189   : > { %4077 = vmatpush3.msra.mxu1 %v2712_v55  ;;  %v2924_v55 = vld [vmem:[#allocation15 + $0x158] sm:$0xff] }
0x118a   : > { %4078 = vmatprep.subr.mxu1 %v2711_v13 }
0x118b   : > { %4079 = vmatpush3.msra.mxu1 %v2711_v13  ;;  %v2921_v13 = vld [vmem:[#allocation15 + $0x140] sm:$0xff] }
0x118c   : > { %4080 = vmatprep.subr.mxu1 %v2710_v15  ;;  %2978 = vmatpush1.msra.mxu0 %v2921_v13 }
0x118d   : > { %4081 = vmatpush3.msra.mxu1 %v2710_v15  ;;  %v2923_v15 = vld [vmem:[#allocation15 + $0x150] sm:$0xff] }
0x118e   : > { %4082 = vmatprep.subr.mxu1 %v2709_v16 }
0x118f   : > { %4083 = vmatpush3.msra.mxu1 %v2709_v16  ;;  %v2918_v16 = vld [vmem:[#allocation15 + $0x128] sm:$0xff] }
0x1190   : > { %4084 = vmatprep.subr.mxu1 %v2708_v17  ;;  %2979 = vmatprep.subr.mxu0 %v2918_v16  ;;  %v5384_v16 = vld [vmem:[%s5490_s11] ss:$0 sm:$0xff] }
0x1191   : > { %4085 = vmatpush3.msra.mxu1 %v2708_v17  ;;  %v2920_v17 = vld [vmem:[#allocation15 + $0x138] sm:$0xff] }
0x1192   : > { %4086 = vmatprep.subr.mxu1 %v2707_v14 }
0x1193   : > { %4087 = vmatpush3.msra.mxu1 %v2707_v14  ;;  %v2917_v14 = vld [vmem:[#allocation15 + $0x120] sm:$0xff] }
0x1194   : > { %4088 = vmatprep.subr.mxu1 %v2706_v42  ;;  %2980 = vmatpush1.msra.mxu0 %v2917_v14 }
0x1195   : > { %4089 = vmatpush3.msra.mxu1 %v2706_v42  ;;  %v2919_v42 = vld [vmem:[#allocation15 + $0x130] sm:$0xff] }
0x1196   : > { %4090 = vmatprep.subr.mxu1 %v2705_v44 }
0x1197   : > { %4091 = vmatpush3.msra.mxu1 %v2705_v44  ;;  %v2914_v44 = vld [vmem:[#allocation15 + $0x108] sm:$0xff] }
0x1198   : > { %4092 = vmatprep.subr.mxu1 %v2704_v18  ;;  %2981 = vmatprep.subr.mxu0 %v2914_v44  ;;  %v3176_v44 = vld [vmem:[#allocation17 + $0x78] sm:$0xff] }
0x1199   : > { %4093 = vmatpush3.msra.mxu1 %v2704_v18  ;;  %v2916_v18 = vld [vmem:[#allocation15 + $0x118] sm:$0xff] }
0x119a   : > { %4094 = vmatprep.subr.mxu1 %v2703_v19 }
0x119b   : > { %4095 = vmatpush3.msra.mxu1 %v2703_v19  ;;  %v2913_v19 = vld [vmem:[#allocation15 + $0x100] sm:$0xff] }
0x119c   : > { %4097 = vmatmul.mubr.f32.vlgmr.msra.gmra.mxu1 %v2700_v21  ;;  %3056 = vmatprep.subr.mxu1 %v2944_v62  ;;  %v2915_v21 = vld [vmem:[#allocation15 + $0x110] sm:$0xff]  ;;  %v2882_v62 = vld [vmem:[#allocation15 + $0x8] sm:$0xff] }
0x119d   : > { %3057 = vmatpush1.msra.mxu1 %v2943_v54  ;;  %2982 = vmatpush1.msra.mxu0 %v2913_v19  ;;  %v2881_v54 = vld [vmem:[#allocation15] sm:$0xff]  ;;  %v3191_v19 = vld [vmem:[#allocation17 + $0xf0] sm:$0xff] }
0x119e   : > { %3058 = vmatprep.subr.mxu1 %v2940_v1  ;;  %v4661_v1 = vmov 0.0  }
0x119f   : > { %3059 = vmatpush1.msra.mxu1 %v2939_v22  ;;  %3031 = vmatprep.mubr.f32.mxu0 %v4661_v1 }
0x11a0   : > { %3060 = vmatprep.subr.mxu1 %v2936_v48 }
0x11a1   : > { %3061 = vmatpush1.msra.mxu1 %v2935_v4 }
0x11a2   : > { %3062 = vmatprep.subr.mxu1 %v2932_v6 }
0x11a3   : > { %3063 = vmatpush1.msra.mxu1 %v2931_v8 }
0x11a4   : > { %3064 = vmatprep.subr.mxu1 %v2928_v10 }
0x11a5   : > { %3065 = vmatpush1.msra.mxu1 %v2927_v12 }
0x11a6   : > { %3066 = vmatprep.subr.mxu1 %v2924_v55 }
0x11a7   : > { %3067 = vmatpush1.msra.mxu1 %v2923_v15 }
0x11a8   : > { %3068 = vmatprep.subr.mxu1 %v2920_v17 }
0x11a9   : > { %3069 = vmatpush1.msra.mxu1 %v2919_v42  ;;  %v3224_v42 = vld [vmem:[#allocation17 + $0x1f8] sm:$0xff] }
0x11aa   : > { %3070 = vmatprep.subr.mxu1 %v2916_v18  ;;  %v3208_v18 = vld [vmem:[#allocation17 + $0x178] sm:$0xff] }
0x11ab   : > { %3071 = vmatpush1.msra.mxu1 %v2915_v21  ;;  %v3223_v21 = vld [vmem:[#allocation17 + $0x1f0] sm:$0xff] }
0x123c   : > { %v4063_v24 = vpop.f32.mrf.mxu1 }
0x123d   : > { %2693 = vrot.lane.b32.xlu1 %v4063_v24, %s4658_s20  ;;  %v2910_v24 = vld [vmem:[#allocation15 + $0xe8] sm:$0xff] }
0x123e   : > { %v2680_v25 = vpop.f32.mrf.mxu1  ;;  %2983 = vmatprep.subr.mxu0 %v2910_v24  ;;  %v3175_v24 = vld [vmem:[#allocation17 + $0x70] sm:$0xff] }
0x123f   : > { %2691 = vrot.lane.b32.xlu0 %v2680_v25, %s4658_s20  ;;  %v2912_v25 = vld [vmem:[#allocation15 + $0xf8] sm:$0xff]  ;;  %s3663_s20 = sshll.u32 %s4771_s27, 9  ;;  %s4662_s27 = smov [#allocation18]  }
0x1240   : > { %3072 = vmatprep.subr.mxu1 %v2912_v25  ;;  %v3207_v25 = vld [vmem:[#allocation17 + $0x170] sm:$0xff]  ;;  %s5435_s29 = scalar_lea.hbm %s5552_s0, %s3663_s20  ;;  %s4565_s17 = sshll.u32 %s4662_s27, 4  ;;  %s4566_s17 = int_to_ptr.vmem [resolvable:$false] %s4565_s17 }
0x1241   : > { %s4567_s12 = scalar_lea.vmem %s4566_s17, 1024  ;;  %p4568_p1 = scmp.lt.s32.totalorder %s5430_s23, %s4566_s17 }
0x1242   : > { %p4569_p3 = scmp.lt.s32.totalorder %s4567_s12, %s4561_s4 }
0x1244   : > { %p4570_p6 = por %p4569_p3, %p4568_p1 }
0x1246   : > { %p4571_p13 = pnand %p4570_p6, %p4564_p8 }
0x125c   : > { %v4098_v30 = vpop.f32.mrf.mxu1 }
0x125d   : > { %v2798_v40 = vadd.f32 %v4098_v30, %v3650_v28  ;;  %v2911_v30 = vld [vmem:[#allocation15 + $0xf0] sm:$0xff] }
0x125e   : > { %v2792_v31 = vpop.f32.mrf.mxu1  ;;  %3073 = vmatpush1.msra.mxu1 %v2911_v30  ;;  %v3222_v30 = vld [vmem:[#allocation17 + $0x1e8] sm:$0xff] }
0x125f   : > { %v2812_v33 = vadd.f32 %v4321_v32, %v2798_v40  ;;  %v2793_v34 = vadd.f32 %v3650_v28, %v2792_v31  ;;  %v2906_v40 = vld [vmem:[#allocation15 + $0xc8] sm:$0xff]  ;;  %v2908_v31 = vld [vmem:[#allocation15 + $0xd8] sm:$0xff]  ;;  %v2905_v32 = vld [vmem:[#allocation15 + $0xc0] sm:$0xff] }
0x1260   : > { %3074 = vmatprep.subr.mxu1 %v2908_v31  ;;  %v3206_v31 = vld [vmem:[#allocation17 + $0x168] sm:$0xff] }
0x1261   : > { %2817 = vadd.xlane.f32.xlu1 %v2812_v33  ;;  %v2811_v36 = vadd.f32 %v4322_v35, %v2793_v34  ;;  %v2902_v34 = vld [vmem:[#allocation15 + $0xa8] sm:$0xff]  ;;  %v2904_v35 = vld [vmem:[#allocation15 + $0xb8] sm:$0xff] }
0x1263   : > { %2815 = vadd.xlane.f32.xlu0 %v2811_v36 }
0x12af   : > { %v2694_v37 = vpop.permute.xlu1 %2693 }
0x12b0   : > { %2698 = vst.msk [vmem:[#allocation2 + $0x18] sm:$0xff] %vm1856_vm5, %v2694_v37  ;;  %v2903_v37 = vld [vmem:[#allocation15 + $0xb0] sm:$0xff] }
0x12b1   : > { %v2692_v38 = vpop.permute.xlu0 %2691 }
0x12b2   : > { %2697 = vst.msk [vmem:[#allocation2 + $0x10] sm:$0xff] %vm1856_vm5, %v2692_v38  ;;  %v2898_v38 = vld [vmem:[#allocation15 + $0x88] sm:$0xff] }
0x12b7   : > { %v2702_v26 = vld [vmem:[#allocation2 + $0x18] sm:$0xff] }
0x12b9   : > { %v2701_v39 = vld [vmem:[#allocation2 + $0x10] sm:$0xff] }
0x12ba   : > { %4099 = vmatprep.mubr.f32.mxu1 %v2701_v39  ;;  %v2900_v39 = vld [vmem:[#allocation15 + $0x98] sm:$0xff] }
0x12bb   : > { %4100 = vmatmul.mubr.f32.gmra.mxu1 %v2702_v26  ;;  %v2897_v26 = vld [vmem:[#allocation15 + $0x80] sm:$0xff] }
0x12bc   : > { %3120 = vmatprep.mubr.f32.mxu1 %v4661_v1 }
0x12ea   : > { %v2818_v43 = vpop.xlane.xlu1 %2817 }
0x12eb   : > { %v2824_v61 = vmul.f32 0.0078125, %v2818_v43  ;;  %v2899_v43 = vld [vmem:[#allocation15 + $0x90] sm:$0xff] }
0x12ec   : > { %v2816_v49 = vpop.xlane.xlu0 %2815 }
0x12ed   : > { %v5345_v63 = vsub.f32 %v2812_v33, %v2824_v61  ;;  %v2823_v51 = vmul.f32 0.0078125, %v2816_v49  ;;  %v2907_v33 = vld [vmem:[#allocation15 + $0xd0] sm:$0xff]  ;;  %v2894_v61 = vld [vmem:[#allocation15 + $0x68] sm:$0xff] }
0x12ee   : > { %3075 = vmatpush1.msra.mxu1 %v2907_v33  ;;  %v2895_v49 = vld [vmem:[#allocation15 + $0x70] sm:$0xff]  ;;  %v3221_v33 = vld [vmem:[#allocation17 + $0x1e0] sm:$0xff] }
0x12ef   : > { %v2832_v2 = vmul.f32 %v5345_v63, %v5345_v63  ;;  %v5353_v60 = vsub.f32 %v2811_v36, %v2823_v51  ;;  %v2901_v36 = vld [vmem:[#allocation15 + $0xa0] sm:$0xff]  ;;  %3076 = vmatprep.subr.mxu1 %v2904_v35 }
0x12f0   : > { %3077 = vmatpush1.msra.mxu1 %v2903_v37  ;;  %v2889_v51 = vld [vmem:[#allocation15 + $0x40] sm:$0xff]  ;;  %v3220_v37 = vld [vmem:[#allocation17 + $0x1d8] sm:$0xff] }
0x12f1   : > { %2837 = vadd.xlane.f32.xlu1 %v2832_v2  ;;  %v2831_v53 = vmul.f32 %v5353_v60, %v5353_v60  ;;  %v2896_v2 = vld [vmem:[#allocation15 + $0x78] sm:$0xff]  ;;  %3078 = vmatprep.subr.mxu1 %v2900_v39  ;;  %v3205_v35 = vld [vmem:[#allocation17 + $0x160] sm:$0xff] }
0x12f2   : > { %3079 = vmatpush1.msra.mxu1 %v2899_v43  ;;  %v3204_v39 = vld [vmem:[#allocation17 + $0x158] sm:$0xff]  ;;  %v3219_v43 = vld [vmem:[#allocation17 + $0x1d0] sm:$0xff] }
0x12f3   : > { %3080 = vmatprep.subr.mxu1 %v2896_v2  ;;  %v3203_v2 = vld [vmem:[#allocation17 + $0x150] sm:$0xff] }
0x12f4   : > { %3081 = vmatpush1.msra.mxu1 %v2895_v49  ;;  %v3218_v49 = vld [vmem:[#allocation17 + $0x1c8] sm:$0xff] }
0x137a   : > { %v2838_v3 = vpop.xlane.xlu1 %2837 }
0x137b   : > { %v4101_v23 = vpop.f32.mrf.mxu1  ;;  %v2844_v48 = vmul.f32 0.0078125, %v2838_v3  ;;  %v3167_v3 = vld [vmem:[#allocation17 + $0x30] sm:$0xff] }
0x137c   : > { %v2808_v45 = vadd.f32 %v4101_v23, %v3650_v28  ;;  %v2893_v23 = vld [vmem:[#allocation15 + $0x60] sm:$0xff] }
0x137d   : > { %v2802_v50 = vpop.f32.mrf.mxu1  ;;  %v2848_v7 = vadd.f32 1e-05, %v2844_v48  ;;  %v3214_v48 = vld [vmem:[#allocation17 + $0x1a8] sm:$0xff] }
0x137e   : > { %v2803_v46 = vadd.f32 %v3650_v28, %v2802_v50  ;;  %v5356_v52 = vadd.f32 %v4324_v57, %v2808_v45  ;;  %v2909_v28 = vld [vmem:[#allocation15 + $0xe0] sm:$0xff]  ;;  %v2890_v50 = vld [vmem:[#allocation15 + $0x48] sm:$0xff]  ;;  %v2891_v45 = vld [vmem:[#allocation15 + $0x50] sm:$0xff] }
0x137f   : > { %2984 = vmatpush1.msra.mxu0 %v2909_v28  ;;  %v2888_v57 = vld [vmem:[#allocation15 + $0x38] sm:$0xff]  ;;  %4313 = vrsqrt.f32 %v2848_v7  ;;  %v3190_v28 = vld [vmem:[#allocation17 + $0xe8] sm:$0xff]  ;;  %v3213_v7 = vld [vmem:[#allocation17 + $0x1a0] sm:$0xff] }
0x1380   : > { %v5350_v47 = vadd.f32 %v4323_v27, %v2803_v46  ;;  %2985 = vmatprep.subr.mxu0 %v2906_v40  ;;  %v2892_v46 = vld [vmem:[#allocation15 + $0x58] sm:$0xff]  ;;  %v2886_v27 = vld [vmem:[#allocation15 + $0x28] sm:$0xff] }
0x1381   : > { %2986 = vmatpush1.msra.mxu0 %v2905_v32  ;;  %3082 = vmatprep.subr.mxu1 %v2892_v46  ;;  %v3174_v40 = vld [vmem:[#allocation17 + $0x68] sm:$0xff]  ;;  %v3189_v32 = vld [vmem:[#allocation17 + $0xe0] sm:$0xff] }
0x1382   : > { %2819 = vadd.xlane.f32.xlu0 %v5350_v47  ;;  %2987 = vmatprep.subr.mxu0 %v2902_v34  ;;  %v3173_v34 = vld [vmem:[#allocation17 + $0x60] sm:$0xff]  ;;  %v3202_v46 = vld [vmem:[#allocation17 + $0x148] sm:$0xff] }
0x1383   : > { %2988 = vmatpush1.msra.mxu0 %v2901_v36  ;;  %3083 = vmatpush1.msra.mxu1 %v2891_v45  ;;  %v3188_v36 = vld [vmem:[#allocation17 + $0xd8] sm:$0xff]  ;;  %v3217_v45 = vld [vmem:[#allocation17 + $0x1c0] sm:$0xff] }
0x1384   : > { %2989 = vmatprep.subr.mxu0 %v2898_v38  ;;  %3084 = vmatprep.subr.mxu1 %v2888_v57  ;;  %v3172_v38 = vld [vmem:[#allocation17 + $0x58] sm:$0xff]  ;;  %v3201_v57 = vld [vmem:[#allocation17 + $0x140] sm:$0xff] }
0x1385   : > { %2990 = vmatpush1.msra.mxu0 %v2897_v26  ;;  %3085 = vmatpush1.msra.mxu1 %v2887_v56  ;;  %v3187_v26 = vld [vmem:[#allocation17 + $0xd0] sm:$0xff]  ;;  %v3216_v56 = vld [vmem:[#allocation17 + $0x1b8] sm:$0xff] }
0x1386   : > { %2821 = vadd.xlane.f32.xlu0 %v5356_v52  ;;  %2991 = vmatprep.subr.mxu0 %v2894_v61  ;;  %v3171_v61 = vld [vmem:[#allocation17 + $0x50] sm:$0xff] }
0x1387   : > { %2992 = vmatpush1.msra.mxu0 %v2893_v23  ;;  %3086 = vmatprep.subr.mxu1 %v2884_v41  ;;  %v3186_v23 = vld [vmem:[#allocation17 + $0xc8] sm:$0xff]  ;;  %v3200_v41 = vld [vmem:[#allocation17 + $0x138] sm:$0xff] }
0x1388   : > { %2993 = vmatprep.subr.mxu0 %v2890_v50  ;;  %3087 = vmatpush1.msra.mxu1 %v2883_v0  ;;  %v3170_v50 = vld [vmem:[#allocation17 + $0x48] sm:$0xff]  ;;  %v3215_v0 = vld [vmem:[#allocation17 + $0x1b0] sm:$0xff] }
0x1389   : > { %2994 = vmatpush1.msra.mxu0 %v2889_v51  ;;  %3832 = vmatprep.subr.mxu1 %v3224_v42  ;;  %v3185_v51 = vld [vmem:[#allocation17 + $0xc0] sm:$0xff]  ;;  %v3210_v42 = vld [vmem:[#allocation17 + $0x188] sm:$0xff] }
0x138a   : > { %2835 = vadd.xlane.f32.xlu0 %v2831_v53  ;;  %v2885_v53 = vld [vmem:[#allocation15 + $0x20] sm:$0xff]  ;;  %2995 = vmatprep.subr.mxu0 %v2886_v27 }
0x138b   : > { %2996 = vmatpush1.msra.mxu0 %v2885_v53  ;;  %v3169_v27 = vld [vmem:[#allocation17 + $0x40] sm:$0xff]  ;;  %v3184_v53 = vld [vmem:[#allocation17 + $0xb8] sm:$0xff] }
0x138c   : > { %2997 = vmatprep.subr.mxu0 %v2882_v62  ;;  %v3168_v62 = vld [vmem:[#allocation17 + $0x38] sm:$0xff] }
0x138d   : > { %2998 = vmatpush1.msra.mxu0 %v2881_v54  ;;  %v3183_v54 = vld [vmem:[#allocation17 + $0xb0] sm:$0xff] }
0x140b   : > { %v2820_v22 = vpop.xlane.xlu0 %2819 }
0x140c   : > { %v2825_v29 = vmul.f32 0.0078125, %v2820_v22  ;;  %v3199_v22 = vld [vmem:[#allocation17 + $0x130] sm:$0xff] }
0x140e   : > { %v5364_v58 = vsub.f32 %v5350_v47, %v2825_v29  ;;  %v4314_v47 = vpop.eup %4313  ;;  %v3182_v29 = vld [vmem:[#allocation17 + $0xa8] sm:$0xff] }
0x140f   : > { %v2822_v4 = vpop.xlane.xlu0 %2821  ;;  %v2856_v13 = vmul.f32 %v4314_v47, %v5345_v63  ;;  %v3164_v47 = vld [vmem:[#allocation17 + $0x18] sm:$0xff] }
0x1410   : > { %v2826_v5 = vmul.f32 0.0078125, %v2822_v4  ;;  %v2833_v6 = vmul.f32 %v5364_v58, %v5364_v58  ;;  %v3166_v4 = vld [vmem:[#allocation17 + $0x28] sm:$0xff] }
0x1412   : > { %v5369_v8 = vsub.f32 %v5356_v52, %v2826_v5  ;;  %2839 = vadd.xlane.f32.xlu0 %v2833_v6  ;;  %v5378_v52 = vld [vmem:[%s5489_s10] ss:$0 sm:$0xff]  ;;  %v3198_v5 = vld [vmem:[#allocation17 + $0x128] sm:$0xff]  ;;  %v3181_v6 = vld [vmem:[#allocation17 + $0xa0] sm:$0xff] }
0x1413   : > { %v2836_v9 = vpop.xlane.xlu0 %2835  ;;  %v2867_v14 = vmul.f32 %v5378_v52, %v2856_v13  ;;  %v3211_v13 = vld [vmem:[#allocation17 + $0x190] sm:$0xff] }
0x1414   : > { %v2843_v10 = vmul.f32 0.0078125, %v2836_v9  ;;  %v2834_v11 = vmul.f32 %v5369_v8, %v5369_v8  ;;  %v3165_v9 = vld [vmem:[#allocation17 + $0x20] sm:$0xff] }
0x1415   : > { %v5395_v63 = vadd.f32 %v5384_v16, %v2867_v14  ;;  %v3195_v14 = vld [vmem:[#allocation17 + $0x110] sm:$0xff] }
0x1416   : > { %v2847_v12 = vadd.f32 1e-05, %v2843_v10  ;;  %2841 = vadd.xlane.f32.xlu1 %v2834_v11  ;;  %v3197_v10 = vld [vmem:[#allocation17 + $0x120] sm:$0xff]  ;;  %v3180_v11 = vld [vmem:[#allocation17 + $0x98] sm:$0xff] }
0x1418   : > { %4315 = vrsqrt.f32 %v2847_v12  ;;  %v3212_v12 = vld [vmem:[#allocation17 + $0x198] sm:$0xff] }
0x1425   : > { %v4316_v59 = vpop.eup %4315 }
0x1426   : > { %v2855_v55 = vmul.f32 %v4316_v59, %v5353_v60  ;;  %v3192_v60 = vld [vmem:[#allocation17 + $0xf8] sm:$0xff] }
0x1427   : > { %3788 = vmatprep.subr.mxu0 %v3192_v60  ;;  %v3196_v59 = vld [vmem:[#allocation17 + $0x118] sm:$0xff]  ;;  %v3178_v60 = vld [vmem:[#allocation17 + $0x88] sm:$0xff] }
0x1428   : > { %v2866_v15 = vmul.f32 %v5378_v52, %v2855_v55  ;;  %v3179_v55 = vld [vmem:[#allocation17 + $0x90] sm:$0xff] }
0x142a   : > { %v5387_v17 = vadd.f32 %v5384_v16, %v2866_v15  ;;  %v3163_v15 = vld [vmem:[#allocation17 + $0x10] sm:$0xff] }
0x142c   : > { %3032 = vmatmul.mubr.f32.vlgmr.msra.gmra.mxu0 %v5387_v17  ;;  %3121 = vmatmul.mubr.f32.vlgmr.msra.gmra.mxu1 %v5387_v17 }
0x142d   : > { %3037 = vmatprep.mubr.f32.mxu0 %v4661_v1  ;;  %3126 = vmatprep.mubr.f32.mxu1 %v4661_v1 }
0x142e   : > { %3789 = vmatpush3.msra.mxu0 %v3176_v44  ;;  %3833 = vmatpush3.msra.mxu1 %v3208_v18  ;;  %v3162_v44 = vld [vmem:[#allocation17 + $0x8] sm:$0xff] }
0x142f   : > { %3790 = vmatprep.subr.mxu0 %v3191_v19  ;;  %3834 = vmatprep.subr.mxu1 %v3223_v21  ;;  %v3194_v18 = vld [vmem:[#allocation17 + $0x108] sm:$0xff]  ;;  %v3177_v19 = vld [vmem:[#allocation17 + $0x80] sm:$0xff] }
0x1430   : > { %3038 = vmatmul.mubr.f32.gmra.mxu0 %v5395_v63  ;;  %3127 = vmatmul.mubr.f32.gmra.mxu1 %v5395_v63  ;;  %v3209_v21 = vld [vmem:[#allocation17 + $0x180] sm:$0xff] }
0x1431   : > { %3043 = vmatprep.mubr.f32.mxu0 %v4661_v1  ;;  %3132 = vmatprep.mubr.f32.mxu1 %v4661_v1 }
0x1432   : > { %3791 = vmatpush3.msra.mxu0 %v3175_v24  ;;  %3835 = vmatpush3.msra.mxu1 %v3207_v25  ;;  %v3161_v24 = vld [vmem:[#allocation17] sm:$0xff] }
0x1433   : > { %3792 = vmatprep.subr.mxu0 %v3190_v28  ;;  %3836 = vmatprep.subr.mxu1 %v3222_v30  ;;  %v3193_v25 = vld [vmem:[#allocation17 + $0x100] sm:$0xff] }
0x1434   : > { %3793 = vmatpush3.msra.mxu0 %v3174_v40  ;;  %3837 = vmatpush3.msra.mxu1 %v3206_v31 }
0x1435   : > { %3794 = vmatprep.subr.mxu0 %v3189_v32  ;;  %3838 = vmatprep.subr.mxu1 %v3221_v33 }
0x1436   : > { %3795 = vmatpush3.msra.mxu0 %v3173_v34  ;;  %3839 = vmatpush3.msra.mxu1 %v3205_v35 }
0x1437   : > { %3796 = vmatprep.subr.mxu0 %v3188_v36  ;;  %3840 = vmatprep.subr.mxu1 %v3220_v37 }
0x1438   : > { %3797 = vmatpush3.msra.mxu0 %v3172_v38  ;;  %3841 = vmatpush3.msra.mxu1 %v3204_v39 }
0x1439   : > { %3798 = vmatprep.subr.mxu0 %v3187_v26  ;;  %3842 = vmatprep.subr.mxu1 %v3219_v43  ;;  %v2948_v43 = vshrl.u32 %v758_v20, 7 }
0x143a   : > { %3799 = vmatpush3.msra.mxu0 %v3171_v61  ;;  %3843 = vmatpush3.msra.mxu1 %v3203_v2  ;;  %v2945_v2 = vld [vmem:[%s5492_s13] sm:$0xf] }
0x143b   : > { %3800 = vmatprep.subr.mxu0 %v3186_v23  ;;  %3844 = vmatprep.subr.mxu1 %v3218_v49  ;;  %v2957_v61 = vsub.s32 2, %v2948_v43  ;;  %v2961_v23 = vsub.s32 3, %v2948_v43 }
0x143c   : > { %3801 = vmatpush3.msra.mxu0 %v3170_v50  ;;  %3845 = vmatpush3.msra.mxu1 %v3202_v46 }
0x143d   : > { %3802 = vmatprep.subr.mxu0 %v3185_v51  ;;  %3846 = vmatprep.subr.mxu1 %v3217_v45  ;;  %v2958_v50 = vrot.slane %v2945_v2, %v2957_v61  ;;  %v2962_v46 = vrot.slane %v2945_v2, %v2961_v23 }
0x143e   : > { %3803 = vmatpush3.msra.mxu0 %v3169_v27  ;;  %3847 = vmatpush3.msra.mxu1 %v3201_v57 }
0x143f   : > { %3804 = vmatprep.subr.mxu0 %v3184_v53  ;;  %3848 = vmatprep.subr.mxu1 %v3216_v56 }
0x1440   : > { %3805 = vmatpush3.msra.mxu0 %v3168_v62  ;;  %3849 = vmatpush3.msra.mxu1 %v3200_v41 }
0x1441   : > { %3806 = vmatprep.subr.mxu0 %v3183_v54  ;;  %3850 = vmatprep.subr.mxu1 %v3215_v0 }
0x1442   : > { %3807 = vmatpush3.msra.mxu0 %v3167_v3  ;;  %3851 = vmatpush3.msra.mxu1 %v3199_v22 }
0x1443   : > { %3808 = vmatprep.subr.mxu0 %v3182_v29  ;;  %3852 = vmatprep.subr.mxu1 %v3214_v48 }
0x1444   : > { %3809 = vmatpush3.msra.mxu0 %v3166_v4  ;;  %3853 = vmatpush3.msra.mxu1 %v3198_v5 }
0x1445   : > { %3810 = vmatprep.subr.mxu0 %v3181_v6  ;;  %3854 = vmatprep.subr.mxu1 %v3213_v7 }
0x1446   : > { %3811 = vmatpush3.msra.mxu0 %v3165_v9  ;;  %3855 = vmatpush3.msra.mxu1 %v3197_v10 }
0x1447   : > { %3812 = vmatprep.subr.mxu0 %v3180_v11  ;;  %3856 = vmatprep.subr.mxu1 %v3212_v12 }
0x1448   : > { %3813 = vmatpush3.msra.mxu0 %v3164_v47  ;;  %3857 = vmatpush3.msra.mxu1 %v3196_v59 }
0x1449   : > { %3814 = vmatprep.subr.mxu0 %v3179_v55  ;;  %3858 = vmatprep.subr.mxu1 %v3211_v13 }
0x144a   : > { %3815 = vmatpush3.msra.mxu0 %v3163_v15  ;;  %3859 = vmatpush3.msra.mxu1 %v3195_v14 }
0x144b   : > { %3816 = vmatprep.subr.mxu0 %v3178_v60  ;;  %3860 = vmatprep.subr.mxu1 %v3210_v42 }
0x144c   : > { %3817 = vmatpush3.msra.mxu0 %v3162_v44  ;;  %3861 = vmatpush3.msra.mxu1 %v3194_v18 }
0x144d   : > { %3818 = vmatprep.subr.mxu0 %v3177_v19  ;;  %3862 = vmatprep.subr.mxu1 %v3209_v21 }
0x144e   : > { %3819 = vmatpush3.msra.mxu0 %v3161_v24  ;;  %3863 = vmatpush3.msra.mxu1 %v3193_v25 }
0x149b   : > { %v2840_v28 = vpop.xlane.xlu0 %2839 }
0x149c   : > { %v2845_v30 = vmul.f32 0.0078125, %v2840_v28 }
0x149e   : > { %v2849_v40 = vadd.f32 1e-05, %v2845_v30 }
0x149f   : > { %v2842_v31 = vpop.xlane.xlu1 %2841 }
0x14a0   : > { %4317 = vrsqrt.f32 %v2849_v40  ;;  %v2846_v32 = vmul.f32 0.0078125, %v2842_v31 }
0x14a2   : > { %v2850_v33 = vadd.f32 1e-05, %v2846_v32 }
0x14a4   : > { %4319 = vrsqrt.f32 %v2850_v33 }
0x14ad   : > { %v4318_v34 = vpop.eup %4317 }
0x14ae   : > { %v2857_v35 = vmul.f32 %v4318_v34, %v5364_v58 }
0x14b0   : > { %v2868_v36 = vmul.f32 %v5378_v52, %v2857_v35 }
0x14b1   : > { %v4320_v37 = vpop.eup %4319 }
0x14b2   : > { %v5404_v38 = vadd.f32 %v5384_v16, %v2868_v36  ;;  %v2858_v39 = vmul.f32 %v4320_v37, %v5369_v8  ;;  %v2949_v8 = vsub.s32 0, %v2948_v43 }
0x14b4   : > { %3044 = vmatmul.mubr.f32.gmra.mxu0 %v5404_v38  ;;  %3133 = vmatmul.mubr.f32.gmra.mxu1 %v5404_v38  ;;  %v2869_v26 = vmul.f32 %v5378_v52, %v2858_v39  ;;  %v2953_v52 = vsub.s32 1, %v2948_v43  ;;  %v2950_v49 = vrot.slane %v2945_v2, %v2949_v8  ;;  %v3653_v43 = vld [vmem:[%s5551_s16] ss:$0 sm:$0xff] }
0x14b5   : > { %3049 = vmatprep.mubr.f32.mxu0 %v4661_v1  ;;  %3138 = vmatprep.mubr.f32.mxu1 %v4661_v1 }
0x14b6   : > { %v5413_v58 = vadd.f32 %v5384_v16, %v2869_v26  ;;  %v2954_v1 = vrot.slane %v2945_v2, %v2953_v52 }
0x14b8   : > { %3050 = vmatmul.mubr.f32.gmra.mxu0 %v5413_v58  ;;  %3139 = vmatmul.mubr.f32.gmra.mxu1 %v5413_v58 }
0x14ec   : > { %v3033_v16 = vpop.f32.mrf.mxu0  ;;  %v3122_v51 = vpop.f32.mrf.mxu1 }
0x14ed   : > { %v3034_v45 = vadd.f32 %v3033_v16, %v2950_v49  ;;  %v3123_v27 = vadd.f32 %v3122_v51, %v2958_v50 }
0x14ee   : > { %v3035_v57 = vpop.f32.mrf.mxu0  ;;  %v3124_v53 = vpop.f32.mrf.mxu1 }
0x14ef   : > { %v3036_v56 = vadd.f32 %v3035_v57, %v2954_v1  ;;  %v3125_v20 = vadd.f32 %v3124_v53, %v2962_v46  ;;  %v3145_v3 = vmax.f32 %v3034_v45, 0.0  ;;  %v3147_v22 = vmax.f32 %v3123_v27, 0.0 }
0x14f0   : > { %v3039_v62 = vpop.f32.mrf.mxu0  ;;  %v3128_v41 = vpop.f32.mrf.mxu1 }
0x14f1   : > { %v3146_v54 = vmax.f32 %v3036_v56, 0.0  ;;  %v3148_v0 = vmax.f32 %v3125_v20, 0.0  ;;  %v3040_v29 = vadd.f32 %v3039_v62, %v2950_v49  ;;  %v3129_v48 = vadd.f32 %v3128_v41, %v2958_v50 }
0x14f2   : > { %v3041_v4 = vpop.f32.mrf.mxu0  ;;  %v3130_v5 = vpop.f32.mrf.mxu1 }
0x14f3   : > { %v3042_v6 = vadd.f32 %v3041_v4, %v2954_v1  ;;  %v3131_v7 = vadd.f32 %v3130_v5, %v2962_v46  ;;  %3296 = vmatprep.mubr.f32.mxu0 %v3146_v54  ;;  %3381 = vmatprep.mubr.f32.mxu1 %v3148_v0  ;;  %v3149_v11 = vmax.f32 %v3040_v29, 0.0  ;;  %v3151_v12 = vmax.f32 %v3129_v48, 0.0 }
0x14f4   : > { %3297 = vmatmul.mubr.f32.vlgmr.msra.gmra.mxu0 %v3145_v3  ;;  %3382 = vmatmul.mubr.f32.vlgmr.msra.gmra.mxu1 %v3147_v22 }
0x14f5   : > { %v3150_v9 = vmax.f32 %v3042_v6, 0.0  ;;  %v3152_v10 = vmax.f32 %v3131_v7, 0.0 }
0x14f7   : > { %3301 = vmatprep.mubr.f32.mxu0 %v3150_v9  ;;  %3386 = vmatprep.mubr.f32.mxu1 %v3152_v10 }
0x14f8   : > { %3302 = vmatmul.mubr.f32.gmra.mxu0 %v3149_v11  ;;  %3387 = vmatmul.mubr.f32.gmra.mxu1 %v3151_v12 }
0x1574   : > { %v3045_v47 = vpop.f32.mrf.mxu0  ;;  %v3134_v59 = vpop.f32.mrf.mxu1 }
0x1575   : > { %v3046_v55 = vadd.f32 %v3045_v47, %v2950_v49  ;;  %v3135_v13 = vadd.f32 %v3134_v59, %v2958_v50 }
0x1576   : > { %v3047_v15 = vpop.f32.mrf.mxu0  ;;  %v3136_v14 = vpop.f32.mrf.mxu1 }
0x1577   : > { %v3048_v60 = vadd.f32 %v3047_v15, %v2954_v1  ;;  %v3137_v42 = vadd.f32 %v3136_v14, %v2962_v46  ;;  %v3153_v24 = vmax.f32 %v3046_v55, 0.0  ;;  %v3155_v25 = vmax.f32 %v3135_v13, 0.0 }
0x1578   : > { %v3051_v44 = vpop.f32.mrf.mxu0  ;;  %v3140_v18 = vpop.f32.mrf.mxu1 }
0x1579   : > { %v3154_v19 = vmax.f32 %v3048_v60, 0.0  ;;  %v3156_v21 = vmax.f32 %v3137_v42, 0.0  ;;  %v3052_v28 = vadd.f32 %v3051_v44, %v2950_v49  ;;  %v3141_v30 = vadd.f32 %v3140_v18, %v2958_v50 }
0x157a   : > { %v3053_v40 = vpop.f32.mrf.mxu0  ;;  %v3142_v31 = vpop.f32.mrf.mxu1 }
0x157b   : > { %v3054_v32 = vadd.f32 %v3053_v40, %v2954_v1  ;;  %v3143_v33 = vadd.f32 %v3142_v31, %v2962_v46  ;;  %3306 = vmatprep.mubr.f32.mxu0 %v3154_v19  ;;  %3391 = vmatprep.mubr.f32.mxu1 %v3156_v21  ;;  %v3157_v36 = vmax.f32 %v3052_v28, 0.0  ;;  %v3159_v37 = vmax.f32 %v3141_v30, 0.0 }
0x157c   : > { %3307 = vmatmul.mubr.f32.gmra.mxu0 %v3153_v24  ;;  %3392 = vmatmul.mubr.f32.gmra.mxu1 %v3155_v25 }
0x157d   : > { %v3158_v34 = vmax.f32 %v3054_v32, 0.0  ;;  %v3160_v35 = vmax.f32 %v3143_v33, 0.0 }
0x157f   : > { %3311 = vmatprep.mubr.f32.mxu0 %v3158_v34  ;;  %3396 = vmatprep.mubr.f32.mxu1 %v3160_v35 }
0x1580   : > { %3312 = vmatmul.mubr.f32.gmra.mxu0 %v3157_v36  ;;  %3397 = vmatmul.mubr.f32.gmra.mxu1 %v3159_v37 }
0x15b4   : > { %v3820_v39 = vpop.f32.mrf.mxu0  ;;  %v3864_v26 = vpop.f32.mrf.mxu1 }
0x15b6   : > { %v3821_v8 = vpop.f32.mrf.mxu0  ;;  %v3865_v61 = vpop.f32.mrf.mxu1 }
0x15b7   : > { %v3822_v2 = vadd.f32 %v3821_v8, %v3820_v39  ;;  %v3866_v50 = vadd.f32 %v3865_v61, %v3864_v26 }
0x15b8   : > { %v3823_v52 = vpop.f32.mrf.mxu0  ;;  %v3867_v23 = vpop.f32.mrf.mxu1 }
0x15b9   : > { %v3299_v49 = vadd.f32 %v3822_v2, %v3653_v43 }
0x15ba   : > { %v3824_v1 = vpop.f32.mrf.mxu0  ;;  %v3868_v46 = vpop.f32.mrf.mxu1 }
0x15bb   : > { %v3384_v16 = vadd.f32 %v3866_v50, %v3299_v49  ;;  %v3825_v51 = vadd.f32 %v3824_v1, %v3823_v52  ;;  %v3869_v57 = vadd.f32 %v3868_v46, %v3867_v23 }
0x15bd   : > { %v3402_v45 = vadd.f32 %v3384_v16, %v5387_v17  ;;  %v3304_v27 = vadd.f32 %v3825_v51, %v3653_v43 }
0x15bf   : > { %3406 = vst [vmem:[%s656_s1] sm:$0xff] %v3402_v45  ;;  %v3389_v53 = vadd.f32 %v3869_v57, %v3304_v27 }
0x15c1   : > { %v3403_v56 = vadd.f32 %v3389_v53, %v5395_v63 }
0x15c3   : > { %3407 = vst [vmem:[%s656_s1 + $0x8] sm:$0xff] %v3403_v56 }
0x163c   : > { %v3826_v20 = vpop.f32.mrf.mxu0  ;;  %v3870_v62 = vpop.f32.mrf.mxu1 }
0x163e   : > { %v3827_v41 = vpop.f32.mrf.mxu0  ;;  %v3871_v54 = vpop.f32.mrf.mxu1 }
0x163f   : > { %v3828_v0 = vadd.f32 %v3827_v41, %v3826_v20  ;;  %v3872_v48 = vadd.f32 %v3871_v54, %v3870_v62 }
0x1640   : > { %v3829_v3 = vpop.f32.mrf.mxu0  ;;  %v3873_v22 = vpop.f32.mrf.mxu1 }
0x1641   : > { %v3309_v29 = vadd.f32 %v3828_v0, %v3653_v43 }
0x1642   : > { %v3830_v17 = vpop.f32.mrf.mxu0  ;;  %v3874_v4 = vpop.f32.mrf.mxu1 }
0x1643   : > { %v3394_v5 = vadd.f32 %v3872_v48, %v3309_v29  ;;  %v3831_v6 = vadd.f32 %v3830_v17, %v3829_v3  ;;  %v3875_v9 = vadd.f32 %v3874_v4, %v3873_v22 }
0x1645   : > { %v3404_v63 = vadd.f32 %v3394_v5, %v5404_v38  ;;  %v3314_v7 = vadd.f32 %v3831_v6, %v3653_v43 }
0x1647   : > { %3408 = vst [vmem:[%s656_s1 + $0x10] sm:$0xff] %v3404_v63  ;;  %v3399_v10 = vadd.f32 %v3875_v9, %v3314_v7 }
0x1649   : > { %v3405_v11 = vadd.f32 %v3399_v10, %v5413_v58 }
0x164b   : > { %3409 = vst [vmem:[%s656_s1 + $0x18] sm:$0xff] %v3405_v11 }
0x164c   : > { %4574 = shalt.err (!%p4571_p13)
}
0x164d   : > { %s4575_s8 = scalar_lea.hbm %s5435_s29, 512  ;;  %s4579_s28 = scalar_lea.hbm %s5552_s0, 1024 }
0x164e   : > { %p4576_p2 = scmp.ne.s32.totalorder %s5435_s29, %s4575_s8  ;;  %p4580_p9 = scmp.lt.s32.totalorder %s5435_s29, %s5552_s0 }
0x164f   : > { %p4581_p10 = scmp.lt.s32.totalorder %s4579_s28, %s4575_s8 }
0x1650   : > { %p4577_p0 = pnand %p4576_p2, %p5553_p4 }
0x1651   : > { %p4582_p12 = por %p4581_p10, %p4580_p9 }
0x1652   : > { %p4578_p5 = pneg %p4577_p0 }
0x1654   : > { %p4583_p11 = pnand %p4582_p12, %p4578_p5 }
0x1656   : > { %4586 = shalt.err (!%p4583_p11)
}
0x1657   : > { %s4663_s20 = smov 128   ;;  %s4664_s18 = smov 8  }
0x1658   : > { %4136 = dma.vmem_to_hbm [thread:$0]  (%p5553_p4), %s5430_s23, 512, %s5435_s29, %s3411_s25, %s4663_s20, %s4663_s20, %s4664_s18  }
0x1659 PF: > { %s3440_s30 = sand.u32 1, %s4629_s21   ;;  %p5554_p7 = scmp.ne.s32.totalorder %s5536_s15, 0 }
0x165a   : > { %p5555_p8 = scmp.ge.s32.totalorder %s4641_s24, 2  ;;  %s3441_s4 = scalar_lea.sflag [#allocation5], %s3440_s30 }
0x165c   : > { %p4168_p1 = pnand %p5555_p8, %p5554_p7 }
0x165e   : > { %p4169_p3 = pneg %p4168_p1 }
0x1660   : > { %4624 = dma.done.wait (%p4169_p3), %s3441_s4, 512  }
0x1661   : > { %4626 = vsyncadd (%p4169_p3), %s3441_s4, 4294966784  ;;  %s5556_s27 = sld [smem:[#allocation25_spill]]  ;;  %p33_p6 = scmp.ge.s32.totalorder %s4888_s19, 4  }
0x1662   : > { %s5557_s23 = sld [smem:[#allocation26_spill]]  ;;  %s5558_s21 = smov %s4633_s22 }
0x1663   : > { %s5560_s24 = smov %s4888_s19  ;;  %35 = sbr.rel (!%p33_p6) target bundleno = 21 (0x15), region = 161 }
0x1667   : > { %s5559_s22 = smov %s5556_s27 }
0x1668   :  { %3446 = vsyncpa [#allocation4], 1 }
0x1669   :  { %3448 = vsyncpa [#allocation4 + $0x1], 1 }
0x166a   :  { %3449 = vsyncpa [#allocation7], 1 }
0x166b   :  { %3450 = vsyncpa [#allocation10], 1 }
0x166c   :  { %3451 = vsyncpa [#allocation13], 1 }
0x166d   :  { %3452 = vsyncpa [#allocation16], 1 }
0x166e   :  { %3453 = vsyncpa [#allocation5], 1 }
0x166f   :  { %3455 = vsyncpa [#allocation5 + $0x1], 1 }

</bundles_post_ra>
